<compile_context>
chip_gen: v7x
topology: tpu7x:2x2x1
jax: 0.10.0
libtpu: 0.0.40
codegen_flags: <defaults>
</compile_context>

<pallas_src>
import functools

import jax
import jax.numpy as jnp
from jax.experimental import pallas as pl
from jax.experimental.pallas import tpu as pltpu

K_PAD = 32  # im2col K padded from 9*3=27 to 32 (sublane/tile friendly)


# ----------------------------------------------------------------------------
# Kernel A: stem conv (im2col matmul) + folded BN + SiLU, tiled over rows.
# ----------------------------------------------------------------------------

def _stem_matmul_kernel(a_ref, w_ref, scale_ref, shift_ref, o_ref):
    # bf16 x bf16 -> f32 on the MXU; BN affine + SiLU epilogue kept in f32.
    y = jnp.dot(a_ref[...], w_ref[...], preferred_element_type=jnp.float32)
    y = y * scale_ref[...] + shift_ref[...]
    y = y * jax.nn.sigmoid(y)                      # SiLU
    o_ref[...] = y.astype(o_ref.dtype)


def stem_conv(patches_bf16, w_bf16, scale, shift, *, tm=256):
    M, K = patches_bf16.shape
    Kw, C = w_bf16.shape
    assert K == Kw
    tm = min(tm, M)
    return pl.pallas_call(
        _stem_matmul_kernel,
        grid=(pl.cdiv(M, tm),),
        in_specs=[
            pl.BlockSpec((tm, K), lambda i: (i, 0)),      # row tile of patches
            pl.BlockSpec((K, C), lambda i: (0, 0)),       # weights stay resident
            pl.BlockSpec((1, C), lambda i: (0, 0)),       # folded BN scale
            pl.BlockSpec((1, C), lambda i: (0, 0)),       # folded BN shift
        ],
        out_specs=pl.BlockSpec((tm, C), lambda i: (i, 0)),
        out_shape=jax.ShapeDtypeStruct((M, C), jnp.bfloat16),
        compiler_params=pltpu.CompilerParams(
            dimension_semantics=("parallel",),
            vmem_limit_bytes=32 * 1024 * 1024,
        ),
    )(patches_bf16, w_bf16, scale.reshape(1, C), shift.reshape(1, C))


# ----------------------------------------------------------------------------
# Kernel B: fused depthwise3x3 -> pointwise1x1 -> head1x1 -> avgpool -> myfc,
#           one grid step per image; taps built in VMEM from a halo tile.
# ----------------------------------------------------------------------------

def _fused_block_kernel(xp_ref, dww_ref, dws_ref, dwb_ref,
                        pww_ref, pws_ref, pwb_ref,
                        hww_ref, hws_ref, hwb_ref,
                        fcw_ref, fcb_ref, o_ref, *, Ho, Wo):
    C1 = dww_ref.shape[1]

    # ---- depthwise 3x3 (halo rows/cols pre-padded) as 9 in-VMEM tap MACs ----
    w = dww_ref[...].astype(jnp.float32).reshape(9, 1, 1, C1)
    acc = jnp.zeros((Ho, Wo, C1), jnp.float32)
    for di in range(3):
        for dj in range(3):
            tap = xp_ref[0, di:di + Ho, dj:dj + Wo, :].astype(jnp.float32)
            acc = acc + tap * w[3 * di + dj]
    y = acc.reshape(Ho * Wo, C1)
    y = y * dws_ref[...] + dwb_ref[...]
    y = y * jax.nn.sigmoid(y)                               # SiLU (f32)

    # ---- pointwise 1x1 expand + BN + SiLU (MXU, bf16 inputs) ----
    pw = jnp.dot(y.astype(jnp.bfloat16), pww_ref[...],
                 preferred_element_type=jnp.float32)
    pw = pw * pws_ref[...] + pwb_ref[...]
    pw = pw * jax.nn.sigmoid(pw)

    # ---- head 1x1 conv to feature width + BN + SiLU ----
    hd = jnp.dot(pw.astype(jnp.bfloat16), hww_ref[...],
                 preferred_element_type=jnp.float32)
    hd = hd * hws_ref[...] + hwb_ref[...]
    hd = hd * jax.nn.sigmoid(hd)                            # [S, C3]

    # ---- global average pool + myfc Linear (never leaves VMEM) ----
    pooled = jnp.mean(hd, axis=0, keepdims=True)            # [1, C3]
    out = jnp.dot(pooled, fcw_ref[...], preferred_element_type=jnp.float32)
    out = out + fcb_ref[...]
    o_ref[...] = out.astype(o_ref.dtype).reshape(o_ref.shape)


def fused_block_head_pool_fc(xp, params):
    B, Hp, Wp, C1 = xp.shape
    Ho, Wo = Hp - 2, Wp - 2
    C2 = params["pw_w"].shape[1]
    C3 = params["head_w"].shape[1]
    O = params["fc_w"].shape[1]

    def const(shape):
        n = len(shape)
        return pl.BlockSpec(shape, lambda b, n=n: (0,) * n)

    kernel = functools.partial(_fused_block_kernel, Ho=Ho, Wo=Wo)
    out = pl.pallas_call(
        kernel,
        grid=(B,),
        in_specs=[
            pl.BlockSpec((1, Hp, Wp, C1), lambda b: (b, 0, 0, 0)),  # halo tile
            const((9, C1)),                       # dw weights
            const((1, C1)), const((1, C1)),       # dw BN scale/shift
            const((C1, C2)),                      # pw weights (bf16, resident)
            const((1, C2)), const((1, C2)),
            const((C2, C3)),                      # head weights (bf16, resident)
            const((1, C3)), const((1, C3)),
            const((C3, O)),                       # myfc weight
            const((1, O)),                        # myfc bias
        ],
        out_specs=pl.BlockSpec((1, 1, O), lambda b: (b, 0, 0)),
        out_shape=jax.ShapeDtypeStruct((B, 1, O), jnp.float32),
        compiler_params=pltpu.CompilerParams(
            dimension_semantics=("parallel",),
            vmem_limit_bytes=32 * 1024 * 1024,
        ),
    )(xp,
      params["dw_w"],
      params["dw_scale"].reshape(1, C1), params["dw_shift"].reshape(1, C1),
      params["pw_w"],
      params["pw_scale"].reshape(1, C2), params["pw_shift"].reshape(1, C2),
      params["head_w"],
      params["head_scale"].reshape(1, C3), params["head_shift"].reshape(1, C3),
      params["fc_w"], params["fc_b"].reshape(1, O))
    return out.reshape(B, O)


# ----------------------------------------------------------------------------
# JAX glue: im2col (pure layout plumbing, no compute)
# ----------------------------------------------------------------------------

def im2col_3x3(x_nhwc, stride, pad, k_pad_to=K_PAD):
    """x:[B,H,W,C] -> patches [B*Ho*Wo, k_pad_to] (tap-major (di,dj,C), K zero-padded)."""
    B, H, W, C = x_nhwc.shape
    xp = jnp.pad(x_nhwc, ((0, 0), (pad, pad), (pad, pad), (0, 0)))
    Ho = (H + 2 * pad - 3) // stride + 1
    Wo = (W + 2 * pad - 3) // stride + 1
    cols = []
    for di in range(3):
        for dj in range(3):
            sl = xp[:, di:di + stride * (Ho - 1) + 1:stride,
                       dj:dj + stride * (Wo - 1) + 1:stride, :]
            cols.append(sl)
    patches = jnp.stack(cols, axis=-2).reshape(B * Ho * Wo, 9 * C)
    if k_pad_to > 9 * C:
        patches = jnp.pad(patches, ((0, 0), (0, k_pad_to - 9 * C)))
    return patches, (B, Ho, Wo)


# ----------------------------------------------------------------------------
# Parameters (deterministic synthetic) + forward
# ----------------------------------------------------------------------------

def init_params(key, in_ch=3, stem_ch=32, mid_ch=64, feat_ch=128, out_dim=5):
    ks = jax.random.split(key, 12)
    k_raw = 9 * in_ch
    stem_w = 0.1 * jax.random.normal(ks[0], (k_raw, stem_ch), jnp.float32)
    stem_w = jnp.pad(stem_w, ((0, K_PAD - k_raw), (0, 0)))   # zero rows 27 -> 32
    p = {
        "stem_w": stem_w.astype(jnp.bfloat16),
        "stem_scale": 1.0 + 0.1 * jax.random.normal(ks[1], (stem_ch,), jnp.float32),
        "stem_shift": 0.05 * jax.random.normal(ks[2], (stem_ch,), jnp.float32),
        "dw_w": 0.1 * jax.random.normal(ks[3], (9, stem_ch), jnp.float32),
        "dw_scale": 1.0 + 0.1 * jax.random.normal(ks[4], (stem_ch,), jnp.float32),
        "dw_shift": 0.05 * jax.random.normal(ks[5], (stem_ch,), jnp.float32),
        "pw_w": (0.1 * jax.random.normal(ks[6], (stem_ch, mid_ch), jnp.float32)
                 ).astype(jnp.bfloat16),
        "pw_scale": 1.0 + 0.1 * jax.random.normal(ks[7], (mid_ch,), jnp.float32),
        "pw_shift": 0.05 * jax.random.normal(ks[8], (mid_ch,), jnp.float32),
        "head_w": (0.1 * jax.random.normal(ks[9], (mid_ch, feat_ch), jnp.float32)
                   ).astype(jnp.bfloat16),
        "head_scale": jnp.ones((feat_ch,), jnp.float32),
        "head_shift": jnp.zeros((feat_ch,), jnp.float32),
        "fc_w": 0.1 * jax.random.normal(ks[10], (feat_ch, out_dim), jnp.float32),
        "fc_b": 0.01 * jax.random.normal(ks[11], (out_dim,), jnp.float32),
    }
    return p


@jax.jit
def enet_v2_forward(x_nchw, params):
    B = x_nchw.shape[0]
    x = jnp.transpose(x_nchw, (0, 2, 3, 1)).astype(jnp.float32)   # NCHW -> NHWC

    # --- stem: conv3x3 s2 + BN + SiLU (row-tiled Pallas matmul, bf16 in) ---
    patches, (_, Ho, Wo) = im2col_3x3(x, stride=2, pad=1)
    stem = stem_conv(patches.astype(jnp.bfloat16), params["stem_w"],
                     params["stem_scale"], params["stem_shift"])
    C1 = params["stem_w"].shape[1]
    stem = stem.reshape(B, Ho, Wo, C1)

    # --- halo pad for the in-kernel depthwise 3x3 (single 1x pad pass) ---
    xp = jnp.pad(stem, ((0, 0), (1, 1), (1, 1), (0, 0)))

    # --- fused dw -> pw -> head -> global avg pool -> myfc (one kernel) ---
    return fused_block_head_pool_fc(xp, params)


# ----------------------------------------------------------------------------
# Pure-JAX reference (same math, f32) for a sanity check
# ----------------------------------------------------------------------------

def enet_v2_reference(x_nchw, params):
    x = jnp.transpose(x_nchw, (0, 2, 3, 1)).astype(jnp.float32)
    B = x.shape[0]
    patches, (_, Ho, Wo) = im2col_3x3(x, stride=2, pad=1)
    y = patches @ params["stem_w"].astype(jnp.float32)
    y = y * params["stem_scale"] + params["stem_shift"]
    y = y * jax.nn.sigmoid(y)
    C1 = y.shape[-1]
    stem = y.reshape(B, Ho, Wo, C1)
    xp = jnp.pad(stem, ((0, 0), (1, 1), (1, 1), (0, 0)))
    acc = jnp.zeros((B, Ho, Wo, C1), jnp.float32)
    w = params["dw_w"]
    for di in range(3):
        for dj in range(3):
            acc = acc + xp[:, di:di + Ho, dj:dj + Wo, :] * w[3 * di + dj]
    y = acc * params["dw_scale"] + params["dw_shift"]
    y = y * jax.nn.sigmoid(y)
    y = y.reshape(B, Ho * Wo, C1)
    pw = jnp.einsum("bsc,cd->bsd", y, params["pw_w"].astype(jnp.float32))
    pw = pw * params["pw_scale"] + params["pw_shift"]
    pw = pw * jax.nn.sigmoid(pw)
    hd = jnp.einsum("bsc,cd->bsd", pw, params["head_w"].astype(jnp.float32))
    hd = hd * params["head_scale"] + params["head_shift"]
    hd = hd * jax.nn.sigmoid(hd)
    pooled = jnp.mean(hd, axis=1)
    return pooled @ params["fc_w"] + params["fc_b"]


if __name__ == "__main__":
    key = jax.random.PRNGKey(0)
    k_x, k_p = jax.random.split(key)
    # small shapes consistent with the module: NCHW image batch
    x = jax.random.normal(k_x, (2, 3, 32, 32), jnp.float32)
    params = init_params(k_p, in_ch=3, stem_ch=32, mid_ch=64, feat_ch=128, out_dim=5)

    y = enet_v2_forward(x, params)
    jax.block_until_ready(y)
    assert y.shape == (2, 5)

    y_ref = enet_v2_reference(x, params)
    max_diff = float(jnp.max(jnp.abs(y - y_ref)))
    assert max_diff < 0.1, f"mismatch vs reference: {max_diff}"

    print("KERNEL_OK")
</pallas_src>

<mosaic_0001>
module attributes {stable_mosaic.version = 11 : i64} {
  func.func @_stem_matmul_kernel(%arg0: i32, %arg1: memref<256x32xbf16, #tpu.memory_space<vmem>>, %arg2: memref<32x32xbf16, #tpu.memory_space<vmem>>, %arg3: memref<1x32xf32, #tpu.memory_space<vmem>>, %arg4: memref<1x32xf32, #tpu.memory_space<vmem>>, %arg5: memref<256x32xbf16, #tpu.memory_space<vmem>>) attributes {dimension_semantics = [#tpu.dimension_semantics<parallel>], iteration_bounds = array<i64: 2>, scalar_prefetch = 0 : i64, scratch_operands = 0 : i64, tpu.core_type = #tpu.core_type<tc>, window_params = [{transform_indices = @transform_0, window_bounds = array<i64: 256, 32>}, {pipeline_mode = #tpu.pipeline_mode<synchronous>, transform_indices = @transform_1, window_bounds = array<i64: 32, 32>}, {pipeline_mode = #tpu.pipeline_mode<synchronous>, transform_indices = @transform_2, window_bounds = array<i64: 1, 32>}, {pipeline_mode = #tpu.pipeline_mode<synchronous>, transform_indices = @transform_3, window_bounds = array<i64: 1, 32>}, {transform_indices = @transform_4, window_bounds = array<i64: 256, 32>}]} {
    %c0 = arith.constant 0 : index
    %c0_0 = arith.constant 0 : index
    %0 = vector.load %arg1[%c0, %c0_0] : memref<256x32xbf16, #tpu.memory_space<vmem>>, vector<256x32xbf16>
    %c0_1 = arith.constant 0 : index
    %c0_2 = arith.constant 0 : index
    %1 = vector.load %arg2[%c0_1, %c0_2] : memref<32x32xbf16, #tpu.memory_space<vmem>>, vector<32x32xbf16>
    %cst = arith.constant dense<0.000000e+00> : vector<256x32xf32>
    %2 = tpu.matmul %0, %1, %cst {dimension_numbers = #tpu.dot_dimension_numbers<[1], [0], [0], [1], [0, 0, 1, 1], [], []>} : vector<256x32xbf16>, vector<32x32xbf16>, vector<256x32xf32> -> vector<256x32xf32>
    %c0_3 = arith.constant 0 : index
    %c0_4 = arith.constant 0 : index
    %3 = vector.load %arg3[%c0_3, %c0_4] : memref<1x32xf32, #tpu.memory_space<vmem>>, vector<1x32xf32>
    %4 = vector.broadcast %3 : vector<1x32xf32> to vector<256x32xf32>
    %5 = arith.mulf %2, %4 : vector<256x32xf32>
    %c0_5 = arith.constant 0 : index
    %c0_6 = arith.constant 0 : index
    %6 = vector.load %arg4[%c0_5, %c0_6] : memref<1x32xf32, #tpu.memory_space<vmem>>, vector<1x32xf32>
    %7 = vector.broadcast %6 : vector<1x32xf32> to vector<256x32xf32>
    %8 = arith.addf %5, %7 : vector<256x32xf32>
    %9 = arith.negf %8 : vector<256x32xf32>
    %10 = math.exp %9 : vector<256x32xf32>
    %cst_7 = arith.constant 1.000000e+00 : f32
    %11 = vector.broadcast %cst_7 : f32 to vector<256x32xf32>
    %12 = arith.addf %11, %10 : vector<256x32xf32>
    %13 = arith.divf %11, %12 : vector<256x32xf32>
    %14 = arith.mulf %8, %13 : vector<256x32xf32>
    %15 = arith.truncf %14 : vector<256x32xf32> to vector<256x32xbf16>
    %c0_8 = arith.constant 0 : index
    %c0_9 = arith.constant 0 : index
    %16 = vector.load %arg5[%c0_8, %c0_9] : memref<256x32xbf16, #tpu.memory_space<vmem>>, vector<256x32xbf16>
    tpu.vector_store %arg5[%c0_8, %c0_9], %15 {strides = array<i32>} : memref<256x32xbf16, #tpu.memory_space<vmem>>, vector<256x32xbf16>,
    return
  }
  func.func @transform_0(%arg0: i32) -> (i32, i32) {
    %c0_i32 = arith.constant 0 : i32
    %c0_i32_0 = arith.constant 0 : i32
    return %arg0, %c0_i32 : i32, i32
  }
  func.func @transform_1(%arg0: i32) -> (i32, i32) {
    %c0_i32 = arith.constant 0 : i32
    %c0_i32_0 = arith.constant 0 : i32
    %c0_i32_1 = arith.constant 0 : i32
    return %c0_i32, %c0_i32_0 : i32, i32
  }
  func.func @transform_2(%arg0: i32) -> (i32, i32) {
    %c0_i32 = arith.constant 0 : i32
    %c0_i32_0 = arith.constant 0 : i32
    %c0_i32_1 = arith.constant 0 : i32
    return %c0_i32, %c0_i32_0 : i32, i32
  }
  func.func @transform_3(%arg0: i32) -> (i32, i32) {
    %c0_i32 = arith.constant 0 : i32
    %c0_i32_0 = arith.constant 0 : i32
    %c0_i32_1 = arith.constant 0 : i32
    return %c0_i32, %c0_i32_0 : i32, i32
  }
  func.func @transform_4(%arg0: i32) -> (i32, i32) {
    %c0_i32 = arith.constant 0 : i32
    %c0_i32_0 = arith.constant 0 : i32
    return %arg0, %c0_i32 : i32, i32
  }
}

module attributes {stable_mosaic.version = 11 : i64} {
  func.func @_fused_block_kernel(%arg0: i32, %arg1: memref<1x18x18x32xbf16, #tpu.memory_space<vmem>>, %arg2: memref<9x32xf32, #tpu.memory_space<vmem>>, %arg3: memref<1x32xf32, #tpu.memory_space<vmem>>, %arg4: memref<1x32xf32, #tpu.memory_space<vmem>>, %arg5: memref<32x64xbf16, #tpu.memory_space<vmem>>, %arg6: memref<1x64xf32, #tpu.memory_space<vmem>>, %arg7: memref<1x64xf32, #tpu.memory_space<vmem>>, %arg8: memref<64x128xbf16, #tpu.memory_space<vmem>>, %arg9: memref<1x128xf32, #tpu.memory_space<vmem>>, %arg10: memref<1x128xf32, #tpu.memory_space<vmem>>, %arg11: memref<128x5xf32, #tpu.memory_space<vmem>>, %arg12: memref<1x5xf32, #tpu.memory_space<vmem>>, %arg13: memref<1x1x5xf32, #tpu.memory_space<vmem>>) attributes {dimension_semantics = [#tpu.dimension_semantics<parallel>], iteration_bounds = array<i64: 2>, scalar_prefetch = 0 : i64, scratch_operands = 0 : i64, tpu.core_type = #tpu.core_type<tc>, window_params = [{transform_indices = @transform_0, window_bounds = array<i64: 1, 18, 18, 32>}, {pipeline_mode = #tpu.pipeline_mode<synchronous>, transform_indices = @transform_1, window_bounds = array<i64: 9, 32>}, {pipeline_mode = #tpu.pipeline_mode<synchronous>, transform_indices = @transform_2, window_bounds = array<i64: 1, 32>}, {pipeline_mode = #tpu.pipeline_mode<synchronous>, transform_indices = @transform_3, window_bounds = array<i64: 1, 32>}, {pipeline_mode = #tpu.pipeline_mode<synchronous>, transform_indices = @transform_4, window_bounds = array<i64: 32, 64>}, {pipeline_mode = #tpu.pipeline_mode<synchronous>, transform_indices = @transform_5, window_bounds = array<i64: 1, 64>}, {pipeline_mode = #tpu.pipeline_mode<synchronous>, transform_indices = @transform_6, window_bounds = array<i64: 1, 64>}, {pipeline_mode = #tpu.pipeline_mode<synchronous>, transform_indices = @transform_7, window_bounds = array<i64: 64, 128>}, {pipeline_mode = #tpu.pipeline_mode<synchronous>, transform_indices = @transform_8, window_bounds = array<i64: 1, 128>}, {pipeline_mode = #tpu.pipeline_mode<synchronous>, transform_indices = @transform_9, window_bounds = array<i64: 1, 128>}, {pipeline_mode = #tpu.pipeline_mode<synchronous>, transform_indices = @transform_10, window_bounds = array<i64: 128, 5>}, {pipeline_mode = #tpu.pipeline_mode<synchronous>, transform_indices = @transform_11, window_bounds = array<i64: 1, 5>}, {transform_indices = @transform_12, window_bounds = array<i64: 1, 1, 5>}]} {
    %c0 = arith.constant 0 : index
    %c0_0 = arith.constant 0 : index
    %0 = vector.load %arg2[%c0, %c0_0] : memref<9x32xf32, #tpu.memory_space<vmem>>, vector<9x32xf32>
    %1 = vector.shape_cast %0 : vector<9x32xf32> to vector<9x1x1x32xf32>
    %cst = arith.constant 0.000000e+00 : f32
    %2 = vector.broadcast %cst : f32 to vector<16x16x32xf32>
    %c0_1 = arith.constant 0 : index
    %c0_2 = arith.constant 0 : index
    %c0_3 = arith.constant 0 : index
    %c0_4 = arith.constant 0 : index
    %3 = vector.load %arg1[%c0_1, %c0_2, %c0_3, %c0_4] : memref<1x18x18x32xbf16, #tpu.memory_space<vmem>>, vector<1x16x16x32xbf16>
    %4 = vector.shape_cast %3 : vector<1x16x16x32xbf16> to vector<16x16x32xbf16>
    %5 = arith.extf %4 : vector<16x16x32xbf16> to vector<16x16x32xf32>
    %6 = vector.extract_strided_slice %1 {offsets = [0, 0, 0, 0], sizes = [1, 1, 1, 32], strides = [1, 1, 1, 1]} : vector<9x1x1x32xf32> to vector<1x1x1x32xf32>
    %7 = vector.shape_cast %6 : vector<1x1x1x32xf32> to vector<1x1x32xf32>
    %8 = vector.broadcast %7 : vector<1x1x32xf32> to vector<16x16x32xf32>
    %9 = arith.mulf %5, %8 : vector<16x16x32xf32>
    %10 = arith.addf %2, %9 : vector<16x16x32xf32>
    %c0_5 = arith.constant 0 : index
    %c0_6 = arith.constant 0 : index
    %c1 = arith.constant 1 : index
    %c0_7 = arith.constant 0 : index
    %11 = vector.load %arg1[%c0_5, %c0_6, %c1, %c0_7] : memref<1x18x18x32xbf16, #tpu.memory_space<vmem>>, vector<1x16x16x32xbf16>
    %12 = vector.shape_cast %11 : vector<1x16x16x32xbf16> to vector<16x16x32xbf16>
    %13 = arith.extf %12 : vector<16x16x32xbf16> to vector<16x16x32xf32>
    %14 = vector.extract_strided_slice %1 {offsets = [1, 0, 0, 0], sizes = [1, 1, 1, 32], strides = [1, 1, 1, 1]} : vector<9x1x1x32xf32> to vector<1x1x1x32xf32>
    %15 = vector.shape_cast %14 : vector<1x1x1x32xf32> to vector<1x1x32xf32>
    %16 = vector.broadcast %15 : vector<1x1x32xf32> to vector<16x16x32xf32>
    %17 = arith.mulf %13, %16 : vector<16x16x32xf32>
    %18 = arith.addf %10, %17 : vector<16x16x32xf32>
    %c0_8 = arith.constant 0 : index
    %c0_9 = arith.constant 0 : index
    %c2 = arith.constant 2 : index
    %c0_10 = arith.constant 0 : index
    %19 = vector.load %arg1[%c0_8, %c0_9, %c2, %c0_10] : memref<1x18x18x32xbf16, #tpu.memory_space<vmem>>, vector<1x16x16x32xbf16>
    %20 = vector.shape_cast %19 : vector<1x16x16x32xbf16> to vector<16x16x32xbf16>
    %21 = arith.extf %20 : vector<16x16x32xbf16> to vector<16x16x32xf32>
    %22 = vector.extract_strided_slice %1 {offsets = [2, 0, 0, 0], sizes = [1, 1, 1, 32], strides = [1, 1, 1, 1]} : vector<9x1x1x32xf32> to vector<1x1x1x32xf32>
    %23 = vector.shape_cast %22 : vector<1x1x1x32xf32> to vector<1x1x32xf32>
    %24 = vector.broadcast %23 : vector<1x1x32xf32> to vector<16x16x32xf32>
    %25 = arith.mulf %21, %24 : vector<16x16x32xf32>
    %26 = arith.addf %18, %25 : vector<16x16x32xf32>
    %c0_11 = arith.constant 0 : index
    %c1_12 = arith.constant 1 : index
    %c0_13 = arith.constant 0 : index
    %c0_14 = arith.constant 0 : index
    %27 = vector.load %arg1[%c0_11, %c1_12, %c0_13, %c0_14] : memref<1x18x18x32xbf16, #tpu.memory_space<vmem>>, vector<1x16x16x32xbf16>
    %28 = vector.shape_cast %27 : vector<1x16x16x32xbf16> to vector<16x16x32xbf16>
    %29 = arith.extf %28 : vector<16x16x32xbf16> to vector<16x16x32xf32>
    %30 = vector.extract_strided_slice %1 {offsets = [3, 0, 0, 0], sizes = [1, 1, 1, 32], strides = [1, 1, 1, 1]} : vector<9x1x1x32xf32> to vector<1x1x1x32xf32>
    %31 = vector.shape_cast %30 : vector<1x1x1x32xf32> to vector<1x1x32xf32>
    %32 = vector.broadcast %31 : vector<1x1x32xf32> to vector<16x16x32xf32>
    %33 = arith.mulf %29, %32 : vector<16x16x32xf32>
    %34 = arith.addf %26, %33 : vector<16x16x32xf32>
    %c0_15 = arith.constant 0 : index
    %c1_16 = arith.constant 1 : index
    %c1_17 = arith.constant 1 : index
    %c0_18 = arith.constant 0 : index
    %35 = vector.load %arg1[%c0_15, %c1_16, %c1_17, %c0_18] : memref<1x18x18x32xbf16, #tpu.memory_space<vmem>>, vector<1x16x16x32xbf16>
    %36 = vector.shape_cast %35 : vector<1x16x16x32xbf16> to vector<16x16x32xbf16>
    %37 = arith.extf %36 : vector<16x16x32xbf16> to vector<16x16x32xf32>
    %38 = vector.extract_strided_slice %1 {offsets = [4, 0, 0, 0], sizes = [1, 1, 1, 32], strides = [1, 1, 1, 1]} : vector<9x1x1x32xf32> to vector<1x1x1x32xf32>
    %39 = vector.shape_cast %38 : vector<1x1x1x32xf32> to vector<1x1x32xf32>
    %40 = vector.broadcast %39 : vector<1x1x32xf32> to vector<16x16x32xf32>
    %41 = arith.mulf %37, %40 : vector<16x16x32xf32>
    %42 = arith.addf %34, %41 : vector<16x16x32xf32>
    %c0_19 = arith.constant 0 : index
    %c1_20 = arith.constant 1 : index
    %c2_21 = arith.constant 2 : index
    %c0_22 = arith.constant 0 : index
    %43 = vector.load %arg1[%c0_19, %c1_20, %c2_21, %c0_22] : memref<1x18x18x32xbf16, #tpu.memory_space<vmem>>, vector<1x16x16x32xbf16>
    %44 = vector.shape_cast %43 : vector<1x16x16x32xbf16> to vector<16x16x32xbf16>
    %45 = arith.extf %44 : vector<16x16x32xbf16> to vector<16x16x32xf32>
    %46 = vector.extract_strided_slice %1 {offsets = [5, 0, 0, 0], sizes = [1, 1, 1, 32], strides = [1, 1, 1, 1]} : vector<9x1x1x32xf32> to vector<1x1x1x32xf32>
    %47 = vector.shape_cast %46 : vector<1x1x1x32xf32> to vector<1x1x32xf32>
    %48 = vector.broadcast %47 : vector<1x1x32xf32> to vector<16x16x32xf32>
    %49 = arith.mulf %45, %48 : vector<16x16x32xf32>
    %50 = arith.addf %42, %49 : vector<16x16x32xf32>
    %c0_23 = arith.constant 0 : index
    %c2_24 = arith.constant 2 : index
    %c0_25 = arith.constant 0 : index
    %c0_26 = arith.constant 0 : index
    %51 = vector.load %arg1[%c0_23, %c2_24, %c0_25, %c0_26] : memref<1x18x18x32xbf16, #tpu.memory_space<vmem>>, vector<1x16x16x32xbf16>
    %52 = vector.shape_cast %51 : vector<1x16x16x32xbf16> to vector<16x16x32xbf16>
    %53 = arith.extf %52 : vector<16x16x32xbf16> to vector<16x16x32xf32>
    %54 = vector.extract_strided_slice %1 {offsets = [6, 0, 0, 0], sizes = [1, 1, 1, 32], strides = [1, 1, 1, 1]} : vector<9x1x1x32xf32> to vector<1x1x1x32xf32>
    %55 = vector.shape_cast %54 : vector<1x1x1x32xf32> to vector<1x1x32xf32>
    %56 = vector.broadcast %55 : vector<1x1x32xf32> to vector<16x16x32xf32>
    %57 = arith.mulf %53, %56 : vector<16x16x32xf32>
    %58 = arith.addf %50, %57 : vector<16x16x32xf32>
    %c0_27 = arith.constant 0 : index
    %c2_28 = arith.constant 2 : index
    %c1_29 = arith.constant 1 : index
    %c0_30 = arith.constant 0 : index
    %59 = vector.load %arg1[%c0_27, %c2_28, %c1_29, %c0_30] : memref<1x18x18x32xbf16, #tpu.memory_space<vmem>>, vector<1x16x16x32xbf16>
    %60 = vector.shape_cast %59 : vector<1x16x16x32xbf16> to vector<16x16x32xbf16>
    %61 = arith.extf %60 : vector<16x16x32xbf16> to vector<16x16x32xf32>
    %62 = vector.extract_strided_slice %1 {offsets = [7, 0, 0, 0], sizes = [1, 1, 1, 32], strides = [1, 1, 1, 1]} : vector<9x1x1x32xf32> to vector<1x1x1x32xf32>
    %63 = vector.shape_cast %62 : vector<1x1x1x32xf32> to vector<1x1x32xf32>
    %64 = vector.broadcast %63 : vector<1x1x32xf32> to vector<16x16x32xf32>
    %65 = arith.mulf %61, %64 : vector<16x16x32xf32>
    %66 = arith.addf %58, %65 : vector<16x16x32xf32>
    %c0_31 = arith.constant 0 : index
    %c2_32 = arith.constant 2 : index
    %c2_33 = arith.constant 2 : index
    %c0_34 = arith.constant 0 : index
    %67 = vector.load %arg1[%c0_31, %c2_32, %c2_33, %c0_34] : memref<1x18x18x32xbf16, #tpu.memory_space<vmem>>, vector<1x16x16x32xbf16>
    %68 = vector.shape_cast %67 : vector<1x16x16x32xbf16> to vector<16x16x32xbf16>
    %69 = arith.extf %68 : vector<16x16x32xbf16> to vector<16x16x32xf32>
    %70 = vector.extract_strided_slice %1 {offsets = [8, 0, 0, 0], sizes = [1, 1, 1, 32], strides = [1, 1, 1, 1]} : vector<9x1x1x32xf32> to vector<1x1x1x32xf32>
    %71 = vector.shape_cast %70 : vector<1x1x1x32xf32> to vector<1x1x32xf32>
    %72 = vector.broadcast %71 : vector<1x1x32xf32> to vector<16x16x32xf32>
    %73 = arith.mulf %69, %72 : vector<16x16x32xf32>
    %74 = arith.addf %66, %73 : vector<16x16x32xf32>
    %75 = vector.shape_cast %74 : vector<16x16x32xf32> to vector<256x32xf32>
    %c0_35 = arith.constant 0 : index
    %c0_36 = arith.constant 0 : index
    %76 = vector.load %arg3[%c0_35, %c0_36] : memref<1x32xf32, #tpu.memory_space<vmem>>, vector<1x32xf32>
    %77 = vector.broadcast %76 : vector<1x32xf32> to vector<256x32xf32>
    %78 = arith.mulf %75, %77 : vector<256x32xf32>
    %c0_37 = arith.constant 0 : index
    %c0_38 = arith.constant 0 : index
    %79 = vector.load %arg4[%c0_37, %c0_38] : memref<1x32xf32, #tpu.memory_space<vmem>>, vector<1x32xf32>
    %80 = vector.broadcast %79 : vector<1x32xf32> to vector<256x32xf32>
    %81 = arith.addf %78, %80 : vector<256x32xf32>
    %82 = arith.negf %81 : vector<256x32xf32>
    %83 = math.exp %82 : vector<256x32xf32>
    %cst_39 = arith.constant 1.000000e+00 : f32
    %84 = vector.broadcast %cst_39 : f32 to vector<256x32xf32>
    %85 = arith.addf %84, %83 : vector<256x32xf32>
    %86 = arith.divf %84, %85 : vector<256x32xf32>
    %87 = arith.mulf %81, %86 : vector<256x32xf32>
    %88 = arith.truncf %87 : vector<256x32xf32> to vector<256x32xbf16>
    %c0_40 = arith.constant 0 : index
    %c0_41 = arith.constant 0 : index
    %89 = vector.load %arg5[%c0_40, %c0_41] : memref<32x64xbf16, #tpu.memory_space<vmem>>, vector<32x64xbf16>
    %cst_42 = arith.constant dense<0.000000e+00> : vector<256x64xf32>
    %90 = tpu.matmul %88, %89, %cst_42 {dimension_numbers = #tpu.dot_dimension_numbers<[1], [0], [0], [1], [0, 0, 1, 1], [], []>} : vector<256x32xbf16>, vector<32x64xbf16>, vector<256x64xf32> -> vector<256x64xf32>
    %c0_43 = arith.constant 0 : index
    %c0_44 = arith.constant 0 : index
    %91 = vector.load %arg6[%c0_43, %c0_44] : memref<1x64xf32, #tpu.memory_space<vmem>>, vector<1x64xf32>
    %92 = vector.broadcast %91 : vector<1x64xf32> to vector<256x64xf32>
    %93 = arith.mulf %90, %92 : vector<256x64xf32>
    %c0_45 = arith.constant 0 : index
    %c0_46 = arith.constant 0 : index
    %94 = vector.load %arg7[%c0_45, %c0_46] : memref<1x64xf32, #tpu.memory_space<vmem>>, vector<1x64xf32>
    %95 = vector.broadcast %94 : vector<1x64xf32> to vector<256x64xf32>
    %96 = arith.addf %93, %95 : vector<256x64xf32>
    %97 = arith.negf %96 : vector<256x64xf32>
    %98 = math.exp %97 : vector<256x64xf32>
    %cst_47 = arith.constant 1.000000e+00 : f32
    %99 = vector.broadcast %cst_47 : f32 to vector<256x64xf32>
    %100 = arith.addf %99, %98 : vector<256x64xf32>
    %101 = arith.divf %99, %100 : vector<256x64xf32>
    %102 = arith.mulf %96, %101 : vector<256x64xf32>
    %103 = arith.truncf %102 : vector<256x64xf32> to vector<256x64xbf16>
    %c0_48 = arith.constant 0 : index
    %c0_49 = arith.constant 0 : index
    %104 = vector.load %arg8[%c0_48, %c0_49] : memref<64x128xbf16, #tpu.memory_space<vmem>>, vector<64x128xbf16>
    %cst_50 = arith.constant dense<0.000000e+00> : vector<256x128xf32>
    %105 = tpu.matmul %103, %104, %cst_50 {dimension_numbers = #tpu.dot_dimension_numbers<[1], [0], [0], [1], [0, 0, 1, 1], [], []>} : vector<256x64xbf16>, vector<64x128xbf16>, vector<256x128xf32> -> vector<256x128xf32>
    %c0_51 = arith.constant 0 : index
    %c0_52 = arith.constant 0 : index
    %106 = vector.load %arg9[%c0_51, %c0_52] : memref<1x128xf32, #tpu.memory_space<vmem>>, vector<1x128xf32>
    %107 = vector.broadcast %106 : vector<1x128xf32> to vector<256x128xf32>
    %108 = arith.mulf %105, %107 : vector<256x128xf32>
    %c0_53 = arith.constant 0 : index
    %c0_54 = arith.constant 0 : index
    %109 = vector.load %arg10[%c0_53, %c0_54] : memref<1x128xf32, #tpu.memory_space<vmem>>, vector<1x128xf32>
    %110 = vector.broadcast %109 : vector<1x128xf32> to vector<256x128xf32>
    %111 = arith.addf %108, %110 : vector<256x128xf32>
    %112 = arith.negf %111 : vector<256x128xf32>
    %113 = math.exp %112 : vector<256x128xf32>
    %cst_55 = arith.constant 1.000000e+00 : f32
    %114 = vector.broadcast %cst_55 : f32 to vector<256x128xf32>
    %115 = arith.addf %114, %113 : vector<256x128xf32>
    %116 = arith.divf %114, %115 : vector<256x128xf32>
    %117 = arith.mulf %111, %116 : vector<256x128xf32>
    %cst_56 = arith.constant dense<0.000000e+00> : vector<128xf32>
    %118 = vector.multi_reduction <add>, %117, %cst_56 [0] : vector<256x128xf32> to vector<128xf32>
    %119 = vector.shape_cast %118 : vector<128xf32> to vector<1x128xf32>
    %cst_57 = arith.constant 2.560000e+02 : f32
    %120 = vector.broadcast %cst_57 : f32 to vector<1x128xf32>
    %121 = arith.divf %119, %120 : vector<1x128xf32>
    %c0_58 = arith.constant 0 : index
    %c0_59 = arith.constant 0 : index
    %122 = vector.load %arg11[%c0_58, %c0_59] : memref<128x5xf32, #tpu.memory_space<vmem>>, vector<128x5xf32>
    %cst_60 = arith.constant dense<0.000000e+00> : vector<1x5xf32>
    %123 = tpu.matmul %121, %122, %cst_60 {dimension_numbers = #tpu.dot_dimension_numbers<[1], [0], [0], [1], [0, 0, 1, 1], [], []>} : vector<1x128xf32>, vector<128x5xf32>, vector<1x5xf32> -> vector<1x5xf32>
    %c0_61 = arith.constant 0 : index
    %c0_62 = arith.constant 0 : index
    %124 = vector.load %arg12[%c0_61, %c0_62] : memref<1x5xf32, #tpu.memory_space<vmem>>, vector<1x5xf32>
    %125 = arith.addf %123, %124 : vector<1x5xf32>
    %126 = vector.shape_cast %125 : vector<1x5xf32> to vector<1x1x5xf32>
    %c0_63 = arith.constant 0 : index
    %c0_64 = arith.constant 0 : index
    %c0_65 = arith.constant 0 : index
    %127 = vector.load %arg13[%c0_63, %c0_64, %c0_65] : memref<1x1x5xf32, #tpu.memory_space<vmem>>, vector<1x1x5xf32>
    tpu.vector_store %arg13[%c0_63, %c0_64, %c0_65], %126 {strides = array<i32>} : memref<1x1x5xf32, #tpu.memory_space<vmem>>, vector<1x1x5xf32>,
    return
  }
  func.func @transform_0(%arg0: i32) -> (i32, i32, i32, i32) {
    %c0_i32 = arith.constant 0 : i32
    %c0_i32_0 = arith.constant 0 : i32
    %c0_i32_1 = arith.constant 0 : i32
    %c0_i32_2 = arith.constant 0 : i32
    return %arg0, %c0_i32, %c0_i32_0, %c0_i32_1 : i32, i32, i32, i32
  }
  func.func @transform_1(%arg0: i32) -> (i32, i32) {
    %c0_i32 = arith.constant 0 : i32
    %c0_i32_0 = arith.constant 0 : i32
    %c0_i32_1 = arith.constant 0 : i32
    return %c0_i32, %c0_i32_0 : i32, i32
  }
  func.func @transform_2(%arg0: i32) -> (i32, i32) {
    %c0_i32 = arith.constant 0 : i32
    %c0_i32_0 = arith.constant 0 : i32
    %c0_i32_1 = arith.constant 0 : i32
    return %c0_i32, %c0_i32_0 : i32, i32
  }
  func.func @transform_3(%arg0: i32) -> (i32, i32) {
    %c0_i32 = arith.constant 0 : i32
    %c0_i32_0 = arith.constant 0 : i32
    %c0_i32_1 = arith.constant 0 : i32
    return %c0_i32, %c0_i32_0 : i32, i32
  }
  func.func @transform_4(%arg0: i32) -> (i32, i32) {
    %c0_i32 = arith.constant 0 : i32
    %c0_i32_0 = arith.constant 0 : i32
    %c0_i32_1 = arith.constant 0 : i32
    return %c0_i32, %c0_i32_0 : i32, i32
  }
  func.func @transform_5(%arg0: i32) -> (i32, i32) {
    %c0_i32 = arith.constant 0 : i32
    %c0_i32_0 = arith.constant 0 : i32
    %c0_i32_1 = arith.constant 0 : i32
    return %c0_i32, %c0_i32_0 : i32, i32
  }
  func.func @transform_6(%arg0: i32) -> (i32, i32) {
    %c0_i32 = arith.constant 0 : i32
    %c0_i32_0 = arith.constant 0 : i32
    %c0_i32_1 = arith.constant 0 : i32
    return %c0_i32, %c0_i32_0 : i32, i32
  }
  func.func @transform_7(%arg0: i32) -> (i32, i32) {
    %c0_i32 = arith.constant 0 : i32
    %c0_i32_0 = arith.constant 0 : i32
    %c0_i32_1 = arith.constant 0 : i32
    return %c0_i32, %c0_i32_0 : i32, i32
  }
  func.func @transform_8(%arg0: i32) -> (i32, i32) {
    %c0_i32 = arith.constant 0 : i32
    %c0_i32_0 = arith.constant 0 : i32
    %c0_i32_1 = arith.constant 0 : i32
    return %c0_i32, %c0_i32_0 : i32, i32
  }
  func.func @transform_9(%arg0: i32) -> (i32, i32) {
    %c0_i32 = arith.constant 0 : i32
    %c0_i32_0 = arith.constant 0 : i32
    %c0_i32_1 = arith.constant 0 : i32
    return %c0_i32, %c0_i32_0 : i32, i32
  }
  func.func @transform_10(%arg0: i32) -> (i32, i32) {
    %c0_i32 = arith.constant 0 : i32
    %c0_i32_0 = arith.constant 0 : i32
    %c0_i32_1 = arith.constant 0 : i32
    return %c0_i32, %c0_i32_0 : i32, i32
  }
  func.func @transform_11(%arg0: i32) -> (i32, i32) {
    %c0_i32 = arith.constant 0 : i32
    %c0_i32_0 = arith.constant 0 : i32
    %c0_i32_1 = arith.constant 0 : i32
    return %c0_i32, %c0_i32_0 : i32, i32
  }
  func.func @transform_12(%arg0: i32) -> (i32, i32, i32) {
    %c0_i32 = arith.constant 0 : i32
    %c0_i32_0 = arith.constant 0 : i32
    %c0_i32_1 = arith.constant 0 : i32
    return %arg0, %c0_i32, %c0_i32_0 : i32, i32, i32
  }
}

</mosaic_0001>

<bundles_post_ra>
// kernel: enet_v2_forward.2
= control target key start
LH: loop header
LB: loop body
LE: loop exit
PB: predicated region body
PF: predicated region fallthrough
CT: control target
= control target key end

     0   :  { %s1447_s15 = smov 0   ;;  %s1806_s0 = inlined_call_operand.vmem [shape: bf16[512,32], index: 0, kind: input, shape index: {}]   ;;  %s1807_s1 = inlined_call_operand.vmem [shape: bf16[32,32], index: 1, kind: input, shape index: {}]   ;;  %s1808_s2 = inlined_call_operand.vmem [shape: f32[1,32], index: 2, kind: input, shape index: {}]   ;;  %s1809_s3 = inlined_call_operand.vmem [shape: f32[1,32], index: 3, kind: input, shape index: {}]   ;;  %s1810_s4 = inlined_call_operand.vmem [shape: bf16[512,32], index: 4, kind: output, shape index: {}]  }
   0x1 LB: > { %s1059_s16 = sadd.s32 4294967295, %s1420_s15   ;;  %p1063_p0 = scmp.ge.s32.totalorder %s1420_s15, 1  ;;  %s1420_s15 = sphi %s1447_s15, %s14_s15  }
   0x2   : > { %p163_p1 = scmp.lt.s32.totalorder %s1420_s15, 3 }
   0x4   : > { %p164_p2 = pnand %p1063_p0, %p163_p1 }
   0x5   : > { %v1268_v0 = vld [vmem:[%s1807_s1] sm:$0xff] (!%p164_p2)   ;;  %s1064_s19 = sshll.u32 (!%p164_p2), %s1059_s16, 5  ;;  %v1269_v1 = vld [vmem:[%s1807_s1 + $0x8] sm:$0xff] (!%p164_p2)   ;;  %vm330_vm0 = vcmask (!%p164_p2), 261120   ;;  %vm970_vm1 = vcmask (!%p164_p2), 257024  }
   0x6   : > { %167 = sbr.rel (%p164_p2) target bundleno = 324 (0x144), region = 36  ;;  %p190_p3 = scmp.lt.s32.totalorder (!%p164_p2), %s1064_s19, 63  ;;  %1220 = vmatprep.subr.bf16.mxu0 (!%p164_p2), %v1268_v0  ;;  %1256 = vmatprep.subr.bf16.mxu1 (!%p164_p2), %v1268_v0  ;;  %v1506_v18 = vld [vmem:[%s1808_s2] ss:$0 sm:$0xff] (!%p164_p2) }
   0x7   : > { %1221 = vmatpush3.bf16.msra.mxu0 (!%p164_p2), %v1268_v0  ;;  %1258 = vmatpush3.bf16.msra.mxu1 (!%p164_p2), %v1268_v0  ;;  %v1511_v20 = vld [vmem:[%s1809_s3] ss:$0 sm:$0xff] (!%p164_p2) }
   0x8   : > { %1222 = vmatprep.subr.bf16.mxu0 (!%p164_p2), %v1269_v1  ;;  %1257 = vmatprep.subr.bf16.mxu1 (!%p164_p2), %v1269_v1 }
   0xb   : > { %1223 = vmatpush3.bf16.msra.mxu0 (!%p164_p2), %v1269_v1  ;;  %1259 = vmatpush3.bf16.msra.mxu1 (!%p164_p2), %v1269_v1 }
   0xd   : > { %s1812_s19 = smov (!%p190_p3, %s1064_s19), 63 }
   0xe   : > { %s1065_s22 = sshll.u32 %s1812_s19, 2 }
   0xf   : > { %s1469_s25 = scalar_lea.vmem %s1806_s0, %s1065_s22  ;;  %s1650_s6 = scalar_lea.vmem %s1810_s4, %s1065_s22 }
  0x10   : > { %v1270_v2 = vld [vmem:[%s1469_s25] sm:$0xff]   ;;  %v1272_v4 = vld [vmem:[%s1469_s25 + $0x8] sm:$0xff]   ;;  %v1274_v6 = vld [vmem:[%s1469_s25 + $0x10] sm:$0xff]  }
  0x11   : > { %v1271_v3 = vld [vmem:[%s1469_s25 + $0x40] sm:$0xff]   ;;  %1224 = vmatprep.mubr.msk.bf16.mxu0 %vm330_vm0, %v1270_v2  ;;  %v1273_v5 = vld [vmem:[%s1469_s25 + $0x48] sm:$0xff]   ;;  %v1275_v7 = vld [vmem:[%s1469_s25 + $0x50] sm:$0xff]  }
  0x12   : > { %1240 = vmatprep.mubr.msk.bf16.mxu1 %vm330_vm0, %v1271_v3  ;;  %1225 = vmatmul.mubr.msk.bf16.vlgmr.msra.gmra.mrb[0].mxu0 %vm330_vm0, %v1272_v4  ;;  %v1276_v8 = vld [vmem:[%s1469_s25 + $0x18] sm:$0xff]   ;;  %v1278_v10 = vld [vmem:[%s1469_s25 + $0x20] sm:$0xff]   ;;  %v1280_v12 = vld [vmem:[%s1469_s25 + $0x28] sm:$0xff]  }
  0x13   : > { %1241 = vmatmul.mubr.msk.bf16.vlgmr.msra.gmra.mrb[0].mxu1 %vm330_vm0, %v1273_v5  ;;  %1228 = vmatprep.mubr.msk.bf16.mxu0 %vm330_vm0, %v1274_v6  ;;  %v1277_v9 = vld [vmem:[%s1469_s25 + $0x58] sm:$0xff]   ;;  %v1279_v11 = vld [vmem:[%s1469_s25 + $0x60] sm:$0xff]   ;;  %v1281_v13 = vld [vmem:[%s1469_s25 + $0x68] sm:$0xff]  }
  0x14   : > { %1244 = vmatprep.mubr.msk.bf16.mxu1 %vm330_vm0, %v1275_v7  ;;  %v1282_v14 = vld [vmem:[%s1469_s25 + $0x30] sm:$0xff]   ;;  %v1284_v16 = vld [vmem:[%s1469_s25 + $0x38] sm:$0xff]  }
  0x15   : > { %v1283_v15 = vld [vmem:[%s1469_s25 + $0x70] sm:$0xff]   ;;  %v1285_v17 = vld [vmem:[%s1469_s25 + $0x78] sm:$0xff]  }
  0x1a   : > { %1229 = vmatmul.mubr.msk.bf16.gmra.mrb[4].mxu0 %vm330_vm0, %v1276_v8 }
  0x1b   : > { %1245 = vmatmul.mubr.msk.bf16.gmra.mrb[4].mxu1 %vm330_vm0, %v1277_v9  ;;  %1232 = vmatprep.mubr.msk.bf16.mxu0 %vm330_vm0, %v1278_v10 }
  0x1c   : > { %1248 = vmatprep.mubr.msk.bf16.mxu1 %vm330_vm0, %v1279_v11 }
  0x22   : > { %1233 = vmatmul.mubr.msk.bf16.gmra.mrb[8].mxu0 %vm330_vm0, %v1280_v12 }
  0x23   : > { %1249 = vmatmul.mubr.msk.bf16.gmra.mrb[8].mxu1 %vm330_vm0, %v1281_v13  ;;  %1236 = vmatprep.mubr.msk.bf16.mxu0 %vm330_vm0, %v1282_v14 }
  0x24   : > { %1252 = vmatprep.mubr.msk.bf16.mxu1 %vm330_vm0, %v1283_v15 }
  0x2a   : > { %1237 = vmatmul.mubr.msk.bf16.gmra.mrb[12].mxu0 %vm330_vm0, %v1284_v16 }
  0x2b   : > { %1253 = vmatmul.mubr.msk.bf16.gmra.mrb[12].mxu1 %vm330_vm0, %v1285_v17 }
  0xe5   : > { %v1226_v19 = vpop.f32.mrb[0].mxu0 }
  0xe6   : > { %v549_v21 = vmul.f32 %v1226_v19, %v1506_v18  ;;  %v1242_v22 = vpop.f32.mrb[0].mxu1  ;;  %v413_v23 = vpop.f32.mrb[1].mxu0 }
  0xe7   : > { %v565_v24 = vmul.f32 %v1242_v22, %v1506_v18  ;;  %v547_v25 = vmul.f32 %v1506_v18, %v413_v23  ;;  %v477_v26 = vpop.f32.mrb[1].mxu1  ;;  %v1227_v27 = vpop.f32.mrb[2].mxu0 }
  0xe8   : > { %v1517_v28 = vadd.f32 %v1511_v20, %v549_v21  ;;  %v563_v29 = vmul.f32 %v1506_v18, %v477_v26  ;;  %v550_v30 = vmul.f32 %v1227_v27, %v1506_v18  ;;  %v1243_v31 = vpop.f32.mrb[2].mxu1  ;;  %v416_v32 = vpop.f32.mrb[3].mxu0 }
  0xe9   : > { %v1522_v33 = vadd.f32 %v1511_v20, %v565_v24  ;;  %v1525_v34 = vadd.f32 %v1511_v20, %v547_v25  ;;  %v566_v35 = vmul.f32 %v1243_v31, %v1506_v18  ;;  %v548_v36 = vmul.f32 %v1506_v18, %v416_v32  ;;  %v480_v37 = vpop.f32.mrb[3].mxu1 }
  0xea   : > { %v1106_v38 = vmul.f32 -1.442695, %v1517_v28  ;;  %v1531_v39 = vadd.f32 %v1511_v20, %v563_v29  ;;  %v1534_v40 = vadd.f32 %v1511_v20, %v550_v30  ;;  %v564_v41 = vmul.f32 %v1506_v18, %v480_v37 }
  0xeb   : > { %v1122_v42 = vmul.f32 -1.442695, %v1522_v33  ;;  %v1104_v43 = vmul.f32 -1.442695, %v1525_v34  ;;  %v1540_v44 = vadd.f32 %v1511_v20, %v566_v35  ;;  %v1543_v45 = vadd.f32 %v1511_v20, %v548_v36 }
  0xec   : > { %1286 = vpow2.f32 %v1106_v38  ;;  %v1120_v46 = vmul.f32 -1.442695, %v1531_v39  ;;  %v1107_v47 = vmul.f32 -1.442695, %v1534_v40  ;;  %v1548_v48 = vadd.f32 %v1511_v20, %v564_v41 }
  0xed   : > { %1288 = vpow2.f32 %v1122_v42  ;;  %v1123_v49 = vmul.f32 -1.442695, %v1540_v44  ;;  %v1230_v50 = vpop.f32.mrb[4].mxu0  ;;  %v1105_v51 = vmul.f32 -1.442695, %v1543_v45 }
  0xee   : > { %1290 = vpow2.f32 %v1104_v43  ;;  %v553_v52 = vmul.f32 %v1230_v50, %v1506_v18  ;;  %v1246_v53 = vpop.f32.mrb[4].mxu1  ;;  %v429_v54 = vpop.f32.mrb[5].mxu0  ;;  %v1121_v55 = vmul.f32 -1.442695, %v1548_v48 }
  0xef   : > { %1292 = vpow2.f32 %v1120_v46  ;;  %v569_v56 = vmul.f32 %v1246_v53, %v1506_v18  ;;  %v551_v57 = vmul.f32 %v1506_v18, %v429_v54  ;;  %v493_v58 = vpop.f32.mrb[5].mxu1  ;;  %v1231_v59 = vpop.f32.mrb[6].mxu0 }
  0xf0   : > { %1294 = vpow2.f32 %v1107_v47  ;;  %v1557_v60 = vadd.f32 %v1511_v20, %v553_v52  ;;  %v567_v61 = vmul.f32 %v1506_v18, %v493_v58  ;;  %v554_v62 = vmul.f32 %v1231_v59, %v1506_v18  ;;  %v1247_v63 = vpop.f32.mrb[6].mxu1  ;;  %v432_v0 = vpop.f32.mrb[7].mxu0 }
  0xf1   : > { %1296 = vpow2.f32 %v1123_v49  ;;  %v1562_v1 = vadd.f32 %v1511_v20, %v569_v56  ;;  %v1565_v2 = vadd.f32 %v1511_v20, %v551_v57  ;;  %v570_v3 = vmul.f32 %v1247_v63, %v1506_v18  ;;  %v496_v4 = vpop.f32.mrb[7].mxu1 }
  0xf2   : > { %1298 = vpow2.f32 %v1105_v51  ;;  %v1110_v5 = vmul.f32 -1.442695, %v1557_v60  ;;  %v1570_v6 = vadd.f32 %v1511_v20, %v567_v61  ;;  %v1573_v7 = vadd.f32 %v1511_v20, %v554_v62 }
  0xf3   : > { %1300 = vpow2.f32 %v1121_v55  ;;  %v1126_v8 = vmul.f32 -1.442695, %v1562_v1  ;;  %v1108_v9 = vmul.f32 -1.442695, %v1565_v2  ;;  %v1580_v12 = vadd.f32 %v1511_v20, %v570_v3 }
  0xf4   : > { %1302 = vpow2.f32 %v1110_v5  ;;  %v1124_v10 = vmul.f32 -1.442695, %v1570_v6  ;;  %v1111_v11 = vmul.f32 -1.442695, %v1573_v7  ;;  %v552_v21 = vmul.f32 %v1506_v18, %v432_v0 }
  0xf5   : > { %1304 = vpow2.f32 %v1126_v8  ;;  %v1234_v13 = vpop.f32.mrb[8].mxu0  ;;  %v568_v26 = vmul.f32 %v1506_v18, %v496_v4  ;;  %v1587_v32 = vmul.f32 -1.442695, %v1580_v12 }
  0xf6   : > { %v1287_v14 = vpop.eup %1286  ;;  %1306 = vpow2.f32 %v1108_v9  ;;  %v1250_v15 = vpop.f32.mrb[8].mxu1  ;;  %v557_v35 = vmul.f32 %v1234_v13, %v1506_v18  ;;  %v1595_v47 = vadd.f32 %v1511_v20, %v552_v21 }
  0xf7   : > { %v445_v16 = vpop.f32.mrb[9].mxu0  ;;  %v1289_v17 = vpop.eup %1288  ;;  %v716_v19 = vadd.f32 1.0, %v1287_v14  ;;  %1308 = vpow2.f32 %v1124_v10  ;;  %v573_v41 = vmul.f32 %v1250_v15, %v1506_v18  ;;  %v1599_v52 = vadd.f32 %v1511_v20, %v568_v26 }
  0xf8   : > { %v509_v22 = vpop.f32.mrb[9].mxu1  ;;  %v1235_v23 = vpop.f32.mrb[10].mxu0  ;;  %v732_v25 = vadd.f32 1.0, %v1289_v17  ;;  %1310 = vpow2.f32 %v1111_v11  ;;  %v555_v42 = vmul.f32 %v1506_v18, %v445_v16  ;;  %v1603_v56 = vadd.f32 %v1511_v20, %v557_v35 }
  0xf9   : > { %v1291_v24 = vpop.eup %1290  ;;  %v1251_v27 = vpop.f32.mrb[10].mxu1  ;;  %1312 = vrcp.f32 %v716_v19  ;;  %v571_v49 = vmul.f32 %v1506_v18, %v509_v22  ;;  %v558_v53 = vmul.f32 %v1235_v23, %v1506_v18  ;;  %v1607_v62 = vadd.f32 %v1511_v20, %v573_v41 }
  0xfa   : > { %v1584_v29 = vpop.f32.mrb[11].mxu0  ;;  %v1293_v30 = vpop.eup %1292  ;;  %v714_v31 = vadd.f32 1.0, %v1291_v24  ;;  %1314 = vrcp.f32 %v732_v25  ;;  %v574_v57 = vmul.f32 %v1251_v27, %v1506_v18  ;;  %v1610_v63 = vadd.f32 %v1511_v20, %v555_v42 }
  0xfb   : > { %v1590_v36 = vpop.f32.mrb[11].mxu1  ;;  %v1295_v37 = vpop.eup %1294  ;;  %v730_v38 = vadd.f32 1.0, %v1293_v30  ;;  %v1109_v8 = vmul.f32 -1.442695, %v1595_v47  ;;  %v1616_v9 = vadd.f32 %v1511_v20, %v571_v49  ;;  %v1125_v15 = vmul.f32 -1.442695, %v1599_v52 }
  0xfc   : > { %v1297_v43 = vpop.eup %1296  ;;  %1316 = vrcp.f32 %v714_v31  ;;  %v717_v46 = vadd.f32 1.0, %v1295_v37  ;;  %v1624_v16 = vadd.f32 %v1511_v20, %v558_v53  ;;  %v1114_v23 = vmul.f32 -1.442695, %v1603_v56 }
  0xfd   : > { %v1299_v50 = vpop.eup %1298  ;;  %1318 = vrcp.f32 %v730_v38  ;;  %v733_v51 = vadd.f32 1.0, %v1297_v43  ;;  %v1238_v58 = vpop.f32.mrb[12].mxu0  ;;  %v1632_v24 = vadd.f32 %v1511_v20, %v574_v57  ;;  %v1130_v30 = vmul.f32 -1.442695, %v1607_v62 }
  0xfe   : > { %v1301_v54 = vpop.eup %1300  ;;  %1320 = vrcp.f32 %v717_v46  ;;  %v715_v55 = vadd.f32 1.0, %v1299_v50  ;;  %v1254_v0 = vpop.f32.mrb[12].mxu1  ;;  %v1112_v31 = vmul.f32 -1.442695, %v1610_v63  ;;  %v1128_v38 = vmul.f32 -1.442695, %v1616_v9 }
  0xff   : > { %v1303_v59 = vpop.eup %1302  ;;  %1322 = vrcp.f32 %v733_v51  ;;  %v731_v61 = vadd.f32 1.0, %v1301_v54  ;;  %v1612_v3 = vpop.f32.mrb[13].mxu0  ;;  %v556_v41 = vmul.f32 %v1506_v18, %v1584_v29  ;;  %v1115_v46 = vmul.f32 -1.442695, %v1624_v16 }
 0x100   : > { %v1305_v4 = vpop.eup %1304  ;;  %1324 = vrcp.f32 %v715_v55  ;;  %v720_v5 = vadd.f32 1.0, %v1303_v59  ;;  %v1618_v10 = vpop.f32.mrb[13].mxu1  ;;  %v572_v49 = vmul.f32 %v1506_v18, %v1590_v36  ;;  %v1131_v29 = vmul.f32 -1.442695, %v1632_v24 }
 0x101   : > { %v1620_v11 = vpop.f32.mrb[14].mxu0  ;;  %v1307_v13 = vpop.eup %1306  ;;  %1326 = vrcp.f32 %v731_v61  ;;  %v736_v14 = vadd.f32 1.0, %v1305_v4  ;;  %v577_v55 = vmul.f32 %v1254_v0, %v1506_v18 }
 0x102   : > { %v1626_v17 = vpop.f32.mrb[14].mxu1  ;;  %v1628_v19 = vpop.f32.mrb[15].mxu0  ;;  %1328 = vrcp.f32 %v720_v5  ;;  %v718_v22 = vadd.f32 1.0, %v1307_v13 }
 0x103   : > { %v1309_v21 = vpop.eup %1308  ;;  %v1634_v25 = vpop.f32.mrb[15].mxu1  ;;  %1330 = vrcp.f32 %v736_v14 }
 0x104   : > { %v1311_v26 = vpop.eup %1310  ;;  %v734_v27 = vadd.f32 1.0, %v1309_v21  ;;  %1332 = vrcp.f32 %v718_v22 }
 0x105   : > { %v1313_v35 = vpop.eup %1312  ;;  %v721_v37 = vadd.f32 1.0, %v1311_v26 }
 0x106   : > { %v1315_v42 = vpop.eup %1314  ;;  %v812_v43 = vmul.f32 %v1313_v35, %v1517_v28  ;;  %1334 = vrcp.f32 %v734_v27  ;;  %v561_v28 = vmul.f32 %v1238_v58, %v1506_v18 }
 0x107   : > { %v1317_v50 = vpop.eup %1316  ;;  %v828_v51 = vmul.f32 %v1315_v42, %v1522_v33  ;;  %1336 = vrcp.f32 %v721_v37  ;;  %v1660_v33 = vadd.f32 %v1511_v20, %v556_v41 }
 0x108   : > { %v1319_v53 = vpop.eup %1318  ;;  %v1172_v54 = vpack.c.bf16 %v812_v43, %v812_v43  ;;  %v810_v36 = vmul.f32 %v1317_v50, %v1525_v34  ;;  %1338 = vpow2.f32 %v1587_v32  ;;  %v1666_v34 = vadd.f32 %v1511_v20, %v572_v49 }
 0x109   : > { %v1321_v57 = vpop.eup %1320  ;;  %v1188_v59 = vpack.c.bf16 %v828_v51, %v828_v51  ;;  %v826_v61 = vmul.f32 %v1319_v53, %v1531_v39  ;;  %1340 = vpow2.f32 %v1109_v8  ;;  %v1672_v8 = vadd.f32 %v1511_v20, %v561_v28 }
 0x10a   : > { %v1323_v4 = vpop.eup %1322  ;;  %973 = vst.msk [vmem:[%s1650_s6 + $0x8] sm:$0xf] %vm970_vm1, %v1172_v54  ;;  %v1170_v58 = vpack.c.bf16 %v810_v36, %v810_v36  ;;  %v813_v5 = vmul.f32 %v1321_v57, %v1534_v40  ;;  %1342 = vpow2.f32 %v1125_v15  ;;  %v1678_v15 = vadd.f32 %v1511_v20, %v577_v55 }
 0x10b   : > { %v1325_v32 = vpop.eup %1324  ;;  %989 = vst.msk [vmem:[%s1650_s6 + $0x48] sm:$0xf] %vm970_vm1, %v1188_v59  ;;  %v1186_v39 = vpack.c.bf16 %v826_v61, %v826_v61  ;;  %v829_v0 = vmul.f32 %v1323_v4, %v1540_v44  ;;  %1344 = vpow2.f32 %v1114_v23  ;;  %v1113_v23 = vmul.f32 -1.442695, %v1660_v33 }
 0x10c   : > { %v1327_v13 = vpop.eup %1326  ;;  %971 = vst.msk [vmem:[%s1650_s6] sm:$0xf] %vm970_vm1, %v1170_v58  ;;  %v1173_v40 = vpack.c.bf16 %v813_v5, %v813_v5  ;;  %v811_v14 = vmul.f32 %v1325_v32, %v1543_v45  ;;  %1346 = vpow2.f32 %v1130_v30  ;;  %v1129_v30 = vmul.f32 -1.442695, %v1666_v34 }
 0x10d   : > { %v1329_v21 = vpop.eup %1328  ;;  %987 = vst.msk [vmem:[%s1650_s6 + $0x40] sm:$0xf] %vm970_vm1, %v1186_v39  ;;  %v1189_v44 = vpack.c.bf16 %v829_v0, %v829_v0  ;;  %v827_v22 = vmul.f32 %v1327_v13, %v1548_v48  ;;  %1348 = vpow2.f32 %v1112_v31  ;;  %v1118_v31 = vmul.f32 -1.442695, %v1672_v8 }
 0x10e   : > { %v1331_v26 = vpop.eup %1330  ;;  %974 = vst.msk [vmem:[%s1650_s6 + $0xc] sm:$0xf] %vm970_vm1, %v1173_v40  ;;  %v1171_v27 = vpack.c.bf16 %v811_v14, %v811_v14  ;;  %v816_v45 = vmul.f32 %v1329_v21, %v1557_v60  ;;  %1350 = vpow2.f32 %v1128_v38  ;;  %v1134_v38 = vmul.f32 -1.442695, %v1678_v15 }
 0x10f   : > { %v1333_v35 = vpop.eup %1332  ;;  %990 = vst.msk [vmem:[%s1650_s6 + $0x4c] sm:$0xf] %vm970_vm1, %v1189_v44  ;;  %v1187_v37 = vpack.c.bf16 %v827_v22, %v827_v22  ;;  %v832_v48 = vmul.f32 %v1331_v26, %v1562_v1  ;;  %1352 = vpow2.f32 %v1115_v46  ;;  %v559_v59 = vmul.f32 %v1506_v18, %v1612_v3 }
 0x110   : > { %v1335_v41 = vpop.eup %1334  ;;  %972 = vst.msk [vmem:[%s1650_s6 + $0x4] sm:$0xf] %vm970_vm1, %v1171_v27  ;;  %v1176_v42 = vpack.c.bf16 %v816_v45, %v816_v45  ;;  %v814_v60 = vmul.f32 %v1333_v35, %v1565_v2  ;;  %1354 = vpow2.f32 %v1131_v29  ;;  %v575_v58 = vmul.f32 %v1506_v18, %v1618_v10 }
 0x111   : > { %v1337_v43 = vpop.eup %1336  ;;  %988 = vst.msk [vmem:[%s1650_s6 + $0x44] sm:$0xf] %vm970_vm1, %v1187_v37  ;;  %v1192_v49 = vpack.c.bf16 %v832_v48, %v832_v48  ;;  %v830_v1 = vmul.f32 %v1335_v41, %v1570_v6  ;;  %1356 = vpow2.f32 %v1113_v23  ;;  %v562_v39 = vmul.f32 %v1620_v11, %v1506_v18 }
 0x112   : > { %v1339_v46 = vpop.eup %1338  ;;  %977 = vst.msk [vmem:[%s1650_s6 + $0x18] sm:$0xf] %vm970_vm1, %v1176_v42  ;;  %v1174_v50 = vpack.c.bf16 %v814_v60, %v814_v60  ;;  %v817_v51 = vmul.f32 %v1337_v43, %v1573_v7  ;;  %1358 = vpow2.f32 %v1129_v30  ;;  %v578_v40 = vmul.f32 %v1626_v17, %v1506_v18 }
 0x113   : > { %v1341_v2 = vpop.eup %1340  ;;  %993 = vst.msk [vmem:[%s1650_s6 + $0x58] sm:$0xf] %vm970_vm1, %v1192_v49  ;;  %v1190_v29 = vpack.c.bf16 %v830_v1, %v830_v1  ;;  %v737_v28 = vadd.f32 1.0, %v1339_v46  ;;  %1360 = vpow2.f32 %v1118_v31  ;;  %v1719_v21 = vadd.f32 %v1511_v20, %v559_v59 }
 0x114   : > { %v1343_v53 = vpop.eup %1342  ;;  %975 = vst.msk [vmem:[%s1650_s6 + $0x10] sm:$0xf] %vm970_vm1, %v1174_v50  ;;  %v1177_v6 = vpack.c.bf16 %v817_v51, %v817_v51  ;;  %v719_v54 = vadd.f32 1.0, %v1341_v2  ;;  %1362 = vpow2.f32 %v1134_v38  ;;  %v560_v10 = vmul.f32 %v1506_v18, %v1628_v19 }
 0x115   : > { %v1345_v36 = vpop.eup %1344  ;;  %991 = vst.msk [vmem:[%s1650_s6 + $0x50] sm:$0xf] %vm970_vm1, %v1190_v29  ;;  %1364 = vrcp.f32 %v737_v28  ;;  %v735_v55 = vadd.f32 1.0, %v1343_v53  ;;  %v1724_v11 = vadd.f32 %v1511_v20, %v575_v58  ;;  %v576_v23 = vmul.f32 %v1506_v18, %v1634_v25 }
 0x116   : > { %v1347_v7 = vpop.eup %1346  ;;  %978 = vst.msk [vmem:[%s1650_s6 + $0x1c] sm:$0xf] %vm970_vm1, %v1177_v6  ;;  %1366 = vrcp.f32 %v719_v54  ;;  %v724_v57 = vadd.f32 1.0, %v1345_v36  ;;  %v1729_v27 = vadd.f32 %v1511_v20, %v562_v39  ;;  %v1732_v19 = vadd.f32 %v1511_v20, %v578_v40 }
 0x117   : > { %v1349_v61 = vpop.eup %1348  ;;  %1368 = vrcp.f32 %v735_v55  ;;  %v740_v4 = vadd.f32 1.0, %v1347_v7  ;;  %v1116_v48 = vmul.f32 -1.442695, %v1719_v21  ;;  %v1736_v31 = vadd.f32 %v1511_v20, %v560_v10 }
 0x118   : > { %v1351_v5 = vpop.eup %1350  ;;  %1370 = vrcp.f32 %v724_v57  ;;  %v722_v32 = vadd.f32 1.0, %v1349_v61  ;;  %v1132_v41 = vmul.f32 -1.442695, %v1724_v11  ;;  %v1740_v42 = vadd.f32 %v1511_v20, %v576_v23 }
 0x119   : > { %v1353_v0 = vpop.eup %1352  ;;  %1372 = vrcp.f32 %v740_v4  ;;  %v738_v13 = vadd.f32 1.0, %v1351_v5  ;;  %v1119_v43 = vmul.f32 -1.442695, %v1729_v27  ;;  %v1135_v46 = vmul.f32 -1.442695, %v1732_v19 }
 0x11a   : > { %v1355_v14 = vpop.eup %1354  ;;  %1374 = vrcp.f32 %v722_v32  ;;  %v725_v3 = vadd.f32 1.0, %v1353_v0  ;;  %v1117_v20 = vmul.f32 -1.442695, %v1736_v31  ;;  %v1133_v53 = vmul.f32 -1.442695, %v1740_v42 }
 0x11b   : > { %v1357_v44 = vpop.eup %1356  ;;  %1376 = vrcp.f32 %v738_v13  ;;  %v741_v22 = vadd.f32 1.0, %v1355_v14 }
 0x11c   : > { %v1359_v26 = vpop.eup %1358  ;;  %1378 = vrcp.f32 %v725_v3  ;;  %v723_v17 = vadd.f32 1.0, %v1357_v44 }
 0x11d   : > { %v1361_v45 = vpop.eup %1360  ;;  %1380 = vrcp.f32 %v741_v22  ;;  %v739_v30 = vadd.f32 1.0, %v1359_v26 }
 0x11e   : > { %v1363_v35 = vpop.eup %1362  ;;  %1382 = vrcp.f32 %v723_v17  ;;  %v728_v37 = vadd.f32 1.0, %v1361_v45 }
 0x11f   : > { %v1365_v18 = vpop.eup %1364  ;;  %1384 = vrcp.f32 %v739_v30  ;;  %v744_v25 = vadd.f32 1.0, %v1363_v35 }
 0x120   : > { %v1367_v60 = vpop.eup %1366  ;;  %v833_v38 = vmul.f32 %v1365_v18, %v1580_v12  ;;  %1386 = vrcp.f32 %v728_v37 }
 0x121   : > { %v1369_v49 = vpop.eup %1368  ;;  %v815_v1 = vmul.f32 %v1367_v60, %v1595_v47  ;;  %1388 = vrcp.f32 %v744_v25 }
 0x122   : > { %v1371_v50 = vpop.eup %1370  ;;  %v1193_v51 = vpack.c.bf16 %v833_v38, %v833_v38  ;;  %v831_v2 = vmul.f32 %v1369_v49, %v1599_v52  ;;  %1390 = vpow2.f32 %v1116_v48 }
 0x123   : > { %v1373_v29 = vpop.eup %1372  ;;  %v1175_v12 = vpack.c.bf16 %v815_v1, %v815_v1  ;;  %v820_v28 = vmul.f32 %v1371_v50, %v1603_v56  ;;  %1392 = vpow2.f32 %v1132_v41 }
 0x124   : > { %v1375_v47 = vpop.eup %1374  ;;  %994 = vst.msk [vmem:[%s1650_s6 + $0x5c] sm:$0xf] %vm970_vm1, %v1193_v51  ;;  %v1191_v6 = vpack.c.bf16 %v831_v2, %v831_v2  ;;  %v836_v54 = vmul.f32 %v1373_v29, %v1607_v62  ;;  %1394 = vpow2.f32 %v1119_v43 }
 0x125   : > { %v1377_v52 = vpop.eup %1376  ;;  %976 = vst.msk [vmem:[%s1650_s6 + $0x14] sm:$0xf] %vm970_vm1, %v1175_v12  ;;  %v1180_v36 = vpack.c.bf16 %v820_v28, %v820_v28  ;;  %v818_v55 = vmul.f32 %v1375_v47, %v1610_v63  ;;  %1396 = vpow2.f32 %v1135_v46 }
 0x126   : > { %v1379_v56 = vpop.eup %1378  ;;  %992 = vst.msk [vmem:[%s1650_s6 + $0x54] sm:$0xf] %vm970_vm1, %v1191_v6  ;;  %v1196_v7 = vpack.c.bf16 %v836_v54, %v836_v54  ;;  %v834_v57 = vmul.f32 %v1377_v52, %v1616_v9  ;;  %1398 = vpow2.f32 %v1117_v20 }
 0x127   : > { %v1381_v59 = vpop.eup %1380  ;;  %981 = vst.msk [vmem:[%s1650_s6 + $0x28] sm:$0xf] %vm970_vm1, %v1180_v36  ;;  %v1178_v62 = vpack.c.bf16 %v818_v55, %v818_v55  ;;  %v821_v61 = vmul.f32 %v1379_v56, %v1624_v16  ;;  %1400 = vpow2.f32 %v1133_v53 }
 0x128   : > { %v1383_v4 = vpop.eup %1382  ;;  %997 = vst.msk [vmem:[%s1650_s6 + $0x68] sm:$0xf] %vm970_vm1, %v1196_v7  ;;  %v1194_v63 = vpack.c.bf16 %v834_v57, %v834_v57  ;;  %v837_v58 = vmul.f32 %v1381_v59, %v1632_v24 }
 0x129   : > { %v1385_v5 = vpop.eup %1384  ;;  %979 = vst.msk [vmem:[%s1650_s6 + $0x20] sm:$0xf] %vm970_vm1, %v1178_v62  ;;  %v1181_v9 = vpack.c.bf16 %v821_v61, %v821_v61  ;;  %v819_v32 = vmul.f32 %v1383_v4, %v1660_v33 }
 0x12a   : > { %v1387_v39 = vpop.eup %1386  ;;  %995 = vst.msk [vmem:[%s1650_s6 + $0x60] sm:$0xf] %vm970_vm1, %v1194_v63  ;;  %v1197_v16 = vpack.c.bf16 %v837_v58, %v837_v58  ;;  %v835_v0 = vmul.f32 %v1385_v5, %v1666_v34 }
 0x12b   : > { %v1389_v13 = vpop.eup %1388  ;;  %982 = vst.msk [vmem:[%s1650_s6 + $0x2c] sm:$0xf] %vm970_vm1, %v1181_v9  ;;  %v1179_v40 = vpack.c.bf16 %v819_v32, %v819_v32  ;;  %v824_v24 = vmul.f32 %v1387_v39, %v1672_v8 }
 0x12c   : > { %v1391_v14 = vpop.eup %1390  ;;  %998 = vst.msk [vmem:[%s1650_s6 + $0x6c] sm:$0xf] %vm970_vm1, %v1197_v16  ;;  %v1195_v3 = vpack.c.bf16 %v835_v0, %v835_v0  ;;  %v840_v33 = vmul.f32 %v1389_v13, %v1678_v15 }
 0x12d   : > { %v1393_v10 = vpop.eup %1392  ;;  %980 = vst.msk [vmem:[%s1650_s6 + $0x24] sm:$0xf] %vm970_vm1, %v1179_v40  ;;  %v1184_v44 = vpack.c.bf16 %v824_v24, %v824_v24  ;;  %v726_v22 = vadd.f32 1.0, %v1391_v14 }
 0x12e   : > { %v1395_v34 = vpop.eup %1394  ;;  %996 = vst.msk [vmem:[%s1650_s6 + $0x64] sm:$0xf] %vm970_vm1, %v1195_v3  ;;  %v1200_v23 = vpack.c.bf16 %v840_v33, %v840_v33  ;;  %v742_v26 = vadd.f32 1.0, %v1393_v10 }
 0x12f   : > { %v1397_v17 = vpop.eup %1396  ;;  %985 = vst.msk [vmem:[%s1650_s6 + $0x38] sm:$0xf] %vm970_vm1, %v1184_v44  ;;  %1402 = vrcp.f32 %v726_v22  ;;  %v729_v8 = vadd.f32 1.0, %v1395_v34 }
 0x130   : > { %v1399_v45 = vpop.eup %1398  ;;  %1001 = vst.msk [vmem:[%s1650_s6 + $0x78] sm:$0xf] %vm970_vm1, %v1200_v23  ;;  %1404 = vrcp.f32 %v742_v26  ;;  %v745_v15 = vadd.f32 1.0, %v1397_v17 }
 0x131   : > { %v1401_v30 = vpop.eup %1400  ;;  %1406 = vrcp.f32 %v729_v8  ;;  %v727_v35 = vadd.f32 1.0, %v1399_v45 }
 0x132   : > { %1408 = vrcp.f32 %v745_v15  ;;  %v743_v37 = vadd.f32 1.0, %v1401_v30 }
 0x133   : > { %1410 = vrcp.f32 %v727_v35 }
 0x134   : > { %1412 = vrcp.f32 %v743_v37 }
 0x139   : > { %v1403_v48 = vpop.eup %1402 }
 0x13a   : > { %v1405_v18 = vpop.eup %1404  ;;  %v822_v25 = vmul.f32 %v1403_v48, %v1719_v21 }
 0x13b   : > { %v1407_v41 = vpop.eup %1406  ;;  %v838_v60 = vmul.f32 %v1405_v18, %v1724_v11 }
 0x13c   : > { %v1409_v38 = vpop.eup %1408  ;;  %v1182_v43 = vpack.c.bf16 %v822_v25, %v822_v25  ;;  %v825_v49 = vmul.f32 %v1407_v41, %v1729_v27 }
 0x13d   : > { %v1411_v1 = vpop.eup %1410  ;;  %v1198_v46 = vpack.c.bf16 %v838_v60, %v838_v60  ;;  %v841_v50 = vmul.f32 %v1409_v38, %v1732_v19 }
 0x13e   : > { %v1413_v51 = vpop.eup %1412  ;;  %983 = vst.msk [vmem:[%s1650_s6 + $0x30] sm:$0xf] %vm970_vm1, %v1182_v43  ;;  %v1185_v2 = vpack.c.bf16 %v825_v49, %v825_v49  ;;  %v823_v21 = vmul.f32 %v1411_v1, %v1736_v31 }
 0x13f   : > { %999 = vst.msk [vmem:[%s1650_s6 + $0x70] sm:$0xf] %vm970_vm1, %v1198_v46  ;;  %v1201_v11 = vpack.c.bf16 %v841_v50, %v841_v50  ;;  %v839_v20 = vmul.f32 %v1413_v51, %v1740_v42 }
 0x140   : > { %986 = vst.msk [vmem:[%s1650_s6 + $0x3c] sm:$0xf] %vm970_vm1, %v1185_v2  ;;  %v1183_v29 = vpack.c.bf16 %v823_v21, %v823_v21 }
 0x141   : > { %1002 = vst.msk [vmem:[%s1650_s6 + $0x7c] sm:$0xf] %vm970_vm1, %v1201_v11  ;;  %v1199_v27 = vpack.c.bf16 %v839_v20, %v839_v20 }
 0x142   : > { %984 = vst.msk [vmem:[%s1650_s6 + $0x34] sm:$0xf] %vm970_vm1, %v1183_v29 }
 0x143   : > { %1000 = vst.msk [vmem:[%s1650_s6 + $0x74] sm:$0xf] %vm970_vm1, %v1199_v27 }
 0x144 PF: > { %s14_s15 = sadd.s32 1, %s1420_s15  }
 0x145   : > { %p11_p4 = scmp.ge.s32.totalorder %s14_s15, 4  }
 0x147   :  { %13 = sbr.rel (!%p11_p4) target bundleno = 1 (0x1), region = 66 }

// kernel: enet_v2_forward.3
= control target key start
LH: loop header
LB: loop body
LE: loop exit
PB: predicated region body
PF: predicated region fallthrough
CT: control target
= control target key end

     0   :  { %s6841_s0 = inlined_call_operand.vmem [shape: bf16[2,18,18,32], index: 0, kind: input, shape index: {}]   ;;  %s6842_s1 = inlined_call_operand.vmem [shape: f32[9,32], index: 1, kind: input, shape index: {}]   ;;  %s6843_s2 = inlined_call_operand.vmem [shape: f32[1,32], index: 2, kind: input, shape index: {}]   ;;  %s6844_s3 = inlined_call_operand.vmem [shape: f32[1,32], index: 3, kind: input, shape index: {}]   ;;  %s6845_s4 = inlined_call_operand.vmem [shape: bf16[32,64], index: 4, kind: input, shape index: {}]   ;;  %s6846_s5 = inlined_call_operand.vmem [shape: f32[1,64], index: 5, kind: input, shape index: {}]   ;;  %s6847_s6 = inlined_call_operand.vmem [shape: f32[1,64], index: 6, kind: input, shape index: {}]   ;;  %s6848_s7 = inlined_call_operand.vmem [shape: bf16[64,128], index: 7, kind: input, shape index: {}]   ;;  %s6849_s8 = inlined_call_operand.vmem [shape: f32[1,128], index: 8, kind: input, shape index: {}]   ;;  %s6850_s9 = inlined_call_operand.vmem [shape: f32[1,128], index: 9, kind: input, shape index: {}]   ;;  %s6851_s10 = inlined_call_operand.vmem [shape: f32[128,5], index: 10, kind: input, shape index: {}]   ;;  %s6852_s11 = inlined_call_operand.vmem [shape: f32[1,5], index: 11, kind: input, shape index: {}]   ;;  %s6853_s12 = inlined_call_operand.hbm [shape: f32[2,1,5], index: 12, kind: output, shape index: {}]  }
   0x1   :  { %6854 = sst [smem:[#allocation5_spill]] %s6841_s0 }
   0x2   :  { %6855 = sst [smem:[#allocation6_spill]] %s6842_s1 }
   0x3   :  { %17 = vsyncpa [#allocation3], 0 }
   0x4   :  { %19 = vsyncpa [#allocation3 + $0x1], 0  ;;  %s5233_s21 = smov 0   ;;  %s5235_s22 = smov 0  }
   0x5   :  { %s5237_s23 = smov 0   ;;  %s5239_s24 = smov 0  }
   0x6 LB: > { %s5254_s25 = sadd.s32 4294967295, %s5162_s24   ;;  %s4072_s26 = sadd.s32 4294967294, %s5162_s24   ;;  %s5162_s24 = sphi %s5239_s24, %s6863_s24   ;;  %s5158_s23 = sphi %s5237_s23, %s6862_s23   ;;  %s5154_s22 = sphi %s5235_s22, %s6861_s22   ;;  %s5150_s21 = sphi %s5233_s21, %s6860_s21  }
   0x7   : > { %s5258_s27 = sadd.s32 1, %s5162_s24   ;;  %s289_s28 = sadd.s32 1, %s5158_s23 }
   0x8   : > { %s286_s29 = ssub.s32 %s5162_s24, %s5258_s27  ;;  %p299_p0 = scmp.ne.s32.totalorder %s5158_s23, %s5154_s22 }
   0x9   : > { %p287_p1 = scmp.eq.s32.totalorder %s286_s29, 0  ;;  %p300_p2 = scmp.eq.s32.totalorder %s5254_s25, 1 }
   0xa   : > { %p305_p3 = scmp.ne.s32.totalorder %s5154_s22, %s5150_s21  ;;  %p306_p4 = scmp.eq.s32.totalorder %s4072_s26, 1 }
   0xb   : > { %s5269_s30 = scalar_select %p287_p1, %s5158_s23, %s289_s28  }
   0xc   : > { %p5271_p5 = por %p300_p2, %p299_p0  ;;  %p5275_p6 = por %p306_p4, %p305_p3 }
   0xd   : > { %p4075_p7 = scmp.ge.s32.totalorder %s5162_s24, 1  ;;  %p365_p8 = scmp.lt.s32.totalorder %s5162_s24, 3 }
   0xf   : > { %p366_p9 = pnand %p4075_p7, %p365_p8 }
  0x10   : > { %v4701_v0 = vld [vmem:[%s6845_s4] sm:$0xff] (!%p366_p9)   ;;  %p406_p10 = scmp.lt.s32.totalorder (!%p366_p9), %s5254_s25, 1  ;;  %v478_v1 = vlaneseq (!%p366_p9)  ;;  %v4702_v2 = vld [vmem:[%s6845_s4 + $0x8] sm:$0xff] (!%p366_p9)   ;;  %s6858_s1 = sld [smem:[#allocation6_spill]] (!%p366_p9)  ;;  %vm678_vm0 = vcmask (!%p366_p9), 1046528   ;;  %vm955_vm1 = vcmask (!%p366_p9), 1045504  }
  0x11   : > { %369 = sbr.rel (%p366_p9) target bundleno = 1188 (0x4a4), region = 68  ;;  %4523 = vmatprep.subr.bf16.mxu0 (!%p366_p9), %v4701_v0  ;;  %s6859_s0 = sld [smem:[#allocation5_spill]] (!%p366_p9)  ;;  %vm2804_vm2 = vcmask (!%p366_p9), 261120   ;;  %vm3364_vm3 = vcmask (!%p366_p9), 523264   ;;  %vm5165_vm4 = vmmov (!%p366_p9), 0   ;;  %vm4002_vm5 = vcmask (!%p366_p9), 32768  }
  0x12   : > { %v479_v3 = vshrl.u32 (!%p366_p9), %v478_v1, 7  ;;  %4524 = vmatpush3.bf16.msra.mxu0 (!%p366_p9), %v4701_v0 }
  0x13   : > { %4525 = vmatprep.subr.bf16.mxu0 (!%p366_p9), %v4702_v2 }
  0x14   : > { %v480_v5 = vsub.s32 (!%p366_p9), 0, %v479_v3  ;;  %v580_v6 = vsub.s32 (!%p366_p9), 1, %v479_v3  ;;  %v857_v7 = vsub.s32 (!%p366_p9), 2, %v479_v3  ;;  %v1167_v8 = vsub.s32 (!%p366_p9), 3, %v479_v3 }
  0x15   : > { %v1267_v9 = vsub.s32 (!%p366_p9), 4, %v479_v3  ;;  %v1543_v10 = vsub.s32 (!%p366_p9), 5, %v479_v3  ;;  %v1852_v11 = vsub.s32 (!%p366_p9), 6, %v479_v3  ;;  %v1952_v12 = vsub.s32 (!%p366_p9), 7, %v479_v3 }
  0x16   : > { %v412_v4 = vld [vmem:[%s6858_s1] sm:$0xff] (!%p366_p9)  ;;  %4526 = vmatpush3.bf16.msra.mxu0 (!%p366_p9), %v4702_v2 }
  0x17   : > { %v5297_v13 = vrot.slane (!%p366_p9), %v412_v4, %v480_v5  ;;  %v5299_v14 = vrot.slane (!%p366_p9), %v412_v4, %v580_v6  ;;  %v5301_v15 = vrot.slane (!%p366_p9), %v412_v4, %v857_v7  ;;  %v5303_v16 = vrot.slane (!%p366_p9), %v412_v4, %v1167_v8 }
  0x18   : > { %s407_s19 = scalar_select %p406_p10, %s5254_s25, 1  ;;  %v5308_v20 = vrot.slane %v412_v4, %v1267_v9  ;;  %v5310_v21 = vrot.slane %v412_v4, %v1543_v10  ;;  %v5312_v22 = vrot.slane %v412_v4, %v1852_v11  ;;  %v5314_v23 = vrot.slane %v412_v4, %v1952_v12 }
  0x1a   : > { %s4658_s28 = smul.u32 216, %s407_s19  ;;  %s404_s19 = sand.u32 1, %s5154_s22  }
  0x1b   : > { %s405_s29 = scalar_lea.vmem [#allocation2], %s404_s19  ;;  %s4005_s20 = scalar_lea.sflag [#allocation3], %s404_s19 }
  0x1c   : > { %s5295_s16 = scalar_lea.vmem %s6859_s0, %s4658_s28  ;;  %s4346_s28 = sshll.u32 %s5254_s25, 4 }
  0x1d   : > { %v4350_v17 = vld [vmem:[%s5295_s16] sm:$0xff]   ;;  %v546_v18 = vld [vmem:[%s5295_s16 + $0x8] sm:$0x1]  ;;  %v4077_v28 = vld [vmem:[%s5295_s16 + $0xc] sm:$0xff]   ;;  %s4017_s15 = sshll.u32 %s405_s29, 4  ;;  %s6799_s18 = scalar_lea.hbm %s6853_s12, %s4346_s28  ;;  %s6801_s15 = int_to_ptr.vmem [resolvable:$true] %s4017_s15 }
  0x1e   : > { %v823_v19 = vld [vmem:[%s5295_s16] sm:$0xe]  ;;  %v4351_v24 = vunpack.c.l.bf16 %v4350_v17  ;;  %v4352_v25 = vunpack.c.h.bf16 %v4350_v17  ;;  %v562_v26 = vunpack.c.l.bf16 %v546_v18  ;;  %v4109_v29 = vld [vmem:[%s5295_s16 + $0x14] sm:$0x1]  ;;  %v4125_v30 = vld [vmem:[%s5295_s16 + $0xc] sm:$0xe]  ;;  %v1133_v31 = vunpack.c.l.bf16 %v4077_v28 }
  0x1f   : > { %v839_v27 = vunpack.c.l.bf16 %v823_v19  ;;  %v1134_v32 = vunpack.c.h.bf16 %v4077_v28  ;;  %v1249_v33 = vunpack.c.l.bf16 %v4109_v29  ;;  %v1525_v34 = vunpack.c.l.bf16 %v4125_v30  ;;  %v4460_v59 = vld [vmem:[%s5295_s16 + $0x18] sm:$0xff]   ;;  %v4173_v4 = vld [vmem:[%s5295_s16 + $0x20] sm:$0x1]  ;;  %v5348_v17 = vld [vmem:[%s6858_s1 + $0x8] ss:$0 sm:$0xff]  ;;  %s5100_s26 = scalar_lea.vmem %s6801_s15, 16 }
  0x20   : > { %v482_v35 = vmul.f32 %v4351_v24, %v5297_v13  ;;  %v483_v36 = vmul.f32 %v4352_v25, %v5297_v13  ;;  %v582_v37 = vmul.f32 %v4351_v24, %v5299_v14  ;;  %v583_v38 = vmul.f32 %v4352_v25, %v5299_v14  ;;  %p5101_p11 = scmp.ne.s32.totalorder %s6801_s15, %s5100_s26  ;;  %s5167_s25 = smov [#allocation2]  }
  0x21   : > { %v584_v39 = vmul.f32 %v5299_v14, %v562_v26  ;;  %v859_v40 = vmul.f32 %v5301_v15, %v839_v27  ;;  %v860_v41 = vmul.f32 %v4352_v25, %v5301_v15  ;;  %v861_v42 = vmul.f32 %v5301_v15, %v562_v26  ;;  %v4189_v26 = vld [vmem:[%s5295_s16 + $0x18] sm:$0xe]  ;;  %s5104_s0 = sshll.u32 %s5167_s25, 4  ;;  %s5105_s0 = int_to_ptr.vmem [resolvable:$false] %s5104_s0 }
  0x22   : > { %v679_v43 = vrot.slane %v582_v37, 1  ;;  %v680_v44 = vrot.slane %v583_v38, 1  ;;  %v1169_v45 = vmul.f32 %v5303_v16, %v1133_v31  ;;  %v1170_v46 = vmul.f32 %v5303_v16, %v1134_v32  ;;  %p5102_p12 = pnand %p5101_p11, %p5271_p5  ;;  %p5107_p0 = scmp.lt.s32.totalorder %s6801_s15, %s5105_s0 }
  0x23   : > { %v682_v47 = vrot.slane %v584_v39, 1  ;;  %v956_v48 = vrot.slane %v859_v40, 2  ;;  %v957_v49 = vrot.slane %v860_v41, 2  ;;  %v959_v50 = vrot.slane %v861_v42, 2 }
  0x24   : > { %v681_v51 = vsel %vm678_vm0, %v679_v43, %v680_v44  ;;  %v1269_v52 = vmul.f32 %v5308_v20, %v1133_v31  ;;  %v1270_v53 = vmul.f32 %v5308_v20, %v1134_v32  ;;  %v1271_v54 = vmul.f32 %v5308_v20, %v1249_v33  ;;  %p5103_p13 = pneg %p5102_p12 }
  0x25   : > { %v683_v55 = vsel %vm678_vm0, %v680_v44, %v682_v47  ;;  %v791_v56 = vadd.f32 %v681_v51, %v482_v35  ;;  %v958_v57 = vsel %vm955_vm1, %v956_v48, %v957_v49  ;;  %v960_v58 = vsel %vm955_vm1, %v957_v49, %v959_v50  ;;  %v416_v35 = vld [vmem:[%s5295_s16 + $0xc] sm:$0xff]   ;;  %v547_v48 = vld [vmem:[%s5295_s16 + $0x14] sm:$0x1] }
  0x26   : > { %v792_v60 = vadd.f32 %v683_v55, %v483_v36  ;;  %v1365_v61 = vrot.slane %v1269_v52, 1  ;;  %v1366_v62 = vrot.slane %v1270_v53, 1  ;;  %v1368_v63 = vrot.slane %v1271_v54, 1  ;;  %v824_v53 = vld [vmem:[%s5295_s16 + $0xc] sm:$0xe] }
  0x27   : > { %v1068_v0 = vadd.f32 %v958_v57, %v791_v56  ;;  %v1545_v1 = vmul.f32 %v5310_v21, %v1525_v34  ;;  %v1546_v2 = vmul.f32 %v5310_v21, %v1134_v32  ;;  %v1547_v3 = vmul.f32 %v5310_v21, %v1249_v33 }
  0x28   : > { %v1069_v5 = vadd.f32 %v960_v58, %v792_v60  ;;  %v1367_v6 = vsel %vm678_vm0, %v1365_v61, %v1366_v62  ;;  %v1369_v7 = vsel %vm678_vm0, %v1366_v62, %v1368_v63  ;;  %v5343_v8 = vunpack.c.l.bf16 %v4460_v59  ;;  %v5380_v63 = vld [vmem:[%s6843_s2] ss:$0 sm:$0xff] }
  0x29   : > { %v1201_v9 = vadd.f32 %v1169_v45, %v1068_v0  ;;  %v1641_v10 = vrot.slane %v1545_v1, 2  ;;  %v1642_v11 = vrot.slane %v1546_v2, 2  ;;  %v1644_v12 = vrot.slane %v1547_v3, 2 }
  0x2a   : > { %v1202_v18 = vadd.f32 %v1170_v46, %v1069_v5  ;;  %v5350_v19 = vunpack.c.h.bf16 %v4460_v59  ;;  %v1854_v24 = vmul.f32 %v5343_v8, %v5312_v22  ;;  %v1934_v25 = vunpack.c.l.bf16 %v4173_v4 }
  0x2b   : > { %v1477_v27 = vadd.f32 %v1367_v6, %v1201_v9  ;;  %v1643_v28 = vsel %vm955_vm1, %v1641_v10, %v1642_v11  ;;  %v1645_v29 = vsel %vm955_vm1, %v1642_v11, %v1644_v12  ;;  %v1954_v30 = vmul.f32 %v5343_v8, %v5314_v23 }
  0x2c   : > { %v1478_v31 = vadd.f32 %v1369_v7, %v1202_v18  ;;  %v1855_v32 = vmul.f32 %v5350_v19, %v5312_v22  ;;  %v1955_v33 = vmul.f32 %v5350_v19, %v5314_v23  ;;  %v1956_v34 = vmul.f32 %v5314_v23, %v1934_v25  ;;  %v5388_v7 = vld [vmem:[%s6844_s3] ss:$0 sm:$0xff] }
  0x2d   : > { %v1753_v36 = vadd.f32 %v1643_v28, %v1477_v27  ;;  %v2050_v37 = vrot.slane %v1954_v30, 1  ;;  %v2210_v38 = vunpack.c.l.bf16 %v4189_v26  ;;  %v2231_v39 = vmul.f32 %v5350_v19, %v5348_v17 }
  0x2e   : > { %v1754_v40 = vadd.f32 %v1645_v29, %v1478_v31  ;;  %v2051_v41 = vrot.slane %v1955_v33, 1  ;;  %v2053_v42 = vrot.slane %v1956_v34, 1  ;;  %v2232_v43 = vmul.f32 %v5348_v17, %v1934_v25  ;;  %v4110_v31 = vld [vmem:[%s5295_s16 + $0x20] sm:$0x1] }
  0x2f   : > { %v1886_v44 = vadd.f32 %v1854_v24, %v1753_v36  ;;  %v2230_v45 = vmul.f32 %v5348_v17, %v2210_v38  ;;  %v2327_v46 = vrot.slane %v2231_v39, 2  ;;  %v448_v47 = vunpack.c.l.bf16 %v416_v35  ;;  %v4126_v36 = vld [vmem:[%s5295_s16 + $0x18] sm:$0xe] }
  0x30   : > { %v1887_v49 = vadd.f32 %v1855_v32, %v1754_v40  ;;  %v2052_v50 = vsel %vm678_vm0, %v2050_v37, %v2051_v41  ;;  %v2054_v51 = vsel %vm678_vm0, %v2051_v41, %v2053_v42  ;;  %v2329_v52 = vrot.slane %v2232_v43, 2 }
  0x31   : > { %v2162_v54 = vadd.f32 %v2052_v50, %v1886_v44  ;;  %v2326_v55 = vrot.slane %v2230_v45, 2  ;;  %v449_v56 = vunpack.c.h.bf16 %v416_v35  ;;  %v484_v57 = vmul.f32 %v5297_v13, %v448_v47 }
  0x32   : > { %v2163_v58 = vadd.f32 %v2054_v51, %v1887_v49  ;;  %v2330_v59 = vsel %vm955_vm1, %v2327_v46, %v2329_v52  ;;  %v563_v60 = vunpack.c.l.bf16 %v547_v48  ;;  %v585_v61 = vmul.f32 %v5299_v14, %v448_v47  ;;  %v4143_v52 = vld [vmem:[%s5295_s16 + $0x24] sm:$0xff]  }
  0x33   : > { %v2328_v62 = vsel %vm955_vm1, %v2326_v55, %v2327_v46  ;;  %v485_v0 = vmul.f32 %v5297_v13, %v449_v56  ;;  %v586_v1 = vmul.f32 %v5299_v14, %v449_v56  ;;  %v840_v2 = vunpack.c.l.bf16 %v824_v53  ;;  %v4174_v53 = vld [vmem:[%s5295_s16 + $0x2c] sm:$0x1] }
  0x34   : > { %v2438_v3 = vadd.f32 %v2328_v62, %v2162_v54  ;;  %v2439_v4 = vadd.f32 %v2330_v59, %v2163_v58  ;;  %v587_v5 = vmul.f32 %v5299_v14, %v563_v60  ;;  %v684_v6 = vrot.slane %v585_v61, 1 }
  0x35   : > { %v685_v9 = vrot.slane %v586_v1, 1  ;;  %v862_v10 = vmul.f32 %v5301_v15, %v840_v2  ;;  %v863_v11 = vmul.f32 %v5301_v15, %v449_v56  ;;  %v864_v12 = vmul.f32 %v5301_v15, %v563_v60 }
  0x36   : > { %v2477_v18 = vmul.f32 %v5380_v63, %v2438_v3  ;;  %v2478_v24 = vmul.f32 %v5380_v63, %v2439_v4  ;;  %v687_v25 = vrot.slane %v587_v5, 1  ;;  %v1171_v26 = vmul.f32 %v5343_v8, %v5303_v16 }
  0x37   : > { %v686_v27 = vsel %vm678_vm0, %v684_v6, %v685_v9  ;;  %v961_v28 = vrot.slane %v862_v10, 2  ;;  %v962_v29 = vrot.slane %v863_v11, 2  ;;  %v964_v30 = vrot.slane %v864_v12, 2  ;;  %v4190_v6 = vld [vmem:[%s5295_s16 + $0x24] sm:$0xe] }
  0x38   : > { %v5400_v32 = vadd.f32 %v5388_v7, %v2477_v18  ;;  %v5403_v33 = vadd.f32 %v5388_v7, %v2478_v24  ;;  %v688_v34 = vsel %vm678_vm0, %v685_v9, %v687_v25  ;;  %v793_v35 = vadd.f32 %v686_v27, %v484_v57 }
  0x39   : > { %v794_v37 = vadd.f32 %v688_v34, %v485_v0  ;;  %v963_v38 = vsel %vm955_vm1, %v961_v28, %v962_v29  ;;  %v965_v39 = vsel %vm955_vm1, %v962_v29, %v964_v30  ;;  %v1172_v40 = vmul.f32 %v5350_v19, %v5303_v16 }
  0x3a   : > { %v4208_v41 = vmul.f32 -1.442695, %v5400_v32  ;;  %v4209_v42 = vmul.f32 -1.442695, %v5403_v33  ;;  %v1070_v43 = vadd.f32 %v963_v38, %v793_v35  ;;  %v1250_v44 = vunpack.c.l.bf16 %v4110_v31 }
  0x3b   : > { %v1071_v45 = vadd.f32 %v965_v39, %v794_v37  ;;  %v1272_v46 = vmul.f32 %v5343_v8, %v5308_v20  ;;  %v1273_v47 = vmul.f32 %v5350_v19, %v5308_v20  ;;  %v1526_v48 = vunpack.c.l.bf16 %v4126_v36 }
  0x3c   : > { %4707 = vpow2.f32 %v4208_v41  ;;  %v1203_v49 = vadd.f32 %v1171_v26, %v1070_v43  ;;  %v1274_v50 = vmul.f32 %v5308_v20, %v1250_v44  ;;  %v1549_v51 = vmul.f32 %v5350_v19, %v5310_v21  ;;  %v548_v41 = vld [vmem:[%s5295_s16 + $0x20] sm:$0x1] }
  0x3d   : > { %4709 = vpow2.f32 %v4209_v42  ;;  %v1204_v54 = vadd.f32 %v1172_v40, %v1071_v45  ;;  %v1370_v55 = vrot.slane %v1272_v46, 1  ;;  %v1371_v56 = vrot.slane %v1273_v47, 1 }
  0x3e   : > { %v1373_v57 = vrot.slane %v1274_v50, 1  ;;  %v1548_v58 = vmul.f32 %v5310_v21, %v1526_v48  ;;  %v1550_v59 = vmul.f32 %v5310_v21, %v1250_v44  ;;  %v1647_v60 = vrot.slane %v1549_v51, 2 }
  0x3f   : > { %v1372_v61 = vsel %vm678_vm0, %v1370_v55, %v1371_v56  ;;  %v1820_v62 = vunpack.c.l.bf16 %v4143_v52  ;;  %v1821_v0 = vunpack.c.h.bf16 %v4143_v52  ;;  %v1935_v1 = vunpack.c.l.bf16 %v4174_v53 }
  0x40   : > { %v1374_v2 = vsel %vm678_vm0, %v1371_v56, %v1373_v57  ;;  %v1479_v3 = vadd.f32 %v1372_v61, %v1203_v49  ;;  %v1646_v4 = vrot.slane %v1548_v58, 2  ;;  %v1649_v5 = vrot.slane %v1550_v59, 2  ;;  %v825_v56 = vld [vmem:[%s5295_s16 + $0x18] sm:$0xe] }
  0x41   : > { %v1480_v9 = vadd.f32 %v1374_v2, %v1204_v54  ;;  %v1856_v10 = vmul.f32 %v5312_v22, %v1820_v62  ;;  %v1857_v11 = vmul.f32 %v5312_v22, %v1821_v0  ;;  %v1957_v12 = vmul.f32 %v5314_v23, %v1820_v62 }
  0x42   : > { %v1648_v18 = vsel %vm955_vm1, %v1646_v4, %v1647_v60  ;;  %v1650_v24 = vsel %vm955_vm1, %v1647_v60, %v1649_v5  ;;  %v1958_v25 = vmul.f32 %v5314_v23, %v1821_v0  ;;  %v1959_v26 = vmul.f32 %v5314_v23, %v1935_v1 }
  0x43   : > { %v1755_v27 = vadd.f32 %v1648_v18, %v1479_v3  ;;  %v1756_v28 = vadd.f32 %v1650_v24, %v1480_v9  ;;  %v2055_v29 = vrot.slane %v1957_v12, 1  ;;  %v2211_v30 = vunpack.c.l.bf16 %v4190_v6 }
  0x44   : > { %v2056_v31 = vrot.slane %v1958_v25, 1  ;;  %v2058_v34 = vrot.slane %v1959_v26, 1  ;;  %v2234_v35 = vmul.f32 %v5348_v17, %v1821_v0  ;;  %v2235_v36 = vmul.f32 %v5348_v17, %v1935_v1  ;;  %v4081_v0 = vld [vmem:[%s5295_s16 + $0x24] sm:$0xff]  }
  0x45   : > { %v1888_v37 = vadd.f32 %v1856_v10, %v1755_v27  ;;  %v1889_v38 = vadd.f32 %v1857_v11, %v1756_v28  ;;  %v2233_v39 = vmul.f32 %v5348_v17, %v2211_v30  ;;  %v486_v40 = vmul.f32 %v5343_v8, %v5297_v13  ;;  %v4111_v27 = vld [vmem:[%s5295_s16 + $0x2c] sm:$0x1] }
  0x46   : > { %v4708_v42 = vpop.eup %4707  ;;  %v2057_v43 = vsel %vm678_vm0, %v2055_v29, %v2056_v31  ;;  %v2059_v44 = vsel %vm678_vm0, %v2056_v31, %v2058_v34  ;;  %v2332_v45 = vrot.slane %v2234_v35, 2  ;;  %v2334_v46 = vrot.slane %v2235_v36, 2 }
  0x47   : > { %v4710_v47 = vpop.eup %4709  ;;  %v2644_v48 = vadd.f32 1.0, %v4708_v42  ;;  %v2164_v49 = vadd.f32 %v2057_v43, %v1888_v37  ;;  %v2165_v50 = vadd.f32 %v2059_v44, %v1889_v38  ;;  %v2331_v51 = vrot.slane %v2233_v39, 2  ;;  %v4127_v38 = vld [vmem:[%s5295_s16 + $0x24] sm:$0xe] }
  0x48   : > { %v2645_v52 = vadd.f32 1.0, %v4710_v47  ;;  %v2335_v53 = vsel %vm955_vm1, %v2332_v45, %v2334_v46  ;;  %v487_v54 = vmul.f32 %v5350_v19, %v5297_v13  ;;  %v564_v55 = vunpack.c.l.bf16 %v548_v41 }
  0x49   : > { %4711 = vrcp.f32 %v2644_v48  ;;  %v2333_v57 = vsel %vm955_vm1, %v2331_v51, %v2332_v45  ;;  %v2441_v58 = vadd.f32 %v2335_v53, %v2165_v50  ;;  %v588_v59 = vmul.f32 %v5343_v8, %v5299_v14  ;;  %v4461_v50 = vld [vmem:[%s5295_s16 + $0x30] sm:$0xff]  }
  0x4a   : > { %4713 = vrcp.f32 %v2645_v52  ;;  %v2440_v60 = vadd.f32 %v2333_v57, %v2164_v49  ;;  %v589_v61 = vmul.f32 %v5350_v19, %v5299_v14  ;;  %v590_v62 = vmul.f32 %v5299_v14, %v564_v55 }
  0x4b   : > { %v2480_v1 = vmul.f32 %v5380_v63, %v2441_v58  ;;  %v689_v2 = vrot.slane %v588_v59, 1  ;;  %v841_v3 = vunpack.c.l.bf16 %v825_v56  ;;  %v866_v4 = vmul.f32 %v5350_v19, %v5301_v15 }
  0x4c   : > { %v2479_v5 = vmul.f32 %v5380_v63, %v2440_v60  ;;  %v690_v6 = vrot.slane %v589_v61, 1  ;;  %v692_v8 = vrot.slane %v590_v62, 1  ;;  %v867_v9 = vmul.f32 %v5301_v15, %v564_v55 }
  0x4d   : > { %v5459_v10 = vadd.f32 %v5388_v7, %v2480_v1  ;;  %v865_v11 = vmul.f32 %v5301_v15, %v841_v3  ;;  %v967_v12 = vrot.slane %v866_v4, 2  ;;  %v1137_v18 = vunpack.c.l.bf16 %v4081_v0  ;;  %v4175_v1 = vld [vmem:[%s5295_s16 + $0x38] sm:$0x1] }
  0x4e   : > { %v5463_v24 = vadd.f32 %v5388_v7, %v2479_v5  ;;  %v691_v19 = vsel %vm678_vm0, %v689_v2, %v690_v6  ;;  %v693_v25 = vsel %vm678_vm0, %v690_v6, %v692_v8  ;;  %v969_v26 = vrot.slane %v867_v9, 2  ;;  %v4191_v5 = vld [vmem:[%s5295_s16 + $0x30] sm:$0xe] }
  0x4f   : > { %v4211_v28 = vmul.f32 -1.442695, %v5459_v10  ;;  %v795_v29 = vadd.f32 %v691_v19, %v486_v40  ;;  %v796_v30 = vadd.f32 %v693_v25, %v487_v54  ;;  %v966_v31 = vrot.slane %v865_v11, 2 }
  0x50   : > { %v4210_v34 = vmul.f32 -1.442695, %v5463_v24  ;;  %v970_v35 = vsel %vm955_vm1, %v967_v12, %v969_v26  ;;  %v1138_v36 = vunpack.c.h.bf16 %v4081_v0  ;;  %v1173_v37 = vmul.f32 %v5303_v16, %v1137_v18 }
  0x51   : > { %4715 = vpow2.f32 %v4211_v28  ;;  %v968_v39 = vsel %vm955_vm1, %v966_v31, %v967_v12  ;;  %v1073_v41 = vadd.f32 %v970_v35, %v796_v30  ;;  %v1251_v42 = vunpack.c.l.bf16 %v4111_v27 }
  0x52   : > { %4717 = vpow2.f32 %v4210_v34  ;;  %v1072_v43 = vadd.f32 %v968_v39, %v795_v29  ;;  %v1174_v40 = vmul.f32 %v5303_v16, %v1138_v36  ;;  %v1275_v44 = vmul.f32 %v5308_v20, %v1137_v18 }
  0x53   : > { %v4712_v45 = vpop.eup %4711  ;;  %v1276_v46 = vmul.f32 %v5308_v20, %v1138_v36  ;;  %v1277_v47 = vmul.f32 %v5308_v20, %v1251_v42  ;;  %v1527_v48 = vunpack.c.l.bf16 %v4127_v38  ;;  %v1552_v49 = vmul.f32 %v5310_v21, %v1138_v36 }
  0x54   : > { %v4714_v51 = vpop.eup %4713  ;;  %v2740_v52 = vmul.f32 %v4712_v45, %v5400_v32  ;;  %v1205_v53 = vadd.f32 %v1173_v37, %v1072_v43  ;;  %v1206_v54 = vadd.f32 %v1174_v40, %v1073_v41  ;;  %v1375_v55 = vrot.slane %v1275_v44, 1  ;;  %v420_v45 = vld [vmem:[%s5295_s16 + $0x24] sm:$0xff]  }
  0x55   : > { %v2741_v56 = vmul.f32 %v4714_v51, %v5403_v33  ;;  %v1376_v57 = vrot.slane %v1276_v46, 1  ;;  %v1378_v58 = vrot.slane %v1277_v47, 1  ;;  %v1551_v59 = vmul.f32 %v5310_v21, %v1527_v48 }
  0x56   : > { %v1553_v60 = vmul.f32 %v5310_v21, %v1251_v42  ;;  %v1652_v61 = vrot.slane %v1552_v49, 2  ;;  %v5484_v62 = vunpack.c.l.bf16 %v4461_v50  ;;  %v5486_v0 = vunpack.c.h.bf16 %v4461_v50  ;;  %v549_v49 = vld [vmem:[%s5295_s16 + $0x2c] sm:$0x1]  ;;  %v826_v50 = vld [vmem:[%s5295_s16 + $0x24] sm:$0xe] }
  0x57   : > { %v2772_v2 = vpack.c.bf16 %v2741_v56, %v2740_v52  ;;  %v1377_v32 = vsel %vm678_vm0, %v1375_v55, %v1376_v57  ;;  %v1379_v3 = vsel %vm678_vm0, %v1376_v57, %v1378_v58  ;;  %v1651_v4 = vrot.slane %v1551_v59, 2 }
  0x58   : > { %v1481_v33 = vadd.f32 %v1377_v32, %v1205_v53  ;;  %v1482_v6 = vadd.f32 %v1379_v3, %v1206_v54  ;;  %v1654_v8 = vrot.slane %v1553_v60, 2  ;;  %v1858_v9 = vmul.f32 %v5484_v62, %v5312_v22 }
  0x59   : > { %4527 = vmatprep.mubr.msk.bf16.mxu0 %vm2804_vm2, %v2772_v2  ;;  %v1653_v11 = vsel %vm955_vm1, %v1651_v4, %v1652_v61  ;;  %v1859_v12 = vmul.f32 %v5486_v0, %v5312_v22  ;;  %v1936_v18 = vunpack.c.l.bf16 %v4175_v1  ;;  %v1960_v19 = vmul.f32 %v5484_v62, %v5314_v23 }
  0x5a   : > { %v1655_v25 = vsel %vm955_vm1, %v1652_v61, %v1654_v8  ;;  %v1757_v26 = vadd.f32 %v1653_v11, %v1481_v33  ;;  %v1961_v27 = vmul.f32 %v5486_v0, %v5314_v23  ;;  %v2212_v28 = vunpack.c.l.bf16 %v4191_v5 }
  0x5b   : > { %v4716_v29 = vpop.eup %4715  ;;  %v1758_v30 = vadd.f32 %v1655_v25, %v1482_v6  ;;  %v1962_v31 = vmul.f32 %v5314_v23, %v1936_v18  ;;  %v2060_v34 = vrot.slane %v1960_v19, 1  ;;  %v2237_v35 = vmul.f32 %v5486_v0, %v5348_v17 }
  0x5c   : > { %v4718_v36 = vpop.eup %4717  ;;  %v2647_v37 = vadd.f32 1.0, %v4716_v29  ;;  %v1890_v38 = vadd.f32 %v1858_v9, %v1757_v26  ;;  %v2061_v39 = vrot.slane %v1961_v27, 1  ;;  %v2236_v41 = vmul.f32 %v5348_v17, %v2212_v28 }
  0x5d   : > { %v2646_v42 = vadd.f32 1.0, %v4718_v36  ;;  %v1891_v43 = vadd.f32 %v1859_v12, %v1758_v30  ;;  %v2063_v40 = vrot.slane %v1962_v31, 1  ;;  %v2238_v44 = vmul.f32 %v5348_v17, %v1936_v18  ;;  %v4112_v31 = vld [vmem:[%s5295_s16 + $0x38] sm:$0x1] }
  0x5e   : > { %4719 = vrcp.f32 %v2647_v37  ;;  %v2062_v46 = vsel %vm678_vm0, %v2060_v34, %v2061_v39  ;;  %v2336_v47 = vrot.slane %v2236_v41, 2  ;;  %v2337_v48 = vrot.slane %v2237_v35, 2 }
  0x5f   : > { %4721 = vrcp.f32 %v2646_v42  ;;  %v2064_v51 = vsel %vm678_vm0, %v2061_v39, %v2063_v40  ;;  %v2166_v52 = vadd.f32 %v2062_v46, %v1890_v38  ;;  %v2339_v53 = vrot.slane %v2238_v44, 2  ;;  %v4128_v40 = vld [vmem:[%s5295_s16 + $0x30] sm:$0xe] }
  0x60   : > { %v2167_v54 = vadd.f32 %v2064_v51, %v1891_v43  ;;  %v2338_v55 = vsel %vm955_vm1, %v2336_v47, %v2337_v48  ;;  %v452_v56 = vunpack.c.l.bf16 %v420_v45  ;;  %v453_v57 = vunpack.c.h.bf16 %v420_v45 }
  0x61   : > { %v2340_v58 = vsel %vm955_vm1, %v2337_v48, %v2339_v53  ;;  %v2442_v59 = vadd.f32 %v2338_v55, %v2166_v52  ;;  %v565_v60 = vunpack.c.l.bf16 %v549_v49  ;;  %v842_v61 = vunpack.c.l.bf16 %v826_v50 }
  0x62   : > { %v2443_v1 = vadd.f32 %v2340_v58, %v2167_v54  ;;  %v488_v2 = vmul.f32 %v5297_v13, %v452_v56  ;;  %v489_v32 = vmul.f32 %v5297_v13, %v453_v57  ;;  %v591_v3 = vmul.f32 %v5299_v14, %v452_v56  ;;  %v4176_v58 = vld [vmem:[%s5295_s16 + $0x44] sm:$0x1] }
  0x63   : > { %v2481_v4 = vmul.f32 %v5380_v63, %v2442_v59  ;;  %v592_v5 = vmul.f32 %v5299_v14, %v453_v57  ;;  %v593_v33 = vmul.f32 %v5299_v14, %v565_v60  ;;  %v868_v6 = vmul.f32 %v5301_v15, %v842_v61 }
  0x64   : > { %v2482_v8 = vmul.f32 %v5380_v63, %v2443_v1  ;;  %v694_v9 = vrot.slane %v591_v3, 1  ;;  %v869_v11 = vmul.f32 %v5301_v15, %v453_v57  ;;  %v870_v12 = vmul.f32 %v5301_v15, %v565_v60 }
  0x65   : > { %v5526_v18 = vadd.f32 %v5388_v7, %v2481_v4  ;;  %v695_v19 = vrot.slane %v592_v5, 1  ;;  %v697_v25 = vrot.slane %v593_v33, 1  ;;  %v971_v26 = vrot.slane %v868_v6, 2 }
  0x66   : > { %v5529_v27 = vadd.f32 %v5388_v7, %v2482_v8  ;;  %v972_v28 = vrot.slane %v869_v11, 2  ;;  %v974_v29 = vrot.slane %v870_v12, 2  ;;  %v1175_v30 = vmul.f32 %v5484_v62, %v5303_v16 }
  0x67   : > { %v4212_v34 = vmul.f32 -1.442695, %v5526_v18  ;;  %v696_v35 = vsel %vm678_vm0, %v694_v9, %v695_v19  ;;  %v698_v36 = vsel %vm678_vm0, %v695_v19, %v697_v25  ;;  %v1176_v37 = vmul.f32 %v5486_v0, %v5303_v16  ;;  %v4192_v9 = vld [vmem:[%s5295_s16 + $0x3c] sm:$0xe] }
  0x68   : > { %v4720_v38 = vpop.eup %4719  ;;  %v4213_v39 = vmul.f32 -1.442695, %v5529_v27  ;;  %v797_v41 = vadd.f32 %v696_v35, %v488_v2  ;;  %v798_v42 = vadd.f32 %v698_v36, %v489_v32  ;;  %v973_v43 = vsel %vm955_vm1, %v971_v26, %v972_v28 }
  0x69   : > { %v4722_v44 = vpop.eup %4721  ;;  %v2743_v45 = vmul.f32 %v4720_v38, %v5459_v10  ;;  %4723 = vpow2.f32 %v4212_v34  ;;  %v975_v46 = vsel %vm955_vm1, %v972_v28, %v974_v29  ;;  %v1252_v47 = vunpack.c.l.bf16 %v4112_v31  ;;  %v4147_v10 = vld [vmem:[%s5295_s16 + $0x3c] sm:$0xff]  }
  0x6a   : > { %v2742_v48 = vmul.f32 %v4722_v44, %v5463_v24  ;;  %4725 = vpow2.f32 %v4213_v39  ;;  %v1074_v49 = vadd.f32 %v973_v43, %v797_v41  ;;  %v1075_v50 = vadd.f32 %v975_v46, %v798_v42 }
  0x6b   : > { %v1278_v51 = vmul.f32 %v5484_v62, %v5308_v20  ;;  %v1279_v52 = vmul.f32 %v5486_v0, %v5308_v20  ;;  %v1280_v53 = vmul.f32 %v5308_v20, %v1252_v47  ;;  %v1528_v54 = vunpack.c.l.bf16 %v4128_v40 }
  0x6c   : > { %v2773_v55 = vpack.c.bf16 %v2743_v45, %v2742_v48  ;;  %v1207_v56 = vadd.f32 %v1175_v30, %v1074_v49  ;;  %v1208_v57 = vadd.f32 %v1176_v37, %v1075_v50  ;;  %v1555_v24 = vmul.f32 %v5486_v0, %v5310_v21 }
  0x6d   : > { %v1380_v59 = vrot.slane %v1278_v51, 1  ;;  %v1381_v60 = vrot.slane %v1279_v52, 1  ;;  %v1383_v61 = vrot.slane %v1280_v53, 1  ;;  %v1554_v1 = vmul.f32 %v5310_v21, %v1528_v54  ;;  %v550_v51 = vld [vmem:[%s5295_s16 + $0x38] sm:$0x1] }
  0x6e   : > { %4528 = vmatmul.mubr.msk.bf16.vlgmr.msra.gmra.mrb[0].mxu0 %vm2804_vm2, %v2773_v55  ;;  %v1556_v2 = vmul.f32 %v5310_v21, %v1252_v47  ;;  %v1657_v32 = vrot.slane %v1555_v24, 2  ;;  %v1824_v3 = vunpack.c.l.bf16 %v4147_v10  ;;  %v1825_v4 = vunpack.c.h.bf16 %v4147_v10  ;;  %v827_v10 = vld [vmem:[%s5295_s16 + $0x30] sm:$0xe] }
  0x6f   : > { %v1382_v5 = vsel %vm678_vm0, %v1380_v59, %v1381_v60  ;;  %v1384_v33 = vsel %vm678_vm0, %v1381_v60, %v1383_v61  ;;  %v1656_v6 = vrot.slane %v1554_v1, 2  ;;  %v1937_v8 = vunpack.c.l.bf16 %v4176_v58 }
  0x70   : > { %v1483_v11 = vadd.f32 %v1382_v5, %v1207_v56  ;;  %v1484_v12 = vadd.f32 %v1384_v33, %v1208_v57  ;;  %v1659_v19 = vrot.slane %v1556_v2, 2  ;;  %v1860_v25 = vmul.f32 %v5312_v22, %v1824_v3 }
  0x71   : > { %v1658_v26 = vsel %vm955_vm1, %v1656_v6, %v1657_v32  ;;  %v1861_v28 = vmul.f32 %v5312_v22, %v1825_v4  ;;  %v1963_v29 = vmul.f32 %v5314_v23, %v1824_v3  ;;  %v1964_v30 = vmul.f32 %v5314_v23, %v1825_v4  ;;  %v4085_v3 = vld [vmem:[%s5295_s16 + $0x3c] sm:$0xff]  }
  0x72   : > { %v1660_v31 = vsel %vm955_vm1, %v1657_v32, %v1659_v19  ;;  %v1759_v34 = vadd.f32 %v1658_v26, %v1483_v11  ;;  %v1965_v35 = vmul.f32 %v5314_v23, %v1937_v8  ;;  %v2213_v36 = vunpack.c.l.bf16 %v4192_v9 }
  0x73   : > { %v4724_v37 = vpop.eup %4723  ;;  %v1760_v38 = vadd.f32 %v1660_v31, %v1484_v12  ;;  %v2065_v39 = vrot.slane %v1963_v29, 1  ;;  %v2066_v41 = vrot.slane %v1964_v30, 1  ;;  %v2240_v42 = vmul.f32 %v5348_v17, %v1825_v4 }
  0x74   : > { %v4726_v43 = vpop.eup %4725  ;;  %v2648_v40 = vadd.f32 1.0, %v4724_v37  ;;  %v1892_v44 = vadd.f32 %v1860_v25, %v1759_v34  ;;  %v2068_v45 = vrot.slane %v1965_v35, 1  ;;  %v2239_v46 = vmul.f32 %v5348_v17, %v2213_v36  ;;  %v4113_v37 = vld [vmem:[%s5295_s16 + $0x44] sm:$0x1] }
  0x75   : > { %v2649_v47 = vadd.f32 1.0, %v4726_v43  ;;  %v1893_v48 = vadd.f32 %v1861_v28, %v1760_v38  ;;  %v2067_v49 = vsel %vm678_vm0, %v2065_v39, %v2066_v41  ;;  %v2241_v50 = vmul.f32 %v5348_v17, %v1937_v8 }
  0x76   : > { %4727 = vrcp.f32 %v2648_v40  ;;  %v2069_v52 = vsel %vm678_vm0, %v2066_v41, %v2068_v45  ;;  %v2168_v53 = vadd.f32 %v2067_v49, %v1892_v44  ;;  %v2341_v54 = vrot.slane %v2239_v46, 2 }
  0x77   : > { %4729 = vrcp.f32 %v2649_v47  ;;  %v2169_v55 = vadd.f32 %v2069_v52, %v1893_v48  ;;  %v2342_v56 = vrot.slane %v2240_v42, 2  ;;  %v2344_v57 = vrot.slane %v2241_v50, 2  ;;  %v4129_v52 = vld [vmem:[%s5295_s16 + $0x3c] sm:$0xe] }
  0x78   : > { %v490_v24 = vmul.f32 %v5484_v62, %v5297_v13  ;;  %v491_v58 = vmul.f32 %v5486_v0, %v5297_v13  ;;  %v566_v59 = vunpack.c.l.bf16 %v550_v51  ;;  %v594_v60 = vmul.f32 %v5484_v62, %v5299_v14 }
  0x79   : > { %v2343_v61 = vsel %vm955_vm1, %v2341_v54, %v2342_v56  ;;  %v2345_v1 = vsel %vm955_vm1, %v2342_v56, %v2344_v57  ;;  %v595_v2 = vmul.f32 %v5486_v0, %v5299_v14  ;;  %v843_v32 = vunpack.c.l.bf16 %v827_v10 }
  0x7a   : > { %v2444_v4 = vadd.f32 %v2343_v61, %v2168_v53  ;;  %v2445_v5 = vadd.f32 %v2345_v1, %v2169_v55  ;;  %v596_v33 = vmul.f32 %v5299_v14, %v566_v59  ;;  %v699_v6 = vrot.slane %v594_v60, 1  ;;  %v4462_v55 = vld [vmem:[%s5295_s16 + $0x48] sm:$0xff]  }
  0x7b   : > { %v700_v8 = vrot.slane %v595_v2, 1  ;;  %v871_v9 = vmul.f32 %v5301_v15, %v843_v32  ;;  %v872_v62 = vmul.f32 %v5486_v0, %v5301_v15  ;;  %v873_v11 = vmul.f32 %v5301_v15, %v566_v59 }
  0x7c   : > { %v2483_v12 = vmul.f32 %v5380_v63, %v2444_v4  ;;  %v2484_v19 = vmul.f32 %v5380_v63, %v2445_v5  ;;  %v702_v25 = vrot.slane %v596_v33, 1  ;;  %v1141_v26 = vunpack.c.l.bf16 %v4085_v3 }
  0x7d   : > { %v701_v28 = vsel %vm678_vm0, %v699_v6, %v700_v8  ;;  %v976_v29 = vrot.slane %v871_v9, 2  ;;  %v977_v30 = vrot.slane %v872_v62, 2  ;;  %v979_v31 = vrot.slane %v873_v11, 2  ;;  %v4193_v11 = vld [vmem:[%s5295_s16 + $0x48] sm:$0xe] }
  0x7e   : > { %v5594_v34 = vadd.f32 %v5388_v7, %v2483_v12  ;;  %v5597_v35 = vadd.f32 %v5388_v7, %v2484_v19  ;;  %v703_v0 = vsel %vm678_vm0, %v700_v8, %v702_v25  ;;  %v799_v36 = vadd.f32 %v701_v28, %v490_v24 }
  0x7f   : > { %v800_v38 = vadd.f32 %v703_v0, %v491_v58  ;;  %v978_v39 = vsel %vm955_vm1, %v976_v29, %v977_v30  ;;  %v980_v41 = vsel %vm955_vm1, %v977_v30, %v979_v31  ;;  %v1142_v42 = vunpack.c.h.bf16 %v4085_v3  ;;  %v4177_v58 = vld [vmem:[%s5295_s16 + $0x50] sm:$0x1] }
  0x80   : > { %v4728_v43 = vpop.eup %4727  ;;  %v4214_v40 = vmul.f32 -1.442695, %v5594_v34  ;;  %v4215_v44 = vmul.f32 -1.442695, %v5597_v35  ;;  %v1076_v45 = vadd.f32 %v978_v39, %v799_v36  ;;  %v1177_v46 = vmul.f32 %v5303_v16, %v1141_v26 }
  0x81   : > { %v4730_v47 = vpop.eup %4729  ;;  %v2744_v48 = vmul.f32 %v4728_v43, %v5526_v18  ;;  %v1077_v49 = vadd.f32 %v980_v41, %v800_v38  ;;  %v1178_v50 = vmul.f32 %v5303_v16, %v1142_v42  ;;  %v1253_v51 = vunpack.c.l.bf16 %v4113_v37 }
  0x82   : > { %v2745_v53 = vmul.f32 %v4730_v47, %v5529_v27  ;;  %4731 = vpow2.f32 %v4214_v40  ;;  %v1209_v54 = vadd.f32 %v1177_v46, %v1076_v45  ;;  %v1281_v10 = vmul.f32 %v5308_v20, %v1141_v26 }
  0x83   : > { %4733 = vpow2.f32 %v4215_v44  ;;  %v1210_v56 = vadd.f32 %v1178_v50, %v1077_v49  ;;  %v1282_v57 = vmul.f32 %v5308_v20, %v1142_v42  ;;  %v1283_v24 = vmul.f32 %v5308_v20, %v1253_v51 }
  0x84   : > { %v2774_v18 = vpack.c.bf16 %v2745_v53, %v2744_v48  ;;  %v1385_v59 = vrot.slane %v1281_v10, 1  ;;  %v1529_v60 = vunpack.c.l.bf16 %v4129_v52  ;;  %v1558_v61 = vmul.f32 %v5310_v21, %v1142_v42  ;;  %v424_v48 = vld [vmem:[%s5295_s16 + $0x3c] sm:$0xff]  }
  0x85   : > { %v1386_v1 = vrot.slane %v1282_v57, 1  ;;  %v1388_v27 = vrot.slane %v1283_v24, 1  ;;  %v1559_v2 = vmul.f32 %v5310_v21, %v1253_v51  ;;  %v5617_v32 = vunpack.c.l.bf16 %v4462_v55 }
  0x86   : > { %4531 = vmatprep.mubr.msk.bf16.mxu0 %vm2804_vm2, %v2774_v18  ;;  %v1557_v3 = vmul.f32 %v5310_v21, %v1529_v60  ;;  %v1662_v4 = vrot.slane %v1558_v61, 2  ;;  %v5621_v5 = vunpack.c.h.bf16 %v4462_v55  ;;  %v1938_v33 = vunpack.c.l.bf16 %v4177_v58 }
  0x87   : > { %v1387_v6 = vsel %vm678_vm0, %v1385_v59, %v1386_v1  ;;  %v1389_v8 = vsel %vm678_vm0, %v1386_v1, %v1388_v27  ;;  %v1664_v9 = vrot.slane %v1559_v2, 2  ;;  %v1862_v62 = vmul.f32 %v5617_v32, %v5312_v22 }
  0x88   : > { %v1485_v12 = vadd.f32 %v1387_v6, %v1209_v54  ;;  %v1486_v19 = vadd.f32 %v1389_v8, %v1210_v56  ;;  %v1661_v25 = vrot.slane %v1557_v3, 2  ;;  %v1863_v26 = vmul.f32 %v5621_v5, %v5312_v22  ;;  %v551_v54 = vld [vmem:[%s5295_s16 + $0x44] sm:$0x1] }
  0x89   : > { %v1665_v28 = vsel %vm955_vm1, %v1662_v4, %v1664_v9  ;;  %v1966_v29 = vmul.f32 %v5617_v32, %v5314_v23  ;;  %v1967_v30 = vmul.f32 %v5621_v5, %v5314_v23  ;;  %v1968_v31 = vmul.f32 %v5314_v23, %v1938_v33 }
  0x8a   : > { %v1663_v0 = vsel %vm955_vm1, %v1661_v25, %v1662_v4  ;;  %v1762_v36 = vadd.f32 %v1665_v28, %v1486_v19  ;;  %v2214_v37 = vunpack.c.l.bf16 %v4193_v11  ;;  %v2243_v38 = vmul.f32 %v5621_v5, %v5348_v17 }
  0x8b   : > { %v1761_v39 = vadd.f32 %v1663_v0, %v1485_v12  ;;  %v2070_v41 = vrot.slane %v1966_v29, 1  ;;  %v2071_v42 = vrot.slane %v1967_v30, 1  ;;  %v2073_v43 = vrot.slane %v1968_v31, 1 }
  0x8c   : > { %v4732_v40 = vpop.eup %4731  ;;  %v1895_v44 = vadd.f32 %v1863_v26, %v1762_v36  ;;  %v2242_v45 = vmul.f32 %v5348_v17, %v2214_v37  ;;  %v2244_v46 = vmul.f32 %v5348_v17, %v1938_v33  ;;  %v2347_v47 = vrot.slane %v2243_v38, 2  ;;  %v828_v17 = vld [vmem:[%s5295_s16 + $0x3c] sm:$0xe]  ;;  %v4114_v36 = vld [vmem:[%s5295_s16 + $0x50] sm:$0x1] }
  0x8d   : > { %v4734_v49 = vpop.eup %4733  ;;  %v2650_v50 = vadd.f32 1.0, %v4732_v40  ;;  %v1894_v51 = vadd.f32 %v1862_v62, %v1761_v39  ;;  %v2072_v52 = vsel %vm678_vm0, %v2070_v41, %v2071_v42  ;;  %v2074_v53 = vsel %vm678_vm0, %v2071_v42, %v2073_v43 }
  0x8e   : > { %v2651_v10 = vadd.f32 1.0, %v4734_v49  ;;  %v2171_v55 = vadd.f32 %v2074_v53, %v1895_v44  ;;  %v2346_v56 = vrot.slane %v2242_v45, 2  ;;  %v2349_v57 = vrot.slane %v2244_v46, 2 }
  0x8f   : > { %4735 = vrcp.f32 %v2650_v50  ;;  %v2170_v24 = vadd.f32 %v2072_v52, %v1894_v51  ;;  %v456_v58 = vunpack.c.l.bf16 %v424_v48  ;;  %v457_v18 = vunpack.c.h.bf16 %v424_v48  ;;  %v4130_v51 = vld [vmem:[%s5295_s16 + $0x48] sm:$0xe] }
  0x90   : > { %4737 = vrcp.f32 %v2651_v10  ;;  %v2348_v59 = vsel %vm955_vm1, %v2346_v56, %v2347_v47  ;;  %v2350_v60 = vsel %vm955_vm1, %v2347_v47, %v2349_v57  ;;  %v567_v61 = vunpack.c.l.bf16 %v551_v54 }
  0x91   : > { %v2446_v1 = vadd.f32 %v2348_v59, %v2170_v24  ;;  %v2447_v27 = vadd.f32 %v2350_v60, %v2171_v55  ;;  %v492_v2 = vmul.f32 %v5297_v13, %v456_v58  ;;  %v493_v3 = vmul.f32 %v5297_v13, %v457_v18  ;;  %v4151_v55 = vld [vmem:[%s5295_s16 + $0x54] sm:$0xff]  }
  0x92   : > { %v597_v4 = vmul.f32 %v5299_v14, %v456_v58  ;;  %v598_v33 = vmul.f32 %v5299_v14, %v457_v18  ;;  %v599_v6 = vmul.f32 %v5299_v14, %v567_v61  ;;  %v844_v8 = vunpack.c.l.bf16 %v828_v17 }
  0x93   : > { %v2485_v9 = vmul.f32 %v5380_v63, %v2446_v1  ;;  %v2486_v62 = vmul.f32 %v5380_v63, %v2447_v27  ;;  %v875_v11 = vmul.f32 %v5301_v15, %v457_v18  ;;  %v876_v12 = vmul.f32 %v5301_v15, %v567_v61 }
  0x94   : > { %v704_v19 = vrot.slane %v597_v4, 1  ;;  %v705_v25 = vrot.slane %v598_v33, 1  ;;  %v707_v26 = vrot.slane %v599_v6, 1  ;;  %v874_v28 = vmul.f32 %v5301_v15, %v844_v8  ;;  %v4194_v6 = vld [vmem:[%s5295_s16 + $0x54] sm:$0xe] }
  0x95   : > { %v5659_v29 = vadd.f32 %v5388_v7, %v2485_v9  ;;  %v5662_v30 = vadd.f32 %v5388_v7, %v2486_v62  ;;  %v982_v31 = vrot.slane %v875_v11, 2  ;;  %v984_v0 = vrot.slane %v876_v12, 2 }
  0x96   : > { %v706_v63 = vsel %vm678_vm0, %v704_v19, %v705_v25  ;;  %v708_v37 = vsel %vm678_vm0, %v705_v25, %v707_v26  ;;  %v981_v38 = vrot.slane %v874_v28, 2  ;;  %v1179_v39 = vmul.f32 %v5617_v32, %v5303_v16 }
  0x97   : > { %v4216_v41 = vmul.f32 -1.442695, %v5659_v29  ;;  %v4217_v42 = vmul.f32 -1.442695, %v5662_v30  ;;  %v801_v43 = vadd.f32 %v706_v63, %v492_v2  ;;  %v802_v40 = vadd.f32 %v708_v37, %v493_v3  ;;  %v4178_v2 = vld [vmem:[%s5295_s16 + $0x5c] sm:$0x1] }
  0x98   : > { %v983_v7 = vsel %vm955_vm1, %v981_v38, %v982_v31  ;;  %v985_v44 = vsel %vm955_vm1, %v982_v31, %v984_v0  ;;  %v1180_v45 = vmul.f32 %v5621_v5, %v5303_v16  ;;  %v1254_v46 = vunpack.c.l.bf16 %v4114_v36  ;;  %v5701_v36 = vld [vmem:[%s6858_s1 + $0x8] ss:$0 sm:$0xff] }
  0x99   : > { %v4736_v47 = vpop.eup %4735  ;;  %4739 = vpow2.f32 %v4216_v41  ;;  %v1078_v48 = vadd.f32 %v983_v7, %v801_v43  ;;  %v1079_v49 = vadd.f32 %v985_v44, %v802_v40  ;;  %v1284_v50 = vmul.f32 %v5617_v32, %v5308_v20 }
  0x9a   : > { %v4738_v52 = vpop.eup %4737  ;;  %v2746_v53 = vmul.f32 %v4736_v47, %v5594_v34  ;;  %4741 = vpow2.f32 %v4217_v42  ;;  %v1285_v54 = vmul.f32 %v5621_v5, %v5308_v20  ;;  %v1286_v10 = vmul.f32 %v5308_v20, %v1254_v46 }
  0x9b   : > { %v2747_v56 = vmul.f32 %v4738_v52, %v5597_v35  ;;  %v1211_v57 = vadd.f32 %v1179_v39, %v1078_v48  ;;  %v1212_v24 = vadd.f32 %v1180_v45, %v1079_v49  ;;  %v1390_v58 = vrot.slane %v1284_v50, 1 }
  0x9c   : > { %v1391_v18 = vrot.slane %v1285_v54, 1  ;;  %v1393_v17 = vrot.slane %v1286_v10, 1  ;;  %v1530_v59 = vunpack.c.l.bf16 %v4130_v51  ;;  %v1561_v34 = vmul.f32 %v5621_v5, %v5310_v21  ;;  %v552_v54 = vld [vmem:[%s5295_s16 + $0x50] sm:$0x1] }
  0x9d   : > { %v2775_v60 = vpack.c.bf16 %v2747_v56, %v2746_v53  ;;  %v1562_v61 = vmul.f32 %v5310_v21, %v1254_v46  ;;  %v1828_v1 = vunpack.c.l.bf16 %v4151_v55  ;;  %v1829_v27 = vunpack.c.h.bf16 %v4151_v55 }
  0x9e   : > { %v1392_v3 = vsel %vm678_vm0, %v1390_v58, %v1391_v18  ;;  %v1394_v35 = vsel %vm678_vm0, %v1391_v18, %v1393_v17  ;;  %v1560_v4 = vmul.f32 %v5310_v21, %v1530_v59  ;;  %v1667_v33 = vrot.slane %v1561_v34, 2 }
  0x9f   : > { %4532 = vmatmul.mubr.msk.bf16.gmra.mrb[4].mxu0 %vm2804_vm2, %v2775_v60  ;;  %v1487_v8 = vadd.f32 %v1392_v3, %v1211_v57  ;;  %v1488_v9 = vadd.f32 %v1394_v35, %v1212_v24  ;;  %v1669_v62 = vrot.slane %v1562_v61, 2  ;;  %v1864_v11 = vmul.f32 %v5312_v22, %v1828_v1  ;;  %v829_v57 = vld [vmem:[%s5295_s16 + $0x48] sm:$0xe]  ;;  %v4089_v3 = vld [vmem:[%s5295_s16 + $0x54] sm:$0xff]  }
  0xa0   : > { %v1666_v12 = vrot.slane %v1560_v4, 2  ;;  %v1865_v19 = vmul.f32 %v5312_v22, %v1829_v27  ;;  %v1939_v25 = vunpack.c.l.bf16 %v4178_v2  ;;  %v1969_v26 = vmul.f32 %v5314_v23, %v1828_v1 }
  0xa1   : > { %v1670_v28 = vsel %vm955_vm1, %v1667_v33, %v1669_v62  ;;  %v1970_v31 = vmul.f32 %v5314_v23, %v1829_v27  ;;  %v2215_v0 = vunpack.c.l.bf16 %v4194_v6  ;;  %v2246_v63 = vmul.f32 %v5701_v36, %v1829_v27 }
  0xa2   : > { %v1668_v37 = vsel %vm955_vm1, %v1666_v12, %v1667_v33  ;;  %v1764_v38 = vadd.f32 %v1670_v28, %v1488_v9  ;;  %v1971_v39 = vmul.f32 %v5314_v23, %v1939_v25  ;;  %v2075_v41 = vrot.slane %v1969_v26, 1 }
  0xa3   : > { %v4740_v42 = vpop.eup %4739  ;;  %v1763_v43 = vadd.f32 %v1668_v37, %v1487_v8  ;;  %v2076_v40 = vrot.slane %v1970_v31, 1  ;;  %v2245_v7 = vmul.f32 %v5701_v36, %v2215_v0  ;;  %v2247_v44 = vmul.f32 %v5701_v36, %v1939_v25  ;;  %v4115_v37 = vld [vmem:[%s5295_s16 + $0x5c] sm:$0x1] }
  0xa4   : > { %v4742_v45 = vpop.eup %4741  ;;  %v2652_v46 = vadd.f32 1.0, %v4740_v42  ;;  %v1897_v47 = vadd.f32 %v1865_v19, %v1764_v38  ;;  %v2078_v48 = vrot.slane %v1971_v39, 1  ;;  %v2352_v49 = vrot.slane %v2246_v63, 2 }
  0xa5   : > { %v2653_v50 = vadd.f32 1.0, %v4742_v45  ;;  %v1896_v51 = vadd.f32 %v1864_v11, %v1763_v43  ;;  %v2077_v52 = vsel %vm678_vm0, %v2075_v41, %v2076_v40  ;;  %v2351_v53 = vrot.slane %v2245_v7, 2 }
  0xa6   : > { %4743 = vrcp.f32 %v2652_v46  ;;  %v2079_v10 = vsel %vm678_vm0, %v2076_v40, %v2078_v48  ;;  %v2354_v55 = vrot.slane %v2247_v44, 2  ;;  %v494_v56 = vmul.f32 %v5617_v32, %v5297_v13 }
  0xa7   : > { %4745 = vrcp.f32 %v2653_v50  ;;  %v2172_v24 = vadd.f32 %v2077_v52, %v1896_v51  ;;  %v2173_v58 = vadd.f32 %v2079_v10, %v1897_v47  ;;  %v2353_v18 = vsel %vm955_vm1, %v2351_v53, %v2352_v49  ;;  %v4131_v50 = vld [vmem:[%s5295_s16 + $0x54] sm:$0xe] }
  0xa8   : > { %v2355_v17 = vsel %vm955_vm1, %v2352_v49, %v2354_v55  ;;  %v495_v59 = vmul.f32 %v5621_v5, %v5297_v13  ;;  %v568_v34 = vunpack.c.l.bf16 %v552_v54  ;;  %v600_v60 = vmul.f32 %v5617_v32, %v5299_v14  ;;  %v5730_v32 = vld [vmem:[%s6843_s2] ss:$0 sm:$0xff] }
  0xa9   : > { %v2448_v61 = vadd.f32 %v2353_v18, %v2172_v24  ;;  %v2449_v1 = vadd.f32 %v2355_v17, %v2173_v58  ;;  %v601_v27 = vmul.f32 %v5621_v5, %v5299_v14  ;;  %v845_v2 = vunpack.c.l.bf16 %v829_v57  ;;  %v4463_v57 = vld [vmem:[%s5295_s16 + $0x60] sm:$0xff]  }
  0xaa   : > { %v602_v35 = vmul.f32 %v5299_v14, %v568_v34  ;;  %v709_v4 = vrot.slane %v600_v60, 1  ;;  %v878_v33 = vmul.f32 %v5621_v5, %v5301_v15  ;;  %v879_v6 = vmul.f32 %v5301_v15, %v568_v34  ;;  %v5738_v5 = vld [vmem:[%s6844_s3] ss:$0 sm:$0xff] }
  0xab   : > { %v2487_v8 = vmul.f32 %v5730_v32, %v2448_v61  ;;  %v2488_v9 = vmul.f32 %v5730_v32, %v2449_v1  ;;  %v710_v62 = vrot.slane %v601_v27, 1  ;;  %v877_v11 = vmul.f32 %v5301_v15, %v845_v2 }
  0xac   : > { %v712_v12 = vrot.slane %v602_v35, 1  ;;  %v987_v19 = vrot.slane %v878_v33, 2  ;;  %v989_v25 = vrot.slane %v879_v6, 2  ;;  %v1145_v26 = vunpack.c.l.bf16 %v4089_v3  ;;  %v4195_v6 = vld [vmem:[%s5295_s16 + $0x60] sm:$0xe] }
  0xad   : > { %v5741_v28 = vadd.f32 %v5738_v5, %v2487_v8  ;;  %v5744_v31 = vadd.f32 %v5738_v5, %v2488_v9  ;;  %v711_v0 = vsel %vm678_vm0, %v709_v4, %v710_v62  ;;  %v986_v63 = vrot.slane %v877_v11, 2 }
  0xae   : > { %v713_v38 = vsel %vm678_vm0, %v710_v62, %v712_v12  ;;  %v803_v39 = vadd.f32 %v711_v0, %v494_v56  ;;  %v990_v41 = vsel %vm955_vm1, %v987_v19, %v989_v25  ;;  %v1146_v42 = vunpack.c.h.bf16 %v4089_v3 }
  0xaf   : > { %v4218_v43 = vmul.f32 -1.442695, %v5741_v28  ;;  %v4219_v40 = vmul.f32 -1.442695, %v5744_v31  ;;  %v804_v7 = vadd.f32 %v713_v38, %v495_v59  ;;  %v988_v44 = vsel %vm955_vm1, %v986_v63, %v987_v19  ;;  %v4179_v59 = vld [vmem:[%s5295_s16 + $0x68] sm:$0x1] }
  0xb0   : > { %v4744_v45 = vpop.eup %4743  ;;  %v1080_v46 = vadd.f32 %v988_v44, %v803_v39  ;;  %v1181_v47 = vmul.f32 %v5303_v16, %v1145_v26  ;;  %v1182_v48 = vmul.f32 %v5303_v16, %v1146_v42  ;;  %v1255_v49 = vunpack.c.l.bf16 %v4115_v37 }
  0xb1   : > { %v4746_v51 = vpop.eup %4745  ;;  %v2748_v52 = vmul.f32 %v4744_v45, %v5659_v29  ;;  %4747 = vpow2.f32 %v4218_v43  ;;  %v1081_v53 = vadd.f32 %v990_v41, %v804_v7  ;;  %v1287_v54 = vmul.f32 %v5308_v20, %v1145_v26 }
  0xb2   : > { %v2749_v10 = vmul.f32 %v4746_v51, %v5662_v30  ;;  %4749 = vpow2.f32 %v4219_v40  ;;  %v1213_v55 = vadd.f32 %v1181_v47, %v1080_v46  ;;  %v1288_v56 = vmul.f32 %v5308_v20, %v1146_v42 }
  0xb3   : > { %v1214_v24 = vadd.f32 %v1182_v48, %v1081_v53  ;;  %v1289_v58 = vmul.f32 %v5308_v20, %v1255_v49  ;;  %v1395_v18 = vrot.slane %v1287_v54, 1  ;;  %v1531_v17 = vunpack.c.l.bf16 %v4131_v50 }
  0xb4   : > { %v2776_v34 = vpack.c.bf16 %v2749_v10, %v2748_v52  ;;  %v1396_v29 = vrot.slane %v1288_v56, 1  ;;  %v1564_v60 = vmul.f32 %v5310_v21, %v1146_v42  ;;  %v1565_v61 = vmul.f32 %v5310_v21, %v1255_v49  ;;  %v428_v52 = vld [vmem:[%s5295_s16 + $0x54] sm:$0xff]   ;;  %v553_v56 = vld [vmem:[%s5295_s16 + $0x5c] sm:$0x1] }
  0xb5   : > { %v1398_v1 = vrot.slane %v1289_v58, 1  ;;  %v1563_v30 = vmul.f32 %v5310_v21, %v1531_v17  ;;  %v5766_v27 = vunpack.c.l.bf16 %v4463_v57  ;;  %v5768_v2 = vunpack.c.h.bf16 %v4463_v57  ;;  %v830_v57 = vld [vmem:[%s5295_s16 + $0x54] sm:$0xe] }
  0xb6   : > { %4535 = vmatprep.mubr.msk.bf16.mxu0 %vm2804_vm2, %v2776_v34  ;;  %v1397_v3 = vsel %vm678_vm0, %v1395_v18, %v1396_v29  ;;  %v1672_v35 = vrot.slane %v1564_v60, 2  ;;  %v1674_v4 = vrot.slane %v1565_v61, 2  ;;  %v1940_v33 = vunpack.c.l.bf16 %v4179_v59 }
  0xb7   : > { %v1399_v8 = vsel %vm678_vm0, %v1396_v29, %v1398_v1  ;;  %v1489_v9 = vadd.f32 %v1397_v3, %v1213_v55  ;;  %v1671_v62 = vrot.slane %v1563_v30, 2  ;;  %v1866_v11 = vmul.f32 %v5766_v27, %v5312_v22 }
  0xb8   : > { %v1490_v12 = vadd.f32 %v1399_v8, %v1214_v24  ;;  %v1675_v19 = vsel %vm955_vm1, %v1672_v35, %v1674_v4  ;;  %v1867_v25 = vmul.f32 %v5768_v2, %v5312_v22  ;;  %v1972_v26 = vmul.f32 %v5766_v27, %v5314_v23 }
  0xb9   : > { %v1673_v0 = vsel %vm955_vm1, %v1671_v62, %v1672_v35  ;;  %v1973_v63 = vmul.f32 %v5768_v2, %v5314_v23  ;;  %v1974_v37 = vmul.f32 %v5314_v23, %v1940_v33  ;;  %v2216_v38 = vunpack.c.l.bf16 %v4195_v6 }
  0xba   : > { %v1765_v39 = vadd.f32 %v1673_v0, %v1489_v9  ;;  %v1766_v41 = vadd.f32 %v1675_v19, %v1490_v12  ;;  %v2080_v42 = vrot.slane %v1972_v26, 1  ;;  %v2249_v43 = vmul.f32 %v5701_v36, %v5768_v2 }
  0xbb   : > { %v4748_v40 = vpop.eup %4747  ;;  %v2081_v7 = vrot.slane %v1973_v63, 1  ;;  %v2083_v44 = vrot.slane %v1974_v37, 1  ;;  %v2248_v45 = vmul.f32 %v5701_v36, %v2216_v38  ;;  %v2250_v46 = vmul.f32 %v5701_v36, %v1940_v33 }
  0xbc   : > { %v4750_v47 = vpop.eup %4749  ;;  %v2654_v48 = vadd.f32 1.0, %v4748_v40  ;;  %v1898_v49 = vadd.f32 %v1866_v11, %v1765_v39  ;;  %v1899_v50 = vadd.f32 %v1867_v25, %v1766_v41  ;;  %v2357_v51 = vrot.slane %v2249_v43, 2 }
  0xbd   : > { %v2655_v53 = vadd.f32 1.0, %v4750_v47  ;;  %v2082_v54 = vsel %vm678_vm0, %v2080_v42, %v2081_v7  ;;  %v2084_v10 = vsel %vm678_vm0, %v2081_v7, %v2083_v44  ;;  %v2356_v55 = vrot.slane %v2248_v45, 2  ;;  %v4116_v42 = vld [vmem:[%s5295_s16 + $0x68] sm:$0x1] }
  0xbe   : > { %4751 = vrcp.f32 %v2654_v48  ;;  %v2174_v24 = vadd.f32 %v2082_v54, %v1898_v49  ;;  %v2175_v58 = vadd.f32 %v2084_v10, %v1899_v50  ;;  %v2359_v18 = vrot.slane %v2250_v46, 2 }
  0xbf   : > { %4753 = vrcp.f32 %v2655_v53  ;;  %v2358_v17 = vsel %vm955_vm1, %v2356_v55, %v2357_v51  ;;  %v460_v59 = vunpack.c.l.bf16 %v428_v52  ;;  %v461_v34 = vunpack.c.h.bf16 %v428_v52  ;;  %v4132_v53 = vld [vmem:[%s5295_s16 + $0x60] sm:$0xe] }
  0xc0   : > { %v2360_v29 = vsel %vm955_vm1, %v2357_v51, %v2359_v18  ;;  %v2450_v60 = vadd.f32 %v2358_v17, %v2174_v24  ;;  %v569_v61 = vunpack.c.l.bf16 %v553_v56  ;;  %v846_v1 = vunpack.c.l.bf16 %v830_v57  ;;  %v4155_v17 = vld [vmem:[%s5295_s16 + $0x6c] sm:$0xff]  }
  0xc1   : > { %v2451_v30 = vadd.f32 %v2360_v29, %v2175_v58  ;;  %v496_v3 = vmul.f32 %v5297_v13, %v460_v59  ;;  %v497_v35 = vmul.f32 %v5297_v13, %v461_v34  ;;  %v603_v4 = vmul.f32 %v5299_v14, %v460_v59 }
  0xc2   : > { %v2489_v33 = vmul.f32 %v5730_v32, %v2450_v60  ;;  %v604_v6 = vmul.f32 %v5299_v14, %v461_v34  ;;  %v605_v8 = vmul.f32 %v5299_v14, %v569_v61  ;;  %v880_v9 = vmul.f32 %v5301_v15, %v846_v1 }
  0xc3   : > { %v2490_v62 = vmul.f32 %v5730_v32, %v2451_v30  ;;  %v714_v11 = vrot.slane %v603_v4, 1  ;;  %v881_v12 = vmul.f32 %v5301_v15, %v461_v34  ;;  %v882_v19 = vmul.f32 %v5301_v15, %v569_v61 }
  0xc4   : > { %v5807_v25 = vadd.f32 %v5738_v5, %v2489_v33  ;;  %v715_v26 = vrot.slane %v604_v6, 1  ;;  %v717_v0 = vrot.slane %v605_v8, 1  ;;  %v991_v63 = vrot.slane %v880_v9, 2 }
  0xc5   : > { %v5810_v37 = vadd.f32 %v5738_v5, %v2490_v62  ;;  %v992_v38 = vrot.slane %v881_v12, 2  ;;  %v994_v39 = vrot.slane %v882_v19, 2  ;;  %v1183_v41 = vmul.f32 %v5766_v27, %v5303_v16 }
  0xc6   : > { %v4220_v43 = vmul.f32 -1.442695, %v5807_v25  ;;  %v716_v40 = vsel %vm678_vm0, %v714_v11, %v715_v26  ;;  %v718_v7 = vsel %vm678_vm0, %v715_v26, %v717_v0  ;;  %v1184_v44 = vmul.f32 %v5768_v2, %v5303_v16  ;;  %v4196_v11 = vld [vmem:[%s5295_s16 + $0x6c] sm:$0xe] }
  0xc7   : > { %v4221_v45 = vmul.f32 -1.442695, %v5810_v37  ;;  %v805_v46 = vadd.f32 %v716_v40, %v496_v3  ;;  %v806_v47 = vadd.f32 %v718_v7, %v497_v35  ;;  %v993_v48 = vsel %vm955_vm1, %v991_v63, %v992_v38 }
  0xc8   : > { %v4752_v49 = vpop.eup %4751  ;;  %4755 = vpow2.f32 %v4220_v43  ;;  %v995_v50 = vsel %vm955_vm1, %v992_v38, %v994_v39  ;;  %v1256_v51 = vunpack.c.l.bf16 %v4116_v42  ;;  %v1290_v52 = vmul.f32 %v5766_v27, %v5308_v20 }
  0xc9   : > { %v4754_v54 = vpop.eup %4753  ;;  %v2750_v10 = vmul.f32 %v4752_v49, %v5741_v28  ;;  %4757 = vpow2.f32 %v4221_v45  ;;  %v1082_v55 = vadd.f32 %v993_v48, %v805_v46  ;;  %v1083_v56 = vadd.f32 %v995_v50, %v806_v47  ;;  %v4180_v28 = vld [vmem:[%s5295_s16 + $0x74] sm:$0x1] }
  0xca   : > { %v2751_v57 = vmul.f32 %v4754_v54, %v5744_v31  ;;  %v1291_v24 = vmul.f32 %v5768_v2, %v5308_v20  ;;  %v1292_v58 = vmul.f32 %v5308_v20, %v1256_v51  ;;  %v1400_v18 = vrot.slane %v1290_v52, 1 }
  0xcb   : > { %v1215_v59 = vadd.f32 %v1183_v41, %v1082_v55  ;;  %v1216_v34 = vadd.f32 %v1184_v44, %v1083_v56  ;;  %v1532_v29 = vunpack.c.l.bf16 %v4132_v53  ;;  %v1567_v60 = vmul.f32 %v5768_v2, %v5310_v21 }
  0xcc   : > { %v2777_v61 = vpack.c.bf16 %v2751_v57, %v2750_v10  ;;  %v1401_v1 = vrot.slane %v1291_v24, 1  ;;  %v1403_v30 = vrot.slane %v1292_v58, 1  ;;  %v1568_v31 = vmul.f32 %v5310_v21, %v1256_v51  ;;  %v554_v57 = vld [vmem:[%s5295_s16 + $0x68] sm:$0x1] }
  0xcd   : > { %v1566_v3 = vmul.f32 %v5310_v21, %v1532_v29  ;;  %v1677_v35 = vrot.slane %v1567_v60, 2  ;;  %v1832_v4 = vunpack.c.l.bf16 %v4155_v17  ;;  %v1833_v33 = vunpack.c.h.bf16 %v4155_v17  ;;  %v831_v29 = vld [vmem:[%s5295_s16 + $0x60] sm:$0xe] }
  0xce   : > { %4536 = vmatmul.mubr.msk.bf16.gmra.mrb[8].mxu0 %vm2804_vm2, %v2777_v61  ;;  %v1402_v6 = vsel %vm678_vm0, %v1400_v18, %v1401_v1  ;;  %v1404_v8 = vsel %vm678_vm0, %v1401_v1, %v1403_v30  ;;  %v1679_v9 = vrot.slane %v1568_v31, 2  ;;  %v1941_v62 = vunpack.c.l.bf16 %v4180_v28 }
  0xcf   : > { %v1491_v12 = vadd.f32 %v1402_v6, %v1215_v59  ;;  %v1492_v19 = vadd.f32 %v1404_v8, %v1216_v34  ;;  %v1676_v26 = vrot.slane %v1566_v3, 2  ;;  %v1868_v0 = vmul.f32 %v5312_v22, %v1832_v4 }
  0xd0   : > { %v1680_v63 = vsel %vm955_vm1, %v1677_v35, %v1679_v9  ;;  %v1869_v38 = vmul.f32 %v5312_v22, %v1833_v33  ;;  %v1975_v39 = vmul.f32 %v5314_v23, %v1832_v4  ;;  %v1976_v41 = vmul.f32 %v5314_v23, %v1833_v33  ;;  %v4093_v9 = vld [vmem:[%s5295_s16 + $0x6c] sm:$0xff]  }
  0xd1   : > { %v1678_v42 = vsel %vm955_vm1, %v1676_v26, %v1677_v35  ;;  %v1768_v43 = vadd.f32 %v1680_v63, %v1492_v19  ;;  %v1977_v40 = vmul.f32 %v5314_v23, %v1941_v62  ;;  %v2217_v7 = vunpack.c.l.bf16 %v4196_v11 }
  0xd2   : > { %v4756_v44 = vpop.eup %4755  ;;  %v1767_v45 = vadd.f32 %v1678_v42, %v1491_v12  ;;  %v2085_v46 = vrot.slane %v1975_v39, 1  ;;  %v2086_v47 = vrot.slane %v1976_v41, 1  ;;  %v2252_v48 = vmul.f32 %v5701_v36, %v1833_v33  ;;  %v4117_v42 = vld [vmem:[%s5295_s16 + $0x74] sm:$0x1] }
  0xd3   : > { %v4758_v49 = vpop.eup %4757  ;;  %v2656_v50 = vadd.f32 1.0, %v4756_v44  ;;  %v1901_v51 = vadd.f32 %v1869_v38, %v1768_v43  ;;  %v2088_v52 = vrot.slane %v1977_v40, 1  ;;  %v2251_v53 = vmul.f32 %v5701_v36, %v2217_v7 }
  0xd4   : > { %v2657_v54 = vadd.f32 1.0, %v4758_v49  ;;  %v1900_v10 = vadd.f32 %v1868_v0, %v1767_v45  ;;  %v2087_v55 = vsel %vm678_vm0, %v2085_v46, %v2086_v47  ;;  %v2253_v56 = vmul.f32 %v5701_v36, %v1941_v62 }
  0xd5   : > { %4759 = vrcp.f32 %v2656_v50  ;;  %v2089_v24 = vsel %vm678_vm0, %v2086_v47, %v2088_v52  ;;  %v2361_v58 = vrot.slane %v2251_v53, 2  ;;  %v2362_v18 = vrot.slane %v2252_v48, 2 }
  0xd6   : > { %4761 = vrcp.f32 %v2657_v54  ;;  %v2176_v17 = vadd.f32 %v2087_v55, %v1900_v10  ;;  %v2177_v59 = vadd.f32 %v2089_v24, %v1901_v51  ;;  %v2364_v34 = vrot.slane %v2253_v56, 2  ;;  %v4133_v54 = vld [vmem:[%s5295_s16 + $0x6c] sm:$0xe] }
  0xd7   : > { %v2363_v60 = vsel %vm955_vm1, %v2361_v58, %v2362_v18  ;;  %v498_v28 = vmul.f32 %v5766_v27, %v5297_v13  ;;  %v499_v61 = vmul.f32 %v5768_v2, %v5297_v13  ;;  %v570_v1 = vunpack.c.l.bf16 %v554_v57 }
  0xd8   : > { %v2365_v30 = vsel %vm955_vm1, %v2362_v18, %v2364_v34  ;;  %v2452_v31 = vadd.f32 %v2363_v60, %v2176_v17  ;;  %v606_v3 = vmul.f32 %v5766_v27, %v5299_v14  ;;  %v607_v35 = vmul.f32 %v5768_v2, %v5299_v14  ;;  %v4464_v60 = vld [vmem:[%s5295_s16 + $0x78] sm:$0xff]  }
  0xd9   : > { %v2453_v4 = vadd.f32 %v2365_v30, %v2177_v59  ;;  %v608_v33 = vmul.f32 %v5299_v14, %v570_v1  ;;  %v847_v6 = vunpack.c.l.bf16 %v831_v29  ;;  %v884_v8 = vmul.f32 %v5768_v2, %v5301_v15 }
  0xda   : > { %v2491_v62 = vmul.f32 %v5730_v32, %v2452_v31  ;;  %v719_v11 = vrot.slane %v606_v3, 1  ;;  %v720_v12 = vrot.slane %v607_v35, 1  ;;  %v885_v19 = vmul.f32 %v5301_v15, %v570_v1 }
  0xdb   : > { %v2492_v27 = vmul.f32 %v5730_v32, %v2453_v4  ;;  %v722_v26 = vrot.slane %v608_v33, 1  ;;  %v883_v0 = vmul.f32 %v5301_v15, %v847_v6  ;;  %v997_v63 = vrot.slane %v884_v8, 2 }
  0xdc   : > { %v5874_v38 = vadd.f32 %v5738_v5, %v2491_v62  ;;  %v721_v39 = vsel %vm678_vm0, %v719_v11, %v720_v12  ;;  %v999_v41 = vrot.slane %v885_v19, 2  ;;  %v1149_v2 = vunpack.c.l.bf16 %v4093_v9  ;;  %v4197_v19 = vld [vmem:[%s5295_s16 + $0x78] sm:$0xe] }
  0xdd   : > { %v5879_v43 = vadd.f32 %v5738_v5, %v2492_v27  ;;  %v723_v40 = vsel %vm678_vm0, %v720_v12, %v722_v26  ;;  %v807_v7 = vadd.f32 %v721_v39, %v498_v28  ;;  %v996_v44 = vrot.slane %v883_v0, 2  ;;  %v4181_v28 = vld [vmem:[%s5295_s16 + $0x80] sm:$0x1] }
  0xde   : > { %v4222_v45 = vmul.f32 -1.442695, %v5874_v38  ;;  %v808_v46 = vadd.f32 %v723_v40, %v499_v61  ;;  %v1000_v47 = vsel %vm955_vm1, %v997_v63, %v999_v41  ;;  %v1150_v48 = vunpack.c.h.bf16 %v4093_v9 }
  0xdf   : > { %v4760_v49 = vpop.eup %4759  ;;  %v4223_v50 = vmul.f32 -1.442695, %v5879_v43  ;;  %v998_v51 = vsel %vm955_vm1, %v996_v44, %v997_v63  ;;  %v1185_v52 = vmul.f32 %v5303_v16, %v1149_v2  ;;  %v1257_v53 = vunpack.c.l.bf16 %v4117_v42 }
  0xe0   : > { %v4762_v10 = vpop.eup %4761  ;;  %v2752_v55 = vmul.f32 %v4760_v49, %v5807_v25  ;;  %4763 = vpow2.f32 %v4222_v45  ;;  %v1084_v56 = vadd.f32 %v998_v51, %v807_v7  ;;  %v1085_v57 = vadd.f32 %v1000_v47, %v808_v46 }
  0xe1   : > { %v2753_v24 = vmul.f32 %v4762_v10, %v5810_v37  ;;  %4765 = vpow2.f32 %v4223_v50  ;;  %v1186_v58 = vmul.f32 %v5303_v16, %v1150_v48  ;;  %v1293_v18 = vmul.f32 %v5308_v20, %v1149_v2 }
  0xe2   : > { %v1217_v17 = vadd.f32 %v1185_v52, %v1084_v56  ;;  %v1294_v59 = vmul.f32 %v5308_v20, %v1150_v48  ;;  %v1295_v34 = vmul.f32 %v5308_v20, %v1257_v53  ;;  %v1533_v29 = vunpack.c.l.bf16 %v4133_v54 }
  0xe3   : > { %v2778_v61 = vpack.c.bf16 %v2753_v24, %v2752_v55  ;;  %v1218_v25 = vadd.f32 %v1186_v58, %v1085_v57  ;;  %v1405_v1 = vrot.slane %v1293_v18, 1  ;;  %v1570_v30 = vmul.f32 %v5310_v21, %v1150_v48  ;;  %v432_v55 = vld [vmem:[%s5295_s16 + $0x6c] sm:$0xff]   ;;  %v555_v18 = vld [vmem:[%s5295_s16 + $0x74] sm:$0x1] }
  0xe4   : > { %v1406_v37 = vrot.slane %v1294_v59, 1  ;;  %v1408_v31 = vrot.slane %v1295_v34, 1  ;;  %v1569_v3 = vmul.f32 %v5310_v21, %v1533_v29  ;;  %v1571_v35 = vmul.f32 %v5310_v21, %v1257_v53 }
  0xe5   : > { %4539 = vmatprep.mubr.msk.bf16.mxu0 %vm2804_vm2, %v2778_v61  ;;  %v1682_v4 = vrot.slane %v1570_v30, 2  ;;  %v5900_v33 = vunpack.c.l.bf16 %v4464_v60  ;;  %v5902_v6 = vunpack.c.h.bf16 %v4464_v60  ;;  %v1942_v8 = vunpack.c.l.bf16 %v4181_v28 }
  0xe6   : > { %v1407_v9 = vsel %vm678_vm0, %v1405_v1, %v1406_v37  ;;  %v1409_v62 = vsel %vm678_vm0, %v1406_v37, %v1408_v31  ;;  %v1681_v11 = vrot.slane %v1569_v3, 2  ;;  %v1684_v12 = vrot.slane %v1571_v35, 2 }
  0xe7   : > { %v1493_v27 = vadd.f32 %v1407_v9, %v1217_v17  ;;  %v1494_v26 = vadd.f32 %v1409_v62, %v1218_v25  ;;  %v1870_v0 = vmul.f32 %v5900_v33, %v5312_v22  ;;  %v1871_v63 = vmul.f32 %v5902_v6, %v5312_v22  ;;  %v832_v17 = vld [vmem:[%s5295_s16 + $0x6c] sm:$0xe] }
  0xe8   : > { %v1683_v39 = vsel %vm955_vm1, %v1681_v11, %v1682_v4  ;;  %v1685_v41 = vsel %vm955_vm1, %v1682_v4, %v1684_v12  ;;  %v1978_v2 = vmul.f32 %v5900_v33, %v5314_v23  ;;  %v1979_v42 = vmul.f32 %v5902_v6, %v5314_v23 }
  0xe9   : > { %v1769_v40 = vadd.f32 %v1683_v39, %v1493_v27  ;;  %v1770_v7 = vadd.f32 %v1685_v41, %v1494_v26  ;;  %v1980_v44 = vmul.f32 %v5314_v23, %v1942_v8  ;;  %v2218_v45 = vunpack.c.l.bf16 %v4197_v19 }
  0xea   : > { %v4764_v46 = vpop.eup %4763  ;;  %v2090_v47 = vrot.slane %v1978_v2, 1  ;;  %v2091_v48 = vrot.slane %v1979_v42, 1  ;;  %v2255_v49 = vmul.f32 %v5701_v36, %v5902_v6  ;;  %v2256_v50 = vmul.f32 %v5701_v36, %v1942_v8 }
  0xeb   : > { %v4766_v51 = vpop.eup %4765  ;;  %v2658_v52 = vadd.f32 1.0, %v4764_v46  ;;  %v1902_v53 = vadd.f32 %v1870_v0, %v1769_v40  ;;  %v1903_v54 = vadd.f32 %v1871_v63, %v1770_v7  ;;  %v2093_v10 = vrot.slane %v1980_v44, 1  ;;  %v4118_v44 = vld [vmem:[%s5295_s16 + $0x80] sm:$0x1] }
  0xec   : > { %v2659_v56 = vadd.f32 1.0, %v4766_v51  ;;  %v2092_v57 = vsel %vm678_vm0, %v2090_v47, %v2091_v48  ;;  %v2254_v24 = vmul.f32 %v5701_v36, %v2218_v45  ;;  %v2367_v58 = vrot.slane %v2255_v49, 2 }
  0xed   : > { %4767 = vrcp.f32 %v2658_v52  ;;  %v2094_v59 = vsel %vm678_vm0, %v2091_v48, %v2093_v10  ;;  %v2178_v34 = vadd.f32 %v2092_v57, %v1902_v53  ;;  %v2369_v29 = vrot.slane %v2256_v50, 2  ;;  %v4134_v57 = vld [vmem:[%s5295_s16 + $0x78] sm:$0xe] }
  0xee   : > { %4769 = vrcp.f32 %v2659_v56  ;;  %v2179_v60 = vadd.f32 %v2094_v59, %v1903_v54  ;;  %v2366_v28 = vrot.slane %v2254_v24, 2  ;;  %v464_v61 = vunpack.c.l.bf16 %v432_v55 }
  0xef   : > { %v2370_v25 = vsel %vm955_vm1, %v2367_v58, %v2369_v29  ;;  %v465_v1 = vunpack.c.h.bf16 %v432_v55  ;;  %v571_v30 = vunpack.c.l.bf16 %v555_v18  ;;  %v848_v37 = vunpack.c.l.bf16 %v832_v17 }
  0xf0   : > { %v2368_v31 = vsel %vm955_vm1, %v2366_v28, %v2367_v58  ;;  %v2455_v3 = vadd.f32 %v2370_v25, %v2179_v60  ;;  %v500_v35 = vmul.f32 %v5297_v13, %v464_v61  ;;  %v609_v4 = vmul.f32 %v5299_v14, %v464_v61  ;;  %v4159_v60 = vld [vmem:[%s5295_s16 + $0x84] sm:$0xff]  }
  0xf1   : > { %v2454_v8 = vadd.f32 %v2368_v31, %v2178_v34  ;;  %v501_v9 = vmul.f32 %v5297_v13, %v465_v1  ;;  %v610_v62 = vmul.f32 %v5299_v14, %v465_v1  ;;  %v611_v11 = vmul.f32 %v5299_v14, %v571_v30 }
  0xf2   : > { %v2494_v12 = vmul.f32 %v5730_v32, %v2455_v3  ;;  %v724_v19 = vrot.slane %v609_v4, 1  ;;  %v886_v27 = vmul.f32 %v5301_v15, %v848_v37  ;;  %v887_v26 = vmul.f32 %v5301_v15, %v465_v1 }
  0xf3   : > { %v2493_v0 = vmul.f32 %v5730_v32, %v2454_v8  ;;  %v725_v63 = vrot.slane %v610_v62, 1  ;;  %v727_v39 = vrot.slane %v611_v11, 1  ;;  %v888_v41 = vmul.f32 %v5301_v15, %v571_v30  ;;  %v4182_v30 = vld [vmem:[%s5295_s16 + $0x8c] sm:$0x1] }
  0xf4   : > { %v5940_v2 = vadd.f32 %v5738_v5, %v2494_v12  ;;  %v1001_v42 = vrot.slane %v886_v27, 2  ;;  %v1002_v40 = vrot.slane %v887_v26, 2  ;;  %v1187_v7 = vmul.f32 %v5900_v33, %v5303_v16 }
  0xf5   : > { %v5946_v45 = vadd.f32 %v5738_v5, %v2493_v0  ;;  %v726_v46 = vsel %vm678_vm0, %v724_v19, %v725_v63  ;;  %v728_v47 = vsel %vm678_vm0, %v725_v63, %v727_v39  ;;  %v1004_v48 = vrot.slane %v888_v41, 2  ;;  %v4198_v63 = vld [vmem:[%s5295_s16 + $0x84] sm:$0xe] }
  0xf6   : > { %v4225_v49 = vmul.f32 -1.442695, %v5940_v2  ;;  %v809_v50 = vadd.f32 %v726_v46, %v500_v35  ;;  %v810_v51 = vadd.f32 %v728_v47, %v501_v9  ;;  %v1003_v52 = vsel %vm955_vm1, %v1001_v42, %v1002_v40 }
  0xf7   : > { %v4768_v53 = vpop.eup %4767  ;;  %v4224_v54 = vmul.f32 -1.442695, %v5946_v45  ;;  %v1005_v10 = vsel %vm955_vm1, %v1002_v40, %v1004_v48  ;;  %v1188_v55 = vmul.f32 %v5902_v6, %v5303_v16  ;;  %v1258_v56 = vunpack.c.l.bf16 %v4118_v44 }
  0xf8   : > { %v4770_v24 = vpop.eup %4769  ;;  %v2754_v58 = vmul.f32 %v4768_v53, %v5874_v38  ;;  %4771 = vpow2.f32 %v4225_v49  ;;  %v1086_v18 = vadd.f32 %v1003_v52, %v809_v50  ;;  %v1087_v17 = vadd.f32 %v1005_v10, %v810_v51 }
  0xf9   : > { %v2755_v59 = vmul.f32 %v4770_v24, %v5879_v43  ;;  %4773 = vpow2.f32 %v4224_v54  ;;  %v1296_v34 = vmul.f32 %v5900_v33, %v5308_v20  ;;  %v1297_v29 = vmul.f32 %v5902_v6, %v5308_v20 }
  0xfa   : > { %v1219_v28 = vadd.f32 %v1187_v7, %v1086_v18  ;;  %v1220_v61 = vadd.f32 %v1188_v55, %v1087_v17  ;;  %v1298_v25 = vmul.f32 %v5308_v20, %v1258_v56  ;;  %v1534_v1 = vunpack.c.l.bf16 %v4134_v57 }
  0xfb   : > { %v2779_v38 = vpack.c.bf16 %v2755_v59, %v2754_v58  ;;  %v1410_v37 = vrot.slane %v1296_v34, 1  ;;  %v1411_v31 = vrot.slane %v1297_v29, 1  ;;  %v1573_v43 = vmul.f32 %v5902_v6, %v5310_v21 }
  0xfc   : > { %v1413_v3 = vrot.slane %v1298_v25, 1  ;;  %v1572_v35 = vmul.f32 %v5310_v21, %v1534_v1  ;;  %v1574_v4 = vmul.f32 %v5310_v21, %v1258_v56  ;;  %v1836_v8 = vunpack.c.l.bf16 %v4159_v60  ;;  %v833_v1 = vld [vmem:[%s5295_s16 + $0x78] sm:$0xe] }
  0xfd   : > { %4540 = vmatmul.mubr.msk.bf16.gmra.mrb[12].mxu0 %vm2804_vm2, %v2779_v38  ;;  %v1412_v9 = vsel %vm678_vm0, %v1410_v37, %v1411_v31  ;;  %v1687_v62 = vrot.slane %v1573_v43, 2  ;;  %v1837_v11 = vunpack.c.h.bf16 %v4159_v60  ;;  %v1943_v12 = vunpack.c.l.bf16 %v4182_v30  ;;  %v556_v60 = vld [vmem:[%s5295_s16 + $0x80] sm:$0x1] }
  0xfe   : > { %v1414_v19 = vsel %vm678_vm0, %v1411_v31, %v1413_v3  ;;  %v1495_v27 = vadd.f32 %v1412_v9, %v1219_v28  ;;  %v1686_v26 = vrot.slane %v1572_v35, 2  ;;  %v1689_v0 = vrot.slane %v1574_v4, 2 }
  0xff   : > { %v1496_v39 = vadd.f32 %v1414_v19, %v1220_v61  ;;  %v1872_v41 = vmul.f32 %v5312_v22, %v1836_v8  ;;  %v1873_v42 = vmul.f32 %v5312_v22, %v1837_v11  ;;  %v1981_v40 = vmul.f32 %v5314_v23, %v1836_v8 }
 0x100   : > { %v1688_v7 = vsel %vm955_vm1, %v1686_v26, %v1687_v62  ;;  %v1690_v44 = vsel %vm955_vm1, %v1687_v62, %v1689_v0  ;;  %v1982_v46 = vmul.f32 %v5314_v23, %v1837_v11  ;;  %v1983_v47 = vmul.f32 %v5314_v23, %v1943_v12  ;;  %v4097_v62 = vld [vmem:[%s5295_s16 + $0x84] sm:$0xff]  }
 0x101   : > { %v1771_v48 = vadd.f32 %v1688_v7, %v1495_v27  ;;  %v1772_v49 = vadd.f32 %v1690_v44, %v1496_v39  ;;  %v2095_v50 = vrot.slane %v1981_v40, 1  ;;  %v2219_v51 = vunpack.c.l.bf16 %v4198_v63 }
 0x102   : > { %v4772_v52 = vpop.eup %4771  ;;  %v2096_v53 = vrot.slane %v1982_v46, 1  ;;  %v2098_v54 = vrot.slane %v1983_v47, 1  ;;  %v2258_v10 = vmul.f32 %v5701_v36, %v1837_v11  ;;  %v2259_v55 = vmul.f32 %v5701_v36, %v1943_v12  ;;  %v4119_v47 = vld [vmem:[%s5295_s16 + $0x8c] sm:$0x1] }
 0x103   : > { %v4774_v56 = vpop.eup %4773  ;;  %v2661_v57 = vadd.f32 1.0, %v4772_v52  ;;  %v1904_v24 = vadd.f32 %v1872_v41, %v1771_v48  ;;  %v1905_v58 = vadd.f32 %v1873_v42, %v1772_v49  ;;  %v2257_v18 = vmul.f32 %v5701_v36, %v2219_v51 }
 0x104   : > { %v2660_v17 = vadd.f32 1.0, %v4774_v56  ;;  %v2097_v59 = vsel %vm678_vm0, %v2095_v50, %v2096_v53  ;;  %v2099_v34 = vsel %vm678_vm0, %v2096_v53, %v2098_v54  ;;  %v2372_v29 = vrot.slane %v2258_v10, 2 }
 0x105   : > { %4775 = vrcp.f32 %v2661_v57  ;;  %v2180_v28 = vadd.f32 %v2097_v59, %v1904_v24  ;;  %v2181_v61 = vadd.f32 %v2099_v34, %v1905_v58  ;;  %v2371_v25 = vrot.slane %v2257_v18, 2  ;;  %v4135_v24 = vld [vmem:[%s5295_s16 + $0x84] sm:$0xe] }
 0x106   : > { %4777 = vrcp.f32 %v2660_v17  ;;  %v2374_v30 = vrot.slane %v2259_v55, 2  ;;  %v502_v38 = vmul.f32 %v5900_v33, %v5297_v13  ;;  %v503_v36 = vmul.f32 %v5902_v6, %v5297_v13 }
 0x107   : > { %v2373_v37 = vsel %vm955_vm1, %v2371_v25, %v2372_v29  ;;  %v572_v31 = vunpack.c.l.bf16 %v556_v60  ;;  %v612_v43 = vmul.f32 %v5900_v33, %v5299_v14  ;;  %v613_v3 = vmul.f32 %v5902_v6, %v5299_v14 }
 0x108   : > { %v2375_v35 = vsel %vm955_vm1, %v2372_v29, %v2374_v30  ;;  %v2456_v4 = vadd.f32 %v2373_v37, %v2180_v28  ;;  %v849_v8 = vunpack.c.l.bf16 %v833_v1  ;;  %v890_v9 = vmul.f32 %v5902_v6, %v5301_v15  ;;  %v4465_v28 = vld [vmem:[%s5295_s16 + $0x90] sm:$0xff]  }
 0x109   : > { %v2457_v11 = vadd.f32 %v2375_v35, %v2181_v61  ;;  %v614_v12 = vmul.f32 %v5299_v14, %v572_v31  ;;  %v729_v19 = vrot.slane %v612_v43, 1  ;;  %v730_v27 = vrot.slane %v613_v3, 1 }
 0x10a   : > { %v2495_v26 = vmul.f32 %v5730_v32, %v2456_v4  ;;  %v889_v33 = vmul.f32 %v5301_v15, %v849_v8  ;;  %v891_v0 = vmul.f32 %v5301_v15, %v572_v31  ;;  %v1007_v63 = vrot.slane %v890_v9, 2 }
 0x10b   : > { %v2496_v39 = vmul.f32 %v5730_v32, %v2457_v11  ;;  %v731_v41 = vsel %vm678_vm0, %v729_v19, %v730_v27  ;;  %v732_v42 = vrot.slane %v614_v12, 1  ;;  %v1153_v6 = vunpack.c.l.bf16 %v4097_v62  ;;  %v4199_v11 = vld [vmem:[%s5295_s16 + $0x90] sm:$0xe] }
 0x10c   : > { %v6008_v40 = vadd.f32 %v5738_v5, %v2495_v26  ;;  %v811_v7 = vadd.f32 %v731_v41, %v502_v38  ;;  %v1006_v44 = vrot.slane %v889_v33, 2  ;;  %v1009_v46 = vrot.slane %v891_v0, 2  ;;  %v4183_v38 = vld [vmem:[%s5295_s16 + $0x98] sm:$0x1] }
 0x10d   : > { %v6012_v48 = vadd.f32 %v5738_v5, %v2496_v39  ;;  %v733_v49 = vsel %vm678_vm0, %v730_v27, %v732_v42  ;;  %v1154_v50 = vunpack.c.h.bf16 %v4097_v62  ;;  %v1189_v32 = vmul.f32 %v5303_v16, %v1153_v6 }
 0x10e   : > { %v4226_v51 = vmul.f32 -1.442695, %v6008_v40  ;;  %v812_v52 = vadd.f32 %v733_v49, %v503_v36  ;;  %v1008_v53 = vsel %vm955_vm1, %v1006_v44, %v1007_v63  ;;  %v1010_v54 = vsel %vm955_vm1, %v1007_v63, %v1009_v46  ;;  %v6054_v49 = vld [vmem:[%s6858_s1 + $0x8] ss:$0 sm:$0xff] }
 0x10f   : > { %v4776_v10 = vpop.eup %4775  ;;  %v4227_v55 = vmul.f32 -1.442695, %v6012_v48  ;;  %v1088_v56 = vadd.f32 %v1008_v53, %v811_v7  ;;  %v1190_v5 = vmul.f32 %v5303_v16, %v1154_v50  ;;  %v1259_v57 = vunpack.c.l.bf16 %v4119_v47 }
 0x110   : > { %v4778_v58 = vpop.eup %4777  ;;  %v2757_v18 = vmul.f32 %v4776_v10, %v5940_v2  ;;  %4779 = vpow2.f32 %v4226_v51  ;;  %v1089_v17 = vadd.f32 %v1010_v54, %v812_v52  ;;  %v1299_v59 = vmul.f32 %v5308_v20, %v1153_v6 }
 0x111   : > { %v2756_v34 = vmul.f32 %v4778_v58, %v5946_v45  ;;  %4781 = vpow2.f32 %v4227_v55  ;;  %v1221_v29 = vadd.f32 %v1189_v32, %v1088_v56  ;;  %v1300_v60 = vmul.f32 %v5308_v20, %v1154_v50 }
 0x112   : > { %v1222_v61 = vadd.f32 %v1190_v5, %v1089_v17  ;;  %v1301_v25 = vmul.f32 %v5308_v20, %v1259_v57  ;;  %v1415_v1 = vrot.slane %v1299_v59, 1  ;;  %v1535_v30 = vunpack.c.l.bf16 %v4135_v24  ;;  %v436_v24 = vld [vmem:[%s5295_s16 + $0x84] sm:$0xff]  }
 0x113   : > { %v2780_v36 = vpack.c.bf16 %v2757_v18, %v2756_v34  ;;  %v1416_v2 = vrot.slane %v1300_v60, 1  ;;  %v1576_v37 = vmul.f32 %v5310_v21, %v1154_v50  ;;  %v1577_v31 = vmul.f32 %v5310_v21, %v1259_v57  ;;  %v557_v34 = vld [vmem:[%s5295_s16 + $0x8c] sm:$0x1] }
 0x114   : > { %v1418_v43 = vrot.slane %v1301_v25, 1  ;;  %v1575_v45 = vmul.f32 %v5310_v21, %v1535_v30  ;;  %v6032_v3 = vunpack.c.l.bf16 %v4465_v28  ;;  %v6034_v35 = vunpack.c.h.bf16 %v4465_v28 }
 0x115   : > { %4543 = vmatprep.mubr.msk.bf16.mxu0 %vm2804_vm2, %v2780_v36  ;;  %v1417_v4 = vsel %vm678_vm0, %v1415_v1, %v1416_v2  ;;  %v1692_v8 = vrot.slane %v1576_v37, 2  ;;  %v1694_v9 = vrot.slane %v1577_v31, 2  ;;  %v1944_v62 = vunpack.c.l.bf16 %v4183_v38 }
 0x116   : > { %v1419_v12 = vsel %vm678_vm0, %v1416_v2, %v1418_v43  ;;  %v1497_v19 = vadd.f32 %v1417_v4, %v1221_v29  ;;  %v1691_v27 = vrot.slane %v1575_v45, 2  ;;  %v1874_v26 = vmul.f32 %v6032_v3, %v5312_v22  ;;  %v834_v29 = vld [vmem:[%s5295_s16 + $0x84] sm:$0xe] }
 0x117   : > { %v1498_v33 = vadd.f32 %v1419_v12, %v1222_v61  ;;  %v1695_v0 = vsel %vm955_vm1, %v1692_v8, %v1694_v9  ;;  %v1875_v63 = vmul.f32 %v6034_v35, %v5312_v22  ;;  %v1984_v39 = vmul.f32 %v6032_v3, %v5314_v23 }
 0x118   : > { %v1693_v41 = vsel %vm955_vm1, %v1691_v27, %v1692_v8  ;;  %v1985_v42 = vmul.f32 %v6034_v35, %v5314_v23  ;;  %v1986_v6 = vmul.f32 %v5314_v23, %v1944_v62  ;;  %v2220_v7 = vunpack.c.l.bf16 %v4199_v11  ;;  %v6073_v8 = vld [vmem:[%s6843_s2] ss:$0 sm:$0xff] }
 0x119   : > { %v1773_v44 = vadd.f32 %v1693_v41, %v1497_v19  ;;  %v1774_v46 = vadd.f32 %v1695_v0, %v1498_v33  ;;  %v2100_v47 = vrot.slane %v1984_v39, 1  ;;  %v2261_v50 = vmul.f32 %v6054_v49, %v6034_v35  ;;  %v6085_v0 = vld [vmem:[%s6844_s3] ss:$0 sm:$0xff] }
 0x11a   : > { %v4780_v32 = vpop.eup %4779  ;;  %v2101_v51 = vrot.slane %v1985_v42, 1  ;;  %v2103_v52 = vrot.slane %v1986_v6, 1  ;;  %v2260_v53 = vmul.f32 %v6054_v49, %v2220_v7  ;;  %v2262_v54 = vmul.f32 %v6054_v49, %v1944_v62 }
 0x11b   : > { %v4782_v10 = vpop.eup %4781  ;;  %v2662_v55 = vadd.f32 1.0, %v4780_v32  ;;  %v1906_v56 = vadd.f32 %v1874_v26, %v1773_v44  ;;  %v1907_v5 = vadd.f32 %v1875_v63, %v1774_v46  ;;  %v2377_v57 = vrot.slane %v2261_v50, 2 }
 0x11c   : > { %v2663_v58 = vadd.f32 1.0, %v4782_v10  ;;  %v2102_v18 = vsel %vm678_vm0, %v2100_v47, %v2101_v51  ;;  %v2104_v17 = vsel %vm678_vm0, %v2101_v51, %v2103_v52  ;;  %v2376_v59 = vrot.slane %v2260_v53, 2  ;;  %v4120_v47 = vld [vmem:[%s5295_s16 + $0x98] sm:$0x1] }
 0x11d   : > { %4783 = vrcp.f32 %v2662_v55  ;;  %v2182_v60 = vadd.f32 %v2102_v18, %v1906_v56  ;;  %v2183_v28 = vadd.f32 %v2104_v17, %v1907_v5  ;;  %v2379_v61 = vrot.slane %v2262_v54, 2 }
 0x11e   : > { %4785 = vrcp.f32 %v2663_v58  ;;  %v2378_v25 = vsel %vm955_vm1, %v2376_v59, %v2377_v57  ;;  %v468_v1 = vunpack.c.l.bf16 %v436_v24  ;;  %v469_v30 = vunpack.c.h.bf16 %v436_v24  ;;  %v4136_v58 = vld [vmem:[%s5295_s16 + $0x90] sm:$0xe] }
 0x11f   : > { %v2380_v38 = vsel %vm955_vm1, %v2377_v57, %v2379_v61  ;;  %v2458_v36 = vadd.f32 %v2378_v25, %v2182_v60  ;;  %v573_v2 = vunpack.c.l.bf16 %v557_v34  ;;  %v850_v37 = vunpack.c.l.bf16 %v834_v29  ;;  %v4163_v25 = vld [vmem:[%s5295_s16 + $0x9c] sm:$0xff]  }
 0x120   : > { %v2459_v31 = vadd.f32 %v2380_v38, %v2183_v28  ;;  %v504_v43 = vmul.f32 %v5297_v13, %v468_v1  ;;  %v505_v45 = vmul.f32 %v5297_v13, %v469_v30  ;;  %v615_v4 = vmul.f32 %v5299_v14, %v468_v1 }
 0x121   : > { %v2497_v9 = vmul.f32 %v6073_v8, %v2458_v36  ;;  %v616_v62 = vmul.f32 %v5299_v14, %v469_v30  ;;  %v617_v11 = vmul.f32 %v5299_v14, %v573_v2  ;;  %v892_v12 = vmul.f32 %v5301_v15, %v850_v37 }
 0x122   : > { %v2498_v19 = vmul.f32 %v6073_v8, %v2459_v31  ;;  %v734_v27 = vrot.slane %v615_v4, 1  ;;  %v893_v26 = vmul.f32 %v5301_v15, %v469_v30  ;;  %v894_v33 = vmul.f32 %v5301_v15, %v573_v2 }
 0x123   : > { %v6088_v63 = vadd.f32 %v6085_v0, %v2497_v9  ;;  %v735_v39 = vrot.slane %v616_v62, 1  ;;  %v737_v41 = vrot.slane %v617_v11, 1  ;;  %v1011_v42 = vrot.slane %v892_v12, 2 }
 0x124   : > { %v6091_v6 = vadd.f32 %v6085_v0, %v2498_v19  ;;  %v1012_v7 = vrot.slane %v893_v26, 2  ;;  %v1014_v44 = vrot.slane %v894_v33, 2  ;;  %v1191_v46 = vmul.f32 %v6032_v3, %v5303_v16 }
 0x125   : > { %v4228_v50 = vmul.f32 -1.442695, %v6088_v63  ;;  %v736_v32 = vsel %vm678_vm0, %v734_v27, %v735_v39  ;;  %v738_v51 = vsel %vm678_vm0, %v735_v39, %v737_v41  ;;  %v1192_v52 = vmul.f32 %v6034_v35, %v5303_v16  ;;  %v4200_v27 = vld [vmem:[%s5295_s16 + $0x9c] sm:$0xe] }
 0x126   : > { %v4229_v53 = vmul.f32 -1.442695, %v6091_v6  ;;  %v813_v54 = vadd.f32 %v736_v32, %v504_v43  ;;  %v814_v10 = vadd.f32 %v738_v51, %v505_v45  ;;  %v1013_v55 = vsel %vm955_vm1, %v1011_v42, %v1012_v7 }
 0x127   : > { %v4784_v56 = vpop.eup %4783  ;;  %4787 = vpow2.f32 %v4228_v50  ;;  %v1015_v5 = vsel %vm955_vm1, %v1012_v7, %v1014_v44  ;;  %v1260_v57 = vunpack.c.l.bf16 %v4120_v47  ;;  %v1302_v24 = vmul.f32 %v6032_v3, %v5308_v20 }
 0x128   : > { %v4786_v18 = vpop.eup %4785  ;;  %v2758_v17 = vmul.f32 %v4784_v56, %v6008_v40  ;;  %4789 = vpow2.f32 %v4229_v53  ;;  %v1090_v59 = vadd.f32 %v1013_v55, %v813_v54  ;;  %v1091_v34 = vadd.f32 %v1015_v5, %v814_v10  ;;  %v4184_v40 = vld [vmem:[%s5295_s16 + $0xa4] sm:$0x1] }
 0x129   : > { %v2759_v29 = vmul.f32 %v4786_v18, %v6012_v48  ;;  %v1303_v60 = vmul.f32 %v6034_v35, %v5308_v20  ;;  %v1304_v28 = vmul.f32 %v5308_v20, %v1260_v57  ;;  %v1420_v61 = vrot.slane %v1302_v24, 1 }
 0x12a   : > { %v1223_v1 = vadd.f32 %v1191_v46, %v1090_v59  ;;  %v1224_v30 = vadd.f32 %v1192_v52, %v1091_v34  ;;  %v1536_v38 = vunpack.c.l.bf16 %v4136_v58  ;;  %v1579_v36 = vmul.f32 %v6034_v35, %v5310_v21 }
 0x12b   : > { %v2781_v2 = vpack.c.bf16 %v2759_v29, %v2758_v17  ;;  %v1421_v37 = vrot.slane %v1303_v60, 1  ;;  %v1423_v31 = vrot.slane %v1304_v28, 1  ;;  %v1580_v48 = vmul.f32 %v5310_v21, %v1260_v57  ;;  %v558_v29 = vld [vmem:[%s5295_s16 + $0x98] sm:$0x1] }
 0x12c   : > { %v1578_v43 = vmul.f32 %v5310_v21, %v1536_v38  ;;  %v1697_v45 = vrot.slane %v1579_v36, 2  ;;  %v1840_v4 = vunpack.c.l.bf16 %v4163_v25  ;;  %v1841_v9 = vunpack.c.h.bf16 %v4163_v25  ;;  %v835_v38 = vld [vmem:[%s5295_s16 + $0x90] sm:$0xe] }
 0x12d   : > { %4544 = vmatmul.mubr.msk.bf16.gmra.mrb[16].mxu0 %vm2804_vm2, %v2781_v2  ;;  %v1422_v62 = vsel %vm678_vm0, %v1420_v61, %v1421_v37  ;;  %v1424_v11 = vsel %vm678_vm0, %v1421_v37, %v1423_v31  ;;  %v1699_v12 = vrot.slane %v1580_v48, 2  ;;  %v1945_v19 = vunpack.c.l.bf16 %v4184_v40 }
 0x12e   : > { %v1499_v26 = vadd.f32 %v1422_v62, %v1223_v1  ;;  %v1500_v33 = vadd.f32 %v1424_v11, %v1224_v30  ;;  %v1696_v39 = vrot.slane %v1578_v43, 2  ;;  %v1876_v41 = vmul.f32 %v5312_v22, %v1840_v4 }
 0x12f   : > { %v1700_v42 = vsel %vm955_vm1, %v1697_v45, %v1699_v12  ;;  %v1877_v7 = vmul.f32 %v5312_v22, %v1841_v9  ;;  %v1987_v44 = vmul.f32 %v5314_v23, %v1840_v4  ;;  %v1988_v46 = vmul.f32 %v5314_v23, %v1841_v9  ;;  %v4101_v12 = vld [vmem:[%s5295_s16 + $0x9c] sm:$0xff]  }
 0x130   : > { %v1698_v47 = vsel %vm955_vm1, %v1696_v39, %v1697_v45  ;;  %v1776_v50 = vadd.f32 %v1700_v42, %v1500_v33  ;;  %v1989_v32 = vmul.f32 %v5314_v23, %v1945_v19  ;;  %v2221_v51 = vunpack.c.l.bf16 %v4200_v27 }
 0x131   : > { %v4788_v52 = vpop.eup %4787  ;;  %v1775_v53 = vadd.f32 %v1698_v47, %v1499_v26  ;;  %v2105_v54 = vrot.slane %v1987_v44, 1  ;;  %v2106_v10 = vrot.slane %v1988_v46, 1  ;;  %v2264_v55 = vmul.f32 %v6054_v49, %v1841_v9  ;;  %v4121_v47 = vld [vmem:[%s5295_s16 + $0xa4] sm:$0x1] }
 0x132   : > { %v4790_v56 = vpop.eup %4789  ;;  %v2664_v5 = vadd.f32 1.0, %v4788_v52  ;;  %v1909_v57 = vadd.f32 %v1877_v7, %v1776_v50  ;;  %v2108_v24 = vrot.slane %v1989_v32, 1  ;;  %v2263_v58 = vmul.f32 %v6054_v49, %v2221_v51 }
 0x133   : > { %v2665_v18 = vadd.f32 1.0, %v4790_v56  ;;  %v1908_v17 = vadd.f32 %v1876_v41, %v1775_v53  ;;  %v2107_v59 = vsel %vm678_vm0, %v2105_v54, %v2106_v10  ;;  %v2265_v34 = vmul.f32 %v6054_v49, %v1945_v19 }
 0x134   : > { %4791 = vrcp.f32 %v2664_v5  ;;  %v2109_v60 = vsel %vm678_vm0, %v2106_v10, %v2108_v24  ;;  %v2381_v28 = vrot.slane %v2263_v58, 2  ;;  %v2382_v61 = vrot.slane %v2264_v55, 2 }
 0x135   : > { %4793 = vrcp.f32 %v2665_v18  ;;  %v2184_v25 = vadd.f32 %v2107_v59, %v1908_v17  ;;  %v2185_v1 = vadd.f32 %v2109_v60, %v1909_v57  ;;  %v2384_v30 = vrot.slane %v2265_v34, 2  ;;  %v4137_v18 = vld [vmem:[%s5295_s16 + $0x9c] sm:$0xe] }
 0x136   : > { %v2383_v36 = vsel %vm955_vm1, %v2381_v28, %v2382_v61  ;;  %v506_v40 = vmul.f32 %v6032_v3, %v5297_v13  ;;  %v507_v2 = vmul.f32 %v6034_v35, %v5297_v13  ;;  %v574_v37 = vunpack.c.l.bf16 %v558_v29 }
 0x137   : > { %v2385_v31 = vsel %vm955_vm1, %v2382_v61, %v2384_v30  ;;  %v2460_v48 = vadd.f32 %v2383_v36, %v2184_v25  ;;  %v618_v43 = vmul.f32 %v6032_v3, %v5299_v14  ;;  %v619_v45 = vmul.f32 %v6034_v35, %v5299_v14  ;;  %v4466_v36 = vld [vmem:[%s5295_s16 + $0xa8] sm:$0xff]  }
 0x138   : > { %v2461_v4 = vadd.f32 %v2385_v31, %v2185_v1  ;;  %v620_v9 = vmul.f32 %v5299_v14, %v574_v37  ;;  %v851_v62 = vunpack.c.l.bf16 %v835_v38  ;;  %v896_v11 = vmul.f32 %v6034_v35, %v5301_v15 }
 0x139   : > { %v2499_v19 = vmul.f32 %v6073_v8, %v2460_v48  ;;  %v739_v27 = vrot.slane %v618_v43, 1  ;;  %v740_v26 = vrot.slane %v619_v45, 1  ;;  %v897_v33 = vmul.f32 %v5301_v15, %v574_v37 }
 0x13a   : > { %v2500_v3 = vmul.f32 %v6073_v8, %v2461_v4  ;;  %v742_v39 = vrot.slane %v620_v9, 1  ;;  %v895_v41 = vmul.f32 %v5301_v15, %v851_v62  ;;  %v1017_v42 = vrot.slane %v896_v11, 2 }
 0x13b   : > { %v6155_v7 = vadd.f32 %v6085_v0, %v2499_v19  ;;  %v741_v44 = vsel %vm678_vm0, %v739_v27, %v740_v26  ;;  %v1019_v46 = vrot.slane %v897_v33, 2  ;;  %v1157_v35 = vunpack.c.l.bf16 %v4101_v12 }
 0x13c   : > { %v6160_v50 = vadd.f32 %v6085_v0, %v2500_v3  ;;  %v743_v32 = vsel %vm678_vm0, %v740_v26, %v742_v39  ;;  %v815_v51 = vadd.f32 %v741_v44, %v506_v40  ;;  %v1016_v52 = vrot.slane %v895_v41, 2  ;;  %v4185_v40 = vld [vmem:[%s5295_s16 + $0xb0] sm:$0x1] }
 0x13d   : > { %v4230_v53 = vmul.f32 -1.442695, %v6155_v7  ;;  %v816_v54 = vadd.f32 %v743_v32, %v507_v2  ;;  %v1020_v10 = vsel %vm955_vm1, %v1017_v42, %v1019_v46  ;;  %v1158_v55 = vunpack.c.h.bf16 %v4101_v12 }
 0x13e   : > { %v4792_v56 = vpop.eup %4791  ;;  %v4231_v5 = vmul.f32 -1.442695, %v6160_v50  ;;  %v1018_v57 = vsel %vm955_vm1, %v1016_v52, %v1017_v42  ;;  %v1193_v24 = vmul.f32 %v5303_v16, %v1157_v35  ;;  %v1261_v58 = vunpack.c.l.bf16 %v4121_v47  ;;  %v4201_v42 = vld [vmem:[%s5295_s16 + $0xa8] sm:$0xe] }
 0x13f   : > { %v4794_v17 = vpop.eup %4793  ;;  %v2760_v59 = vmul.f32 %v4792_v56, %v6088_v63  ;;  %4795 = vpow2.f32 %v4230_v53  ;;  %v1092_v34 = vadd.f32 %v1018_v57, %v815_v51  ;;  %v1093_v29 = vadd.f32 %v1020_v10, %v816_v54 }
 0x140   : > { %v2761_v60 = vmul.f32 %v4794_v17, %v6091_v6  ;;  %4797 = vpow2.f32 %v4231_v5  ;;  %v1194_v28 = vmul.f32 %v5303_v16, %v1158_v55  ;;  %v1305_v61 = vmul.f32 %v5308_v20, %v1157_v35 }
 0x141   : > { %v1225_v25 = vadd.f32 %v1193_v24, %v1092_v34  ;;  %v1306_v1 = vmul.f32 %v5308_v20, %v1158_v55  ;;  %v1307_v30 = vmul.f32 %v5308_v20, %v1261_v58  ;;  %v1537_v38 = vunpack.c.l.bf16 %v4137_v18  ;;  %v6177_v2 = vpop.f32.mrb[0].mxu0 }
 0x142   : > { %v2782_v63 = vpack.c.bf16 %v2761_v60, %v2760_v59  ;;  %v1226_v37 = vadd.f32 %v1194_v28, %v1093_v29  ;;  %v1425_v31 = vrot.slane %v1305_v61, 1  ;;  %v1582_v6 = vmul.f32 %v5310_v21, %v1158_v55  ;;  %v6180_v48 = vpop.f32.mrb[1].mxu0  ;;  %v440_v28 = vld [vmem:[%s5295_s16 + $0x9c] sm:$0xff]  }
 0x143   : > { %v1426_v43 = vrot.slane %v1306_v1, 1  ;;  %v1428_v45 = vrot.slane %v1307_v30, 1  ;;  %v1581_v4 = vmul.f32 %v5310_v21, %v1537_v38  ;;  %v1583_v9 = vmul.f32 %v5310_v21, %v1261_v58  ;;  %v6184_v62 = vpop.f32.mrb[2].mxu0  ;;  %v559_v38 = vld [vmem:[%s5295_s16 + $0xa4] sm:$0x1] }
 0x144   : > { %4547 = vmatprep.mubr.msk.bf16.mxu0 %vm2804_vm2, %v2782_v63  ;;  %v1702_v11 = vrot.slane %v1582_v6, 2  ;;  %v6187_v12 = vunpack.c.l.bf16 %v4466_v36  ;;  %v6189_v19 = vunpack.c.h.bf16 %v4466_v36  ;;  %v1946_v27 = vunpack.c.l.bf16 %v4185_v40  ;;  %v6191_v26 = vpop.f32.mrb[3].mxu0  ;;  %v836_v36 = vld [vmem:[%s5295_s16 + $0x9c] sm:$0xe] }
 0x145   : > { %v1427_v33 = vsel %vm678_vm0, %v1425_v31, %v1426_v43  ;;  %v1429_v3 = vsel %vm678_vm0, %v1426_v43, %v1428_v45  ;;  %v1701_v39 = vrot.slane %v1581_v4, 2  ;;  %v1704_v41 = vrot.slane %v1583_v9, 2 }
 0x146   : > { %v1501_v44 = vadd.f32 %v1427_v33, %v1225_v25  ;;  %v1502_v46 = vadd.f32 %v1429_v3, %v1226_v37  ;;  %v1878_v35 = vmul.f32 %v6187_v12, %v5312_v22  ;;  %v1879_v47 = vmul.f32 %v6189_v19, %v5312_v22 }
 0x147   : > { %v1703_v32 = vsel %vm955_vm1, %v1701_v39, %v1702_v11  ;;  %v1705_v51 = vsel %vm955_vm1, %v1702_v11, %v1704_v41  ;;  %v1990_v52 = vmul.f32 %v6187_v12, %v5314_v23  ;;  %v1991_v53 = vmul.f32 %v6189_v19, %v5314_v23  ;;  %v4703_v41 = vld [vmem:[%s6848_s7] sm:$0xff]  }
 0x148   : > { %v1777_v54 = vadd.f32 %v1703_v32, %v1501_v44  ;;  %v1778_v10 = vadd.f32 %v1705_v51, %v1502_v46  ;;  %v1992_v55 = vmul.f32 %v5314_v23, %v1946_v27  ;;  %v2222_v56 = vunpack.c.l.bf16 %v4201_v42  ;;  %4559 = vmatprep.subr.bf16.mxu1 %v4703_v41 }
 0x149   : > { %v4796_v5 = vpop.eup %4795  ;;  %v2110_v57 = vrot.slane %v1990_v52, 1  ;;  %v2111_v24 = vrot.slane %v1991_v53, 1  ;;  %v2267_v58 = vmul.f32 %v6054_v49, %v6189_v19  ;;  %v2268_v18 = vmul.f32 %v6054_v49, %v1946_v27  ;;  %4560 = vmatpush3.bf16.msra.mxu1 %v4703_v41 }
 0x14a   : > { %v4798_v17 = vpop.eup %4797  ;;  %v2666_v59 = vadd.f32 1.0, %v4796_v5  ;;  %v1910_v34 = vadd.f32 %v1878_v35, %v1777_v54  ;;  %v1911_v29 = vadd.f32 %v1879_v47, %v1778_v10  ;;  %v2113_v60 = vrot.slane %v1992_v55, 1 }
 0x14b   : > { %v2667_v61 = vadd.f32 1.0, %v4798_v17  ;;  %v2112_v25 = vsel %vm678_vm0, %v2110_v57, %v2111_v24  ;;  %v2266_v1 = vmul.f32 %v6054_v49, %v2222_v56  ;;  %v2387_v30 = vrot.slane %v2267_v58, 2  ;;  %v4122_v58 = vld [vmem:[%s5295_s16 + $0xb0] sm:$0x1] }
 0x14c   : > { %4799 = vrcp.f32 %v2666_v59  ;;  %v2114_v40 = vsel %vm678_vm0, %v2111_v24, %v2113_v60  ;;  %v2186_v63 = vadd.f32 %v2112_v25, %v1910_v34  ;;  %v2389_v37 = vrot.slane %v2268_v18, 2 }
 0x14d   : > { %4801 = vrcp.f32 %v2667_v61  ;;  %v2187_v31 = vadd.f32 %v2114_v40, %v1911_v29  ;;  %v2386_v6 = vrot.slane %v2266_v1, 2  ;;  %v472_v43 = vunpack.c.l.bf16 %v440_v28  ;;  %v4138_v40 = vld [vmem:[%s5295_s16 + $0xa8] sm:$0xe] }
 0x14e   : > { %v2390_v45 = vsel %vm955_vm1, %v2387_v30, %v2389_v37  ;;  %v473_v4 = vunpack.c.h.bf16 %v440_v28  ;;  %v575_v9 = vunpack.c.l.bf16 %v559_v38  ;;  %v852_v11 = vunpack.c.l.bf16 %v836_v36 }
 0x14f   : > { %v2388_v27 = vsel %vm955_vm1, %v2386_v6, %v2387_v30  ;;  %v2463_v33 = vadd.f32 %v2390_v45, %v2187_v31  ;;  %v508_v3 = vmul.f32 %v5297_v13, %v472_v43  ;;  %v621_v39 = vmul.f32 %v5299_v14, %v472_v43 }
 0x150   : > { %v2462_v42 = vadd.f32 %v2388_v27, %v2186_v63  ;;  %v509_v44 = vmul.f32 %v5297_v13, %v473_v4  ;;  %v622_v46 = vmul.f32 %v5299_v14, %v473_v4  ;;  %v623_v35 = vmul.f32 %v5299_v14, %v575_v9 }
 0x151   : > { %v2502_v47 = vmul.f32 %v6073_v8, %v2463_v33  ;;  %v744_v32 = vrot.slane %v621_v39, 1  ;;  %v898_v51 = vmul.f32 %v5301_v15, %v852_v11  ;;  %v899_v52 = vmul.f32 %v5301_v15, %v473_v4  ;;  %v4186_v39 = vld [vmem:[%s5295_s16 + $0xbc] sm:$0x1] }
 0x152   : > { %v2501_v53 = vmul.f32 %v6073_v8, %v2462_v42  ;;  %v745_v54 = vrot.slane %v622_v46, 1  ;;  %v747_v10 = vrot.slane %v623_v35, 1  ;;  %v900_v55 = vmul.f32 %v5301_v15, %v575_v9  ;;  %v4167_v9 = vld [vmem:[%s5295_s16 + $0xb4] sm:$0xff]  }
 0x153   : > { %v6232_v56 = vadd.f32 %v6085_v0, %v2502_v47  ;;  %v1021_v5 = vrot.slane %v898_v51, 2  ;;  %v1022_v57 = vrot.slane %v899_v52, 2  ;;  %v1195_v24 = vmul.f32 %v6187_v12, %v5303_v16 }
 0x154   : > { %v6238_v18 = vadd.f32 %v6085_v0, %v2501_v53  ;;  %v746_v17 = vsel %vm678_vm0, %v744_v32, %v745_v54  ;;  %v748_v59 = vsel %vm678_vm0, %v745_v54, %v747_v10  ;;  %v1024_v34 = vrot.slane %v900_v55, 2 }
 0x155   : > { %v4233_v29 = vmul.f32 -1.442695, %v6232_v56  ;;  %v817_v60 = vadd.f32 %v746_v17, %v508_v3  ;;  %v818_v28 = vadd.f32 %v748_v59, %v509_v44  ;;  %v1023_v61 = vsel %vm955_vm1, %v1021_v5, %v1022_v57 }
 0x156   : > { %v4800_v25 = vpop.eup %4799  ;;  %v4232_v1 = vmul.f32 -1.442695, %v6238_v18  ;;  %v1025_v30 = vsel %vm955_vm1, %v1022_v57, %v1024_v34  ;;  %v1196_v38 = vmul.f32 %v6189_v19, %v5303_v16  ;;  %v1262_v36 = vunpack.c.l.bf16 %v4122_v58  ;;  %v4202_v57 = vld [vmem:[%s5295_s16 + $0xb4] sm:$0xe] }
 0x157   : > { %v4802_v63 = vpop.eup %4801  ;;  %v2762_v37 = vmul.f32 %v4800_v25, %v6155_v7  ;;  %4803 = vpow2.f32 %v4233_v29  ;;  %v1094_v31 = vadd.f32 %v1023_v61, %v817_v60  ;;  %v1095_v6 = vadd.f32 %v1025_v30, %v818_v28 }
 0x158   : > { %v2763_v43 = vmul.f32 %v4802_v63, %v6160_v50  ;;  %4805 = vpow2.f32 %v4232_v1  ;;  %v1308_v45 = vmul.f32 %v6187_v12, %v5308_v20  ;;  %v1309_v4 = vmul.f32 %v6189_v19, %v5308_v20 }
 0x159   : > { %v1227_v11 = vadd.f32 %v1195_v24, %v1094_v31  ;;  %v1228_v27 = vadd.f32 %v1196_v38, %v1095_v6  ;;  %v1310_v33 = vmul.f32 %v5308_v20, %v1262_v36  ;;  %v1538_v3 = vunpack.c.l.bf16 %v4138_v40 }
 0x15a   : > { %v2783_v7 = vpack.c.bf16 %v2763_v43, %v2762_v37  ;;  %v1430_v41 = vrot.slane %v1308_v45, 1  ;;  %v1431_v42 = vrot.slane %v1309_v4, 1  ;;  %v1585_v50 = vmul.f32 %v6189_v19, %v5310_v21 }
 0x15b   : > { %v1433_v44 = vrot.slane %v1310_v33, 1  ;;  %v1584_v46 = vmul.f32 %v5310_v21, %v1538_v3  ;;  %v1586_v35 = vmul.f32 %v5310_v21, %v1262_v36  ;;  %v1844_v47 = vunpack.c.l.bf16 %v4167_v9  ;;  %v560_v3 = vld [vmem:[%s5295_s16 + $0xb0] sm:$0x1] }
 0x15c   : > { %4548 = vmatmul.mubr.msk.bf16.gmra.mrb[20].mxu0 %vm2804_vm2, %v2783_v7  ;;  %v1432_v32 = vsel %vm678_vm0, %v1430_v41, %v1431_v42  ;;  %v1707_v51 = vrot.slane %v1585_v50, 2  ;;  %v1845_v52 = vunpack.c.h.bf16 %v4167_v9  ;;  %v1947_v53 = vunpack.c.l.bf16 %v4186_v39 }
 0x15d   : > { %v1434_v54 = vsel %vm678_vm0, %v1431_v42, %v1433_v44  ;;  %v1503_v10 = vadd.f32 %v1432_v32, %v1227_v11  ;;  %v1706_v55 = vrot.slane %v1584_v46, 2  ;;  %v1709_v5 = vrot.slane %v1586_v35, 2  ;;  %v837_v42 = vld [vmem:[%s5295_s16 + $0xa8] sm:$0xe] }
 0x15e   : > { %v1504_v24 = vadd.f32 %v1434_v54, %v1228_v27  ;;  %v1880_v58 = vmul.f32 %v5312_v22, %v1844_v47  ;;  %v1881_v17 = vmul.f32 %v5312_v22, %v1845_v52  ;;  %v1993_v59 = vmul.f32 %v5314_v23, %v1844_v47 }
 0x15f   : > { %v1708_v34 = vsel %vm955_vm1, %v1706_v55, %v1707_v51  ;;  %v1710_v29 = vsel %vm955_vm1, %v1707_v51, %v1709_v5  ;;  %v1994_v60 = vmul.f32 %v5314_v23, %v1845_v52  ;;  %v1995_v28 = vmul.f32 %v5314_v23, %v1947_v53  ;;  %v4105_v55 = vld [vmem:[%s5295_s16 + $0xb4] sm:$0xff]  }
 0x160   : > { %v1779_v61 = vadd.f32 %v1708_v34, %v1503_v10  ;;  %v1780_v25 = vadd.f32 %v1710_v29, %v1504_v24  ;;  %v2115_v1 = vrot.slane %v1993_v59, 1  ;;  %v2223_v30 = vunpack.c.l.bf16 %v4202_v57 }
 0x161   : > { %v4804_v38 = vpop.eup %4803  ;;  %v2116_v36 = vrot.slane %v1994_v60, 1  ;;  %v2118_v40 = vrot.slane %v1995_v28, 1  ;;  %v2270_v63 = vmul.f32 %v6054_v49, %v1845_v52  ;;  %v2271_v37 = vmul.f32 %v6054_v49, %v1947_v53 }
 0x162   : > { %v4806_v31 = vpop.eup %4805  ;;  %v2669_v6 = vadd.f32 1.0, %v4804_v38  ;;  %v1912_v43 = vadd.f32 %v1880_v58, %v1779_v61  ;;  %v1913_v45 = vadd.f32 %v1881_v17, %v1780_v25  ;;  %v2269_v4 = vmul.f32 %v6054_v49, %v2223_v30  ;;  %v4123_v38 = vld [vmem:[%s5295_s16 + $0xbc] sm:$0x1] }
 0x163   : > { %v2668_v9 = vadd.f32 1.0, %v4806_v31  ;;  %v2117_v11 = vsel %vm678_vm0, %v2115_v1, %v2116_v36  ;;  %v2119_v27 = vsel %vm678_vm0, %v2116_v36, %v2118_v40  ;;  %v2392_v33 = vrot.slane %v2270_v63, 2 }
 0x164   : > { %4807 = vrcp.f32 %v2669_v6  ;;  %v2188_v39 = vadd.f32 %v2117_v11, %v1912_v43  ;;  %v2189_v7 = vadd.f32 %v2119_v27, %v1913_v45  ;;  %v2391_v41 = vrot.slane %v2269_v4, 2 }
 0x165   : > { %4809 = vrcp.f32 %v2668_v9  ;;  %v2394_v50 = vrot.slane %v2271_v37, 2  ;;  %v510_v44 = vmul.f32 %v6187_v12, %v5297_v13  ;;  %v511_v46 = vmul.f32 %v6189_v19, %v5297_v13 }
 0x166   : > { %v2393_v35 = vsel %vm955_vm1, %v2391_v41, %v2392_v33  ;;  %v576_v47 = vunpack.c.l.bf16 %v560_v3  ;;  %v624_v32 = vmul.f32 %v6187_v12, %v5299_v14  ;;  %v625_v51 = vmul.f32 %v6189_v19, %v5299_v14  ;;  %v4139_v3 = vld [vmem:[%s5295_s16 + $0xb4] sm:$0xe] }
 0x167   : > { %v2395_v52 = vsel %vm955_vm1, %v2392_v33, %v2394_v50  ;;  %v2464_v53 = vadd.f32 %v2393_v35, %v2188_v39  ;;  %v853_v54 = vunpack.c.l.bf16 %v837_v42  ;;  %v902_v10 = vmul.f32 %v6189_v19, %v5301_v15  ;;  %v4467_v35 = vld [vmem:[%s5295_s16 + $0xc0] sm:$0xff]  }
 0x168   : > { %v2465_v5 = vadd.f32 %v2395_v52, %v2189_v7  ;;  %v626_v57 = vmul.f32 %v5299_v14, %v576_v47  ;;  %v749_v24 = vrot.slane %v624_v32, 1  ;;  %v750_v58 = vrot.slane %v625_v51, 1 }
 0x169   : > { %v2503_v17 = vmul.f32 %v6073_v8, %v2464_v53  ;;  %v901_v12 = vmul.f32 %v5301_v15, %v853_v54  ;;  %v903_v59 = vmul.f32 %v5301_v15, %v576_v47  ;;  %v1027_v34 = vrot.slane %v902_v10, 2  ;;  %v4187_v53 = vld [vmem:[%s5295_s16 + $0xc8] sm:$0x1] }
 0x16a   : > { %v2504_v29 = vmul.f32 %v6073_v8, %v2465_v5  ;;  %v751_v60 = vsel %vm678_vm0, %v749_v24, %v750_v58  ;;  %v752_v28 = vrot.slane %v626_v57, 1  ;;  %v1161_v19 = vunpack.c.l.bf16 %v4105_v55 }
 0x16b   : > { %v6300_v61 = vadd.f32 %v6085_v0, %v2503_v17  ;;  %v819_v25 = vadd.f32 %v751_v60, %v510_v44  ;;  %v1026_v1 = vrot.slane %v901_v12, 2  ;;  %v1029_v30 = vrot.slane %v903_v59, 2  ;;  %v4203_v17 = vld [vmem:[%s5295_s16 + $0xc0] sm:$0xe] }
 0x16c   : > { %v6304_v36 = vadd.f32 %v6085_v0, %v2504_v29  ;;  %v753_v40 = vsel %vm678_vm0, %v750_v58, %v752_v28  ;;  %v1162_v63 = vunpack.c.h.bf16 %v4105_v55  ;;  %v1197_v37 = vmul.f32 %v5303_v16, %v1161_v19 }
 0x16d   : > { %v4234_v31 = vmul.f32 -1.442695, %v6300_v61  ;;  %v820_v6 = vadd.f32 %v753_v40, %v511_v46  ;;  %v1028_v43 = vsel %vm955_vm1, %v1026_v1, %v1027_v34  ;;  %v1030_v45 = vsel %vm955_vm1, %v1027_v34, %v1029_v30 }
 0x16e   : > { %v4808_v4 = vpop.eup %4807  ;;  %v4235_v9 = vmul.f32 -1.442695, %v6304_v36  ;;  %v1096_v11 = vadd.f32 %v1028_v43, %v819_v25  ;;  %v1198_v27 = vmul.f32 %v5303_v16, %v1162_v63  ;;  %v1263_v33 = vunpack.c.l.bf16 %v4123_v38  ;;  %v4705_v25 = vld [vmem:[%s6848_s7 + $0x10] sm:$0xff]  }
 0x16f   : > { %v4810_v39 = vpop.eup %4809  ;;  %v2765_v7 = vmul.f32 %v4808_v4, %v6232_v56  ;;  %4811 = vpow2.f32 %v4234_v31  ;;  %v1097_v41 = vadd.f32 %v1030_v45, %v820_v6  ;;  %v1311_v42 = vmul.f32 %v5308_v20, %v1161_v19  ;;  %v4704_v19 = vld [vmem:[%s6848_s7 + $0x8] sm:$0xff]  }
 0x170   : > { %v2764_v50 = vmul.f32 %v4810_v39, %v6238_v18  ;;  %4813 = vpow2.f32 %v4235_v9  ;;  %v1229_v44 = vadd.f32 %v1197_v37, %v1096_v11  ;;  %v1312_v46 = vmul.f32 %v5308_v20, %v1162_v63  ;;  %4561 = vmatprep.subr.bf16.mxu1 %v4704_v19 }
 0x171   : > { %v1230_v47 = vadd.f32 %v1198_v27, %v1097_v41  ;;  %v1313_v32 = vmul.f32 %v5308_v20, %v1263_v33  ;;  %v1435_v51 = vrot.slane %v1311_v42, 1  ;;  %v1539_v52 = vunpack.c.l.bf16 %v4139_v3  ;;  %4562 = vmatpush3.bf16.msra.mxu1 %v4704_v19 }
 0x172   : > { %v2784_v54 = vpack.c.bf16 %v2765_v7, %v2764_v50  ;;  %v1436_v56 = vrot.slane %v1312_v46, 1  ;;  %v1588_v10 = vmul.f32 %v5310_v21, %v1162_v63  ;;  %v1589_v55 = vmul.f32 %v5310_v21, %v1263_v33  ;;  %v6323_v5 = vpop.f32.mrb[4].mxu0  ;;  %4563 = vmatprep.subr.bf16.mxu1 %v4705_v25 }
 0x173   : > { %v1438_v18 = vrot.slane %v1313_v32, 1  ;;  %v1587_v57 = vmul.f32 %v5310_v21, %v1539_v52  ;;  %v6326_v24 = vunpack.c.l.bf16 %v4467_v35  ;;  %v6328_v58 = vunpack.c.h.bf16 %v4467_v35  ;;  %v6331_v12 = vpop.f32.mrb[5].mxu0  ;;  %v444_v52 = vld [vmem:[%s5295_s16 + $0xb4] sm:$0xff]  }
 0x174   : > { %4551 = vmatprep.mubr.msk.bf16.mxu0 %vm2804_vm2, %v2784_v54  ;;  %v1437_v59 = vsel %vm678_vm0, %v1435_v51, %v1436_v56  ;;  %v1712_v34 = vrot.slane %v1588_v10, 2  ;;  %v1714_v29 = vrot.slane %v1589_v55, 2  ;;  %v1948_v60 = vunpack.c.l.bf16 %v4187_v53  ;;  %v6335_v28 = vpop.f32.mrb[6].mxu0  ;;  %v561_v55 = vld [vmem:[%s5295_s16 + $0xbc] sm:$0x1] }
 0x175   : > { %v1439_v1 = vsel %vm678_vm0, %v1436_v56, %v1438_v18  ;;  %v1505_v30 = vadd.f32 %v1437_v59, %v1229_v44  ;;  %v1711_v38 = vrot.slane %v1587_v57, 2  ;;  %v1882_v40 = vmul.f32 %v6326_v24, %v5312_v22  ;;  %v6346_v63 = vpop.f32.mrb[7].mxu0  ;;  %v838_v18 = vld [vmem:[%s5295_s16 + $0xb4] sm:$0xe]  ;;  %4564 = vmatpush3.bf16.msra.mxu1 %v4705_v25 }
 0x176   : > { %v1506_v37 = vadd.f32 %v1439_v1, %v1230_v47  ;;  %v1715_v31 = vsel %vm955_vm1, %v1712_v34, %v1714_v29  ;;  %v1883_v6 = vmul.f32 %v6328_v58, %v5312_v22  ;;  %v1996_v43 = vmul.f32 %v6326_v24, %v5314_v23 }
 0x177   : > { %v1713_v45 = vsel %vm955_vm1, %v1711_v38, %v1712_v34  ;;  %v1997_v4 = vmul.f32 %v6328_v58, %v5314_v23  ;;  %v1998_v9 = vmul.f32 %v5314_v23, %v1948_v60  ;;  %v2224_v11 = vunpack.c.l.bf16 %v4203_v17 }
 0x178   : > { %v1781_v27 = vadd.f32 %v1713_v45, %v1505_v30  ;;  %v1782_v33 = vadd.f32 %v1715_v31, %v1506_v37  ;;  %v2120_v3 = vrot.slane %v1996_v43, 1  ;;  %v2273_v39 = vmul.f32 %v6054_v49, %v6328_v58 }
 0x179   : > { %v4812_v7 = vpop.eup %4811  ;;  %v2121_v41 = vrot.slane %v1997_v4, 1  ;;  %v2123_v42 = vrot.slane %v1998_v9, 1  ;;  %v2272_v50 = vmul.f32 %v6054_v49, %v2224_v11  ;;  %v2274_v44 = vmul.f32 %v6054_v49, %v1948_v60 }
 0x17a   : > { %v4814_v46 = vpop.eup %4813  ;;  %v2670_v35 = vadd.f32 1.0, %v4812_v7  ;;  %v1914_v47 = vadd.f32 %v1882_v40, %v1781_v27  ;;  %v1915_v32 = vadd.f32 %v1883_v6, %v1782_v33  ;;  %v2397_v51 = vrot.slane %v2273_v39, 2 }
 0x17b   : > { %v2671_v53 = vadd.f32 1.0, %v4814_v46  ;;  %v2122_v54 = vsel %vm678_vm0, %v2120_v3, %v2121_v41  ;;  %v2124_v56 = vsel %vm678_vm0, %v2121_v41, %v2123_v42  ;;  %v2396_v10 = vrot.slane %v2272_v50, 2  ;;  %v4124_v42 = vld [vmem:[%s5295_s16 + $0xc8] sm:$0x1] }
 0x17c   : > { %4815 = vrcp.f32 %v2670_v35  ;;  %v2190_v57 = vadd.f32 %v2122_v54, %v1914_v47  ;;  %v2191_v17 = vadd.f32 %v2124_v56, %v1915_v32  ;;  %v2399_v59 = vrot.slane %v2274_v44, 2  ;;  %v4140_v56 = vld [vmem:[%s5295_s16 + $0xc0] sm:$0xe] }
 0x17d   : > { %4817 = vrcp.f32 %v2671_v53  ;;  %v2398_v49 = vsel %vm955_vm1, %v2396_v10, %v2397_v51  ;;  %v476_v34 = vunpack.c.l.bf16 %v444_v52  ;;  %v477_v29 = vunpack.c.h.bf16 %v444_v52 }
 0x17e   : > { %v2400_v60 = vsel %vm955_vm1, %v2397_v51, %v2399_v59  ;;  %v2466_v19 = vadd.f32 %v2398_v49, %v2190_v57  ;;  %v577_v1 = vunpack.c.l.bf16 %v561_v55  ;;  %v854_v30 = vunpack.c.l.bf16 %v838_v18 }
 0x17f   : > { %v2467_v38 = vadd.f32 %v2400_v60, %v2191_v17  ;;  %v512_v40 = vmul.f32 %v5297_v13, %v476_v34  ;;  %v513_v37 = vmul.f32 %v5297_v13, %v477_v29  ;;  %v627_v25 = vmul.f32 %v5299_v14, %v476_v34  ;;  %v4171_v34 = vld [vmem:[%s5295_s16 + $0xcc] sm:$0xff]  }
 0x180   : > { %v2505_v31 = vmul.f32 %v6073_v8, %v2466_v19  ;;  %v628_v6 = vmul.f32 %v5299_v14, %v477_v29  ;;  %v629_v43 = vmul.f32 %v5299_v14, %v577_v1  ;;  %v904_v45 = vmul.f32 %v5301_v15, %v854_v30 }
 0x181   : > { %v2506_v4 = vmul.f32 %v6073_v8, %v2467_v38  ;;  %v754_v9 = vrot.slane %v627_v25, 1  ;;  %v905_v11 = vmul.f32 %v5301_v15, %v477_v29  ;;  %v906_v27 = vmul.f32 %v5301_v15, %v577_v1 }
 0x182   : > { %v6379_v13 = vadd.f32 %v6085_v0, %v2505_v31  ;;  %v755_v33 = vrot.slane %v628_v6, 1  ;;  %v757_v3 = vrot.slane %v629_v43, 1  ;;  %v1031_v39 = vrot.slane %v904_v45, 2 }
 0x183   : > { %v6382_v7 = vadd.f32 %v6085_v0, %v2506_v4  ;;  %v1032_v41 = vrot.slane %v905_v11, 2  ;;  %v1034_v14 = vrot.slane %v906_v27, 2  ;;  %v1199_v8 = vmul.f32 %v6326_v24, %v5303_v16 }
 0x184   : > { %v4236_v50 = vmul.f32 -1.442695, %v6379_v13  ;;  %v756_v15 = vsel %vm678_vm0, %v754_v9, %v755_v33  ;;  %v758_v44 = vsel %vm678_vm0, %v755_v33, %v757_v3  ;;  %v1200_v46 = vmul.f32 %v6328_v58, %v5303_v16 }
 0x185   : > { %v4237_v35 = vmul.f32 -1.442695, %v6382_v7  ;;  %v821_v0 = vadd.f32 %v756_v15, %v512_v40  ;;  %v822_v47 = vadd.f32 %v758_v44, %v513_v37  ;;  %v1033_v32 = vsel %vm955_vm1, %v1031_v39, %v1032_v41 }
 0x186   : > { %v4816_v51 = vpop.eup %4815  ;;  %4819 = vpow2.f32 %v4236_v50  ;;  %v1035_v52 = vsel %vm955_vm1, %v1032_v41, %v1034_v14  ;;  %v1264_v53 = vunpack.c.l.bf16 %v4124_v42  ;;  %v1314_v54 = vmul.f32 %v6326_v24, %v5308_v20 }
 0x187   : > { %v4818_v10 = vpop.eup %4817  ;;  %v2766_v16 = vmul.f32 %v4816_v51, %v6300_v61  ;;  %4821 = vpow2.f32 %v4237_v35  ;;  %v1098_v55 = vadd.f32 %v1033_v32, %v821_v0  ;;  %v1099_v18 = vadd.f32 %v1035_v52, %v822_v47  ;;  %v4188_v61 = vld [vmem:[%s5295_s16 + $0xd4] sm:$0x1]  ;;  %v5097_v35 = vld [vmem:[%s6858_s1 + $0x8] ss:$0 sm:$0xff]  ;;  %s5106_s1 = scalar_lea.vmem %s5105_s0, 32 }
 0x188   : > { %v2767_v57 = vmul.f32 %v4818_v10, %v6304_v36  ;;  %v1315_v17 = vmul.f32 %v6328_v58, %v5308_v20  ;;  %v1316_v59 = vmul.f32 %v5308_v20, %v1264_v53  ;;  %v1440_v49 = vrot.slane %v1314_v54, 1  ;;  %v6427_v10 = vld [vmem:[%s6846_s5] ss:$0 sm:$0xff]  ;;  %p5108_p1 = scmp.lt.s32.totalorder %s5106_s1, %s5100_s26 }
 0x189   : > { %v1231_v29 = vadd.f32 %v1199_v8, %v1098_v55  ;;  %v1232_v60 = vadd.f32 %v1200_v46, %v1099_v18  ;;  %v1540_v24 = vunpack.c.l.bf16 %v4140_v56  ;;  %v1591_v19 = vmul.f32 %v6328_v58, %v5310_v21  ;;  %v4204_v58 = vld [vmem:[%s5295_s16 + $0xcc] sm:$0xe] }
 0x18a   : > { %v2785_v1 = vpack.c.bf16 %v2767_v57, %v2766_v16  ;;  %v1441_v30 = vrot.slane %v1315_v17, 1  ;;  %v1443_v38 = vrot.slane %v1316_v59, 1  ;;  %v1592_v36 = vmul.f32 %v5310_v21, %v1264_v53  ;;  %p5109_p2 = por %p5108_p1, %p5107_p0 }
 0x18b   : > { %v1590_v40 = vmul.f32 %v5310_v21, %v1540_v24  ;;  %v1717_v37 = vrot.slane %v1591_v19, 2  ;;  %v1848_v25 = vunpack.c.l.bf16 %v4171_v34  ;;  %v1849_v20 = vunpack.c.h.bf16 %v4171_v34 }
 0x18c   : > { %4552 = vmatmul.mubr.msk.bf16.gmra.mrb[24].mxu0 %vm2804_vm2, %v2785_v1  ;;  %v1442_v31 = vsel %vm678_vm0, %v1440_v49, %v1441_v30  ;;  %v1444_v6 = vsel %vm678_vm0, %v1441_v30, %v1443_v38  ;;  %v1719_v43 = vrot.slane %v1592_v36, 2  ;;  %v1949_v45 = vunpack.c.l.bf16 %v4188_v61  ;;  %v6433_v49 = vld [vmem:[%s6847_s6] ss:$0 sm:$0xff]  ;;  %p5110_p3 = pnand %p5109_p2, %p5103_p13 }
 0x18d   : > { %v1507_v4 = vadd.f32 %v1442_v31, %v1231_v29  ;;  %v1508_v9 = vadd.f32 %v1444_v6, %v1232_v60  ;;  %v1716_v11 = vrot.slane %v1590_v40, 2  ;;  %v1884_v27 = vmul.f32 %v5312_v22, %v1848_v25 }
 0x18e   : > { %v1720_v33 = vsel %vm955_vm1, %v1717_v37, %v1719_v43  ;;  %v1885_v21 = vmul.f32 %v5312_v22, %v1849_v20  ;;  %v1999_v3 = vmul.f32 %v5314_v23, %v1848_v25  ;;  %v2000_v39 = vmul.f32 %v5314_v23, %v1849_v20  ;;  %v5099_v43 = vld [vmem:[%s6844_s3] ss:$0 sm:$0xff] }
 0x18f   : > { %v1718_v41 = vsel %vm955_vm1, %v1716_v11, %v1717_v37  ;;  %v1784_v14 = vadd.f32 %v1720_v33, %v1508_v9  ;;  %v2001_v8 = vmul.f32 %v5314_v23, %v1949_v45  ;;  %v2225_v42 = vunpack.c.l.bf16 %v4204_v58 }
 0x190   : > { %v4820_v50 = vpop.eup %4819  ;;  %v1783_v15 = vadd.f32 %v1718_v41, %v1507_v4  ;;  %v2125_v44 = vrot.slane %v1999_v3, 1  ;;  %v2126_v46 = vrot.slane %v2000_v39, 1  ;;  %v2276_v0 = vmul.f32 %v5097_v35, %v1849_v20 }
 0x191   : > { %v4822_v22 = vpop.eup %4821  ;;  %v2672_v47 = vadd.f32 1.0, %v4820_v50  ;;  %v1917_v32 = vadd.f32 %v1885_v21, %v1784_v14  ;;  %v2128_v51 = vrot.slane %v2001_v8, 1  ;;  %v2275_v52 = vmul.f32 %v5097_v35, %v2225_v42 }
 0x192   : > { %v2673_v53 = vadd.f32 1.0, %v4822_v22  ;;  %v1916_v54 = vadd.f32 %v1884_v27, %v1783_v15  ;;  %v2127_v56 = vsel %vm678_vm0, %v2125_v44, %v2126_v46  ;;  %v2277_v23 = vmul.f32 %v5097_v35, %v1949_v45 }
 0x193   : > { %4823 = vrcp.f32 %v2672_v47  ;;  %v2129_v16 = vsel %vm678_vm0, %v2126_v46, %v2128_v51  ;;  %v2401_v55 = vrot.slane %v2275_v52, 2  ;;  %v2402_v18 = vrot.slane %v2276_v0, 2 }
 0x194   : > { %4825 = vrcp.f32 %v2673_v53  ;;  %v2192_v57 = vadd.f32 %v2127_v56, %v1916_v54  ;;  %v2193_v17 = vadd.f32 %v2129_v16, %v1917_v32  ;;  %v2404_v59 = vrot.slane %v2277_v23, 2 }
 0x195   : > { %v2403_v34 = vsel %vm955_vm1, %v2401_v55, %v2402_v18  ;;  %v3023_v29 = vmul.f32 %v6177_v2, %v6427_v10  ;;  %v3021_v60 = vmul.f32 %v6427_v10, %v6180_v48  ;;  %v3024_v24 = vmul.f32 %v6184_v62, %v6427_v10  ;;  %v5098_v62 = vld [vmem:[%s6843_s2] ss:$0 sm:$0xff] }
 0x196   : > { %v2405_v19 = vsel %vm955_vm1, %v2402_v18, %v2404_v59  ;;  %v2468_v61 = vadd.f32 %v2403_v34, %v2192_v57  ;;  %v3022_v1 = vmul.f32 %v6427_v10, %v6191_v26  ;;  %v3027_v30 = vmul.f32 %v6323_v5, %v6427_v10 }
 0x197   : > { %v2469_v38 = vadd.f32 %v2405_v19, %v2193_v17  ;;  %v6448_v36 = vadd.f32 %v6433_v49, %v3023_v29  ;;  %v6451_v2 = vadd.f32 %v6433_v49, %v3021_v60  ;;  %v6454_v48 = vadd.f32 %v6433_v49, %v3024_v24 }
 0x198   : > { %v2507_v40 = vmul.f32 %v5098_v62, %v2468_v61  ;;  %v6460_v26 = vadd.f32 %v6433_v49, %v3022_v1  ;;  %v6463_v5 = vadd.f32 %v6433_v49, %v3027_v30  ;;  %v3025_v37 = vmul.f32 %v6427_v10, %v6331_v12 }
 0x199   : > { %v2508_v25 = vmul.f32 %v5098_v62, %v2469_v38  ;;  %v4262_v20 = vmul.f32 -1.442695, %v6448_v36  ;;  %v4260_v31 = vmul.f32 -1.442695, %v6451_v2  ;;  %v4263_v6 = vmul.f32 -1.442695, %v6454_v48 }
 0x19a   : > { %v6473_v45 = vadd.f32 %v5099_v43, %v2507_v40  ;;  %v6476_v58 = vadd.f32 %v6433_v49, %v3025_v37  ;;  %v3028_v12 = vmul.f32 %v6335_v28, %v6427_v10  ;;  %v3026_v9 = vmul.f32 %v6427_v10, %v6346_v63 }
 0x19b   : > { %v6478_v4 = vadd.f32 %v5099_v43, %v2508_v25  ;;  %4827 = vpow2.f32 %v4262_v20  ;;  %v4261_v27 = vmul.f32 -1.442695, %v6460_v26  ;;  %v4266_v33 = vmul.f32 -1.442695, %v6463_v5 }
 0x19c   : > { %v4238_v11 = vmul.f32 -1.442695, %v6473_v45  ;;  %4829 = vpow2.f32 %v4260_v31  ;;  %v6489_v39 = vadd.f32 %v6433_v49, %v3028_v12  ;;  %v6492_v41 = vadd.f32 %v6433_v49, %v3026_v9 }
 0x19d   : > { %v4824_v21 = vpop.eup %4823  ;;  %v4239_v3 = vmul.f32 -1.442695, %v6478_v4  ;;  %4831 = vpow2.f32 %v4263_v6  ;;  %v4264_v14 = vmul.f32 -1.442695, %v6476_v58 }
 0x19e   : > { %v4826_v28 = vpop.eup %4825  ;;  %v2768_v63 = vmul.f32 %v4824_v21, %v6379_v13  ;;  %4833 = vpow2.f32 %v4238_v11  ;;  %v4267_v42 = vmul.f32 -1.442695, %v6489_v39  ;;  %v4265_v50 = vmul.f32 -1.442695, %v6492_v41 }
 0x19f   : > { %v2769_v8 = vmul.f32 %v4826_v28, %v6382_v7  ;;  %4835 = vpow2.f32 %v4239_v3  ;;  %v4706_v7 = vld [vmem:[%s6848_s7 + $0x18] sm:$0xff]  }
 0x1a0   : > { %4837 = vpow2.f32 %v4261_v27  ;;  %4565 = vmatprep.subr.bf16.mxu1 %v4706_v7 }
 0x1a1   : > { %v2786_v15 = vpack.c.bf16 %v2769_v8, %v2768_v63  ;;  %4839 = vpow2.f32 %v4266_v33  ;;  %v4537_v44 = vpop.f32.mrb[8].mxu0  ;;  %4566 = vmatpush3.bf16.msra.mxu1 %v4706_v7 }
 0x1a2   : > { %4841 = vpow2.f32 %v4264_v14  ;;  %v2919_v46 = vpop.f32.mrb[9].mxu0  ;;  %v3031_v32 = vmul.f32 %v4537_v44, %v6427_v10 }
 0x1a3   : > { %4555 = vmatprep.mubr.msk.bf16.mxu0 %vm2804_vm2, %v2786_v15  ;;  %4843 = vpow2.f32 %v4267_v42  ;;  %v4538_v13 = vpop.f32.mrb[10].mxu0  ;;  %v3029_v53 = vmul.f32 %v6427_v10, %v2919_v46 }
 0x1a4   : > { %4845 = vpow2.f32 %v4265_v50  ;;  %v2922_v35 = vpop.f32.mrb[11].mxu0  ;;  %v3032_v23 = vmul.f32 %v4538_v13, %v6427_v10  ;;  %v6508_v59 = vadd.f32 %v6433_v49, %v3031_v32 }
 0x1a5   : > { %v4828_v0 = vpop.eup %4827  ;;  %v3030_v18 = vmul.f32 %v6427_v10, %v2922_v35  ;;  %v6511_v60 = vadd.f32 %v6433_v49, %v3029_v53 }
 0x1a6   : > { %v4830_v22 = vpop.eup %4829  ;;  %v3190_v47 = vadd.f32 1.0, %v4828_v0  ;;  %v6514_v61 = vadd.f32 %v6433_v49, %v3032_v23  ;;  %v4270_v37 = vmul.f32 -1.442695, %v6508_v59 }
 0x1a7   : > { %v4832_v51 = vpop.eup %4831  ;;  %v3188_v52 = vadd.f32 1.0, %v4830_v22  ;;  %v6517_v38 = vadd.f32 %v6433_v49, %v3030_v18  ;;  %v4268_v20 = vmul.f32 -1.442695, %v6511_v60 }
 0x1a8   : > { %v4834_v54 = vpop.eup %4833  ;;  %4847 = vrcp.f32 %v3190_v47  ;;  %v3191_v56 = vadd.f32 1.0, %v4832_v51  ;;  %v4271_v31 = vmul.f32 -1.442695, %v6514_v61 }
 0x1a9   : > { %v4836_v16 = vpop.eup %4835  ;;  %v2674_v55 = vadd.f32 1.0, %v4834_v54  ;;  %4849 = vrcp.f32 %v3188_v52  ;;  %v4269_v6 = vmul.f32 -1.442695, %v6517_v38 }
 0x1aa   : > { %v4838_v57 = vpop.eup %4837  ;;  %v2675_v17 = vadd.f32 1.0, %v4836_v16  ;;  %4851 = vrcp.f32 %v3191_v56 }
 0x1ab   : > { %v4840_v34 = vpop.eup %4839  ;;  %4853 = vrcp.f32 %v2674_v55  ;;  %v3189_v29 = vadd.f32 1.0, %v4838_v57 }
 0x1ac   : > { %v4842_v24 = vpop.eup %4841  ;;  %4855 = vrcp.f32 %v2675_v17  ;;  %v3194_v19 = vadd.f32 1.0, %v4840_v34 }
 0x1ad   : > { %v4844_v1 = vpop.eup %4843  ;;  %4857 = vrcp.f32 %v3189_v29  ;;  %v3192_v30 = vadd.f32 1.0, %v4842_v24 }
 0x1ae   : > { %v4846_v62 = vpop.eup %4845  ;;  %4859 = vrcp.f32 %v3194_v19  ;;  %v3195_v40 = vadd.f32 1.0, %v4844_v1 }
 0x1af   : > { %4861 = vrcp.f32 %v3192_v30  ;;  %v3193_v25 = vadd.f32 1.0, %v4846_v62 }
 0x1b0   : > { %4863 = vrcp.f32 %v3195_v40 }
 0x1b1   : > { %4865 = vrcp.f32 %v3193_v25 }
 0x1b2   : > { %v4848_v43 = vpop.eup %4847  ;;  %4867 = vpow2.f32 %v4270_v37 }
 0x1b3   : > { %v4850_v12 = vpop.eup %4849  ;;  %4869 = vpow2.f32 %v4268_v20  ;;  %v3286_v27 = vmul.f32 %v4848_v43, %v6448_v36 }
 0x1b4   : > { %v4852_v9 = vpop.eup %4851  ;;  %4871 = vpow2.f32 %v4271_v31  ;;  %v3284_v42 = vmul.f32 %v4850_v12, %v6451_v2 }
 0x1b5   : > { %v4854_v11 = vpop.eup %4853  ;;  %v3287_v33 = vmul.f32 %v4852_v9, %v6454_v48  ;;  %4873 = vpow2.f32 %v4269_v6 }
 0x1b6   : > { %v4856_v21 = vpop.eup %4855  ;;  %v2770_v3 = vmul.f32 %v4854_v11, %v6473_v45 }
 0x1b7   : > { %v4858_v28 = vpop.eup %4857  ;;  %v2771_v63 = vmul.f32 %v4856_v21, %v6478_v4  ;;  %v3317_v14 = vpack.c.bf16 %v3287_v33, %v3286_v27 }
 0x1b8   : > { %v4860_v8 = vpop.eup %4859  ;;  %v3285_v50 = vmul.f32 %v4858_v28, %v6460_v26 }
 0x1b9   : > { %v4862_v15 = vpop.eup %4861  ;;  %v2787_v44 = vpack.c.bf16 %v2771_v63, %v2770_v3  ;;  %v3290_v48 = vmul.f32 %v4860_v8, %v6463_v5 }
 0x1ba   : > { %v4864_v46 = vpop.eup %4863  ;;  %v3316_v36 = vpack.c.bf16 %v3285_v50, %v3284_v42  ;;  %v3288_v4 = vmul.f32 %v4862_v15, %v6476_v58 }
 0x1bb   : > { %v4866_v13 = vpop.eup %4865  ;;  %4556 = vmatmul.mubr.msk.bf16.gmra.mrb[28].mxu0 %vm2804_vm2, %v2787_v44  ;;  %v3291_v45 = vmul.f32 %v4864_v46, %v6489_v39 }
 0x1bc   : > { %v4868_v35 = vpop.eup %4867  ;;  %v3289_v7 = vmul.f32 %v4866_v13, %v6492_v41  ;;  %4567 = vmatprep.mubr.msk.bf16.mxu1 %vm3364_vm3, %v3316_v36 }
 0x1bd   : > { %v4870_v2 = vpop.eup %4869  ;;  %v3319_v26 = vpack.c.bf16 %v3291_v45, %v3290_v48  ;;  %v3198_v0 = vadd.f32 1.0, %v4868_v35  ;;  %4568 = vmatmul.mubr.msk.bf16.vlgmr.msra.gmra.mrb[0].mxu1 %vm3364_vm3, %v3317_v14 }
 0x1be   : > { %v4872_v22 = vpop.eup %4871  ;;  %v3318_v47 = vpack.c.bf16 %v3289_v7, %v3288_v4  ;;  %v3196_v32 = vadd.f32 1.0, %v4870_v2 }
 0x1bf   : > { %v4874_v51 = vpop.eup %4873  ;;  %4875 = vrcp.f32 %v3198_v0  ;;  %v3199_v5 = vadd.f32 1.0, %v4872_v22 }
 0x1c0   : > { %4877 = vrcp.f32 %v3196_v32  ;;  %v3197_v39 = vadd.f32 1.0, %v4874_v51  ;;  %4571 = vmatprep.mubr.msk.bf16.mxu1 %vm3364_vm3, %v3318_v47 }
 0x1c1   : > { %4879 = vrcp.f32 %v3199_v5 }
 0x1c2   : > { %4881 = vrcp.f32 %v3197_v39 }
 0x1c5   : > { %4572 = vmatmul.mubr.msk.bf16.gmra.mrb[4].mxu1 %vm3364_vm3, %v3319_v26 }
 0x1c9   : > { %v4876_v58 = vpop.eup %4875 }
 0x1ca   : > { %v4878_v41 = vpop.eup %4877  ;;  %v3294_v54 = vmul.f32 %v4876_v58, %v6508_v59 }
 0x1cb   : > { %v4880_v52 = vpop.eup %4879  ;;  %v3292_v23 = vmul.f32 %v4878_v41, %v6511_v60 }
 0x1cc   : > { %v4882_v53 = vpop.eup %4881  ;;  %v3295_v56 = vmul.f32 %v4880_v52, %v6514_v61 }
 0x1cd   : > { %v3293_v16 = vmul.f32 %v4882_v53, %v6517_v38 }
 0x1ce   : > { %v3321_v55 = vpack.c.bf16 %v3295_v56, %v3294_v54 }
 0x1cf   : > { %v3320_v18 = vpack.c.bf16 %v3293_v16, %v3292_v23 }
 0x1d0   : > { %v4541_v57 = vpop.f32.mrb[12].mxu0 }
 0x1d1   : > { %v3035_v17 = vmul.f32 %v4541_v57, %v6427_v10  ;;  %v2935_v34 = vpop.f32.mrb[13].mxu0  ;;  %4575 = vmatprep.mubr.msk.bf16.mxu1 %vm3364_vm3, %v3320_v18 }
 0x1d2   : > { %v3033_v29 = vmul.f32 %v6427_v10, %v2935_v34  ;;  %v4542_v24 = vpop.f32.mrb[14].mxu0  ;;  %4576 = vmatmul.mubr.msk.bf16.gmra.mrb[8].mxu1 %vm3364_vm3, %v3321_v55 }
 0x1d3   : > { %v3074_v59 = vadd.f32 %v6433_v49, %v3035_v17  ;;  %v3036_v19 = vmul.f32 %v4542_v24, %v6427_v10  ;;  %v2938_v60 = vpop.f32.mrb[15].mxu0 }
 0x1d4   : > { %v3072_v61 = vadd.f32 %v6433_v49, %v3033_v29  ;;  %v3034_v1 = vmul.f32 %v6427_v10, %v2938_v60 }
 0x1d5   : > { %v4274_v30 = vmul.f32 -1.442695, %v3074_v59  ;;  %v3075_v38 = vadd.f32 %v6433_v49, %v3036_v19 }
 0x1d6   : > { %v4272_v62 = vmul.f32 -1.442695, %v3072_v61  ;;  %v3073_v40 = vadd.f32 %v6433_v49, %v3034_v1 }
 0x1d7   : > { %4883 = vpow2.f32 %v4274_v30  ;;  %v4275_v37 = vmul.f32 -1.442695, %v3075_v38 }
 0x1d8   : > { %4885 = vpow2.f32 %v4272_v62  ;;  %v4273_v25 = vmul.f32 -1.442695, %v3073_v40 }
 0x1d9   : > { %4887 = vpow2.f32 %v4275_v37 }
 0x1da   : > { %4889 = vpow2.f32 %v4273_v25 }
 0x1e1   : > { %v4884_v20 = vpop.eup %4883 }
 0x1e2   : > { %v4886_v31 = vpop.eup %4885  ;;  %v3202_v6 = vadd.f32 1.0, %v4884_v20 }
 0x1e3   : > { %v4888_v43 = vpop.eup %4887  ;;  %v3200_v12 = vadd.f32 1.0, %v4886_v31 }
 0x1e4   : > { %v4890_v9 = vpop.eup %4889  ;;  %4891 = vrcp.f32 %v3202_v6  ;;  %v3203_v11 = vadd.f32 1.0, %v4888_v43 }
 0x1e5   : > { %4893 = vrcp.f32 %v3200_v12  ;;  %v3201_v27 = vadd.f32 1.0, %v4890_v9 }
 0x1e6   : > { %4895 = vrcp.f32 %v3203_v11 }
 0x1e7   : > { %4897 = vrcp.f32 %v3201_v27 }
 0x1ee   : > { %v4892_v33 = vpop.eup %4891 }
 0x1ef   : > { %v4894_v21 = vpop.eup %4893  ;;  %v3298_v63 = vmul.f32 %v4892_v33, %v3074_v59 }
 0x1f0   : > { %v4896_v3 = vpop.eup %4895  ;;  %v3296_v8 = vmul.f32 %v4894_v21, %v3072_v61 }
 0x1f1   : > { %v4898_v28 = vpop.eup %4897  ;;  %v3299_v14 = vmul.f32 %v4896_v3, %v3075_v38 }
 0x1f2   : > { %v3297_v42 = vmul.f32 %v4898_v28, %v3073_v40 }
 0x1f3   : > { %v3323_v50 = vpack.c.bf16 %v3299_v14, %v3298_v63 }
 0x1f4   : > { %v3322_v15 = vpack.c.bf16 %v3297_v42, %v3296_v8 }
 0x1f6   : > { %4579 = vmatprep.mubr.msk.bf16.mxu1 %vm3364_vm3, %v3322_v15 }
 0x1f7   : > { %4580 = vmatmul.mubr.msk.bf16.gmra.mrb[12].mxu1 %vm3364_vm3, %v3323_v50 }
 0x200   : > { %v4545_v44 = vpop.f32.mrb[16].mxu0 }
 0x201   : > { %v3039_v46 = vmul.f32 %v4545_v44, %v6427_v10  ;;  %v2951_v36 = vpop.f32.mrb[17].mxu0 }
 0x202   : > { %v3037_v13 = vmul.f32 %v6427_v10, %v2951_v36  ;;  %v4546_v48 = vpop.f32.mrb[18].mxu0 }
 0x203   : > { %v3078_v45 = vadd.f32 %v6433_v49, %v3039_v46  ;;  %v3040_v35 = vmul.f32 %v4546_v48, %v6427_v10  ;;  %v2954_v4 = vpop.f32.mrb[19].mxu0 }
 0x204   : > { %v3076_v7 = vadd.f32 %v6433_v49, %v3037_v13  ;;  %v3038_v2 = vmul.f32 %v6427_v10, %v2954_v4 }
 0x205   : > { %v4278_v26 = vmul.f32 -1.442695, %v3078_v45  ;;  %v3079_v0 = vadd.f32 %v6433_v49, %v3040_v35 }
 0x206   : > { %v4276_v22 = vmul.f32 -1.442695, %v3076_v7  ;;  %v3077_v47 = vadd.f32 %v6433_v49, %v3038_v2 }
 0x207   : > { %4899 = vpow2.f32 %v4278_v26  ;;  %v4279_v32 = vmul.f32 -1.442695, %v3079_v0 }
 0x208   : > { %4901 = vpow2.f32 %v4276_v22  ;;  %v4277_v51 = vmul.f32 -1.442695, %v3077_v47 }
 0x209   : > { %4903 = vpow2.f32 %v4279_v32 }
 0x20a   : > { %4905 = vpow2.f32 %v4277_v51 }
 0x211   : > { %v4900_v5 = vpop.eup %4899 }
 0x212   : > { %v4902_v39 = vpop.eup %4901  ;;  %v3206_v58 = vadd.f32 1.0, %v4900_v5 }
 0x213   : > { %v4904_v41 = vpop.eup %4903  ;;  %v3204_v52 = vadd.f32 1.0, %v4902_v39 }
 0x214   : > { %v4906_v53 = vpop.eup %4905  ;;  %4907 = vrcp.f32 %v3206_v58  ;;  %v3207_v54 = vadd.f32 1.0, %v4904_v41 }
 0x215   : > { %4909 = vrcp.f32 %v3204_v52  ;;  %v3205_v56 = vadd.f32 1.0, %v4906_v53 }
 0x216   : > { %4911 = vrcp.f32 %v3207_v54 }
 0x217   : > { %4913 = vrcp.f32 %v3205_v56 }
 0x21e   : > { %v4908_v23 = vpop.eup %4907 }
 0x21f   : > { %v4910_v16 = vpop.eup %4909  ;;  %v3302_v57 = vmul.f32 %v4908_v23, %v3078_v45 }
 0x220   : > { %v4912_v55 = vpop.eup %4911  ;;  %v3300_v34 = vmul.f32 %v4910_v16, %v3076_v7 }
 0x221   : > { %v4914_v18 = vpop.eup %4913  ;;  %v3303_v17 = vmul.f32 %v4912_v55, %v3079_v0 }
 0x222   : > { %v3301_v29 = vmul.f32 %v4914_v18, %v3077_v47 }
 0x223   : > { %v3325_v24 = vpack.c.bf16 %v3303_v17, %v3302_v57 }
 0x224   : > { %v3324_v59 = vpack.c.bf16 %v3301_v29, %v3300_v34 }
 0x226   : > { %4583 = vmatprep.mubr.msk.bf16.mxu1 %vm3364_vm3, %v3324_v59 }
 0x227   : > { %4584 = vmatmul.mubr.msk.bf16.gmra.mrb[16].mxu1 %vm3364_vm3, %v3325_v24 }
 0x22f   : > { %v4549_v19 = vpop.f32.mrb[20].mxu0 }
 0x230   : > { %v3043_v60 = vmul.f32 %v4549_v19, %v6427_v10  ;;  %v2967_v61 = vpop.f32.mrb[21].mxu0 }
 0x231   : > { %v3041_v1 = vmul.f32 %v6427_v10, %v2967_v61  ;;  %v4550_v30 = vpop.f32.mrb[22].mxu0 }
 0x232   : > { %v3082_v38 = vadd.f32 %v6433_v49, %v3043_v60  ;;  %v3044_v62 = vmul.f32 %v4550_v30, %v6427_v10  ;;  %v2970_v40 = vpop.f32.mrb[23].mxu0 }
 0x233   : > { %v3080_v37 = vadd.f32 %v6433_v49, %v3041_v1  ;;  %v3042_v25 = vmul.f32 %v6427_v10, %v2970_v40  ;;  %v6587_v40 = vld [vmem:[%s6849_s8] ss:$0 sm:$0xff] }
 0x234   : > { %v4282_v20 = vmul.f32 -1.442695, %v3082_v38  ;;  %v3083_v31 = vadd.f32 %v6433_v49, %v3044_v62 }
 0x235   : > { %v4280_v6 = vmul.f32 -1.442695, %v3080_v37  ;;  %v3081_v43 = vadd.f32 %v6433_v49, %v3042_v25 }
 0x236   : > { %4915 = vpow2.f32 %v4282_v20  ;;  %v4283_v12 = vmul.f32 -1.442695, %v3083_v31 }
 0x237   : > { %4917 = vpow2.f32 %v4280_v6  ;;  %v4281_v9 = vmul.f32 -1.442695, %v3081_v43 }
 0x238   : > { %4919 = vpow2.f32 %v4283_v12 }
 0x239   : > { %4921 = vpow2.f32 %v4281_v9 }
 0x240   : > { %v4916_v11 = vpop.eup %4915 }
 0x241   : > { %v4918_v27 = vpop.eup %4917  ;;  %v3210_v33 = vadd.f32 1.0, %v4916_v11 }
 0x242   : > { %v4920_v21 = vpop.eup %4919  ;;  %v3208_v3 = vadd.f32 1.0, %v4918_v27 }
 0x243   : > { %v4922_v28 = vpop.eup %4921  ;;  %4923 = vrcp.f32 %v3210_v33  ;;  %v3211_v63 = vadd.f32 1.0, %v4920_v21 }
 0x244   : > { %4925 = vrcp.f32 %v3208_v3  ;;  %v3209_v14 = vadd.f32 1.0, %v4922_v28 }
 0x245   : > { %4927 = vrcp.f32 %v3211_v63 }
 0x246   : > { %4929 = vrcp.f32 %v3209_v14 }
 0x24d   : > { %v4924_v8 = vpop.eup %4923 }
 0x24e   : > { %v4926_v42 = vpop.eup %4925  ;;  %v3306_v44 = vmul.f32 %v4924_v8, %v3082_v38 }
 0x24f   : > { %v4928_v50 = vpop.eup %4927  ;;  %v3304_v36 = vmul.f32 %v4926_v42, %v3080_v37 }
 0x250   : > { %v4930_v15 = vpop.eup %4929  ;;  %v3307_v46 = vmul.f32 %v4928_v50, %v3083_v31 }
 0x251   : > { %v3305_v13 = vmul.f32 %v4930_v15, %v3081_v43  ;;  %v6594_v43 = vld [vmem:[%s6850_s9] ss:$0 sm:$0xff] }
 0x252   : > { %v3327_v48 = vpack.c.bf16 %v3307_v46, %v3306_v44 }
 0x253   : > { %v3326_v45 = vpack.c.bf16 %v3305_v13, %v3304_v36 }
 0x255   : > { %4587 = vmatprep.mubr.msk.bf16.mxu1 %vm3364_vm3, %v3326_v45 }
 0x256   : > { %4588 = vmatmul.mubr.msk.bf16.gmra.mrb[20].mxu1 %vm3364_vm3, %v3327_v48 }
 0x25f   : > { %v4553_v35 = vpop.f32.mrb[24].mxu0 }
 0x260   : > { %v3047_v4 = vmul.f32 %v4553_v35, %v6427_v10  ;;  %v2983_v7 = vpop.f32.mrb[25].mxu0 }
 0x261   : > { %v3045_v2 = vmul.f32 %v6427_v10, %v2983_v7  ;;  %v4554_v26 = vpop.f32.mrb[26].mxu0 }
 0x262   : > { %v3086_v0 = vadd.f32 %v6433_v49, %v3047_v4  ;;  %v3048_v22 = vmul.f32 %v4554_v26, %v6427_v10  ;;  %v2986_v47 = vpop.f32.mrb[27].mxu0 }
 0x263   : > { %v3084_v32 = vadd.f32 %v6433_v49, %v3045_v2  ;;  %v3046_v51 = vmul.f32 %v6427_v10, %v2986_v47 }
 0x264   : > { %v4286_v5 = vmul.f32 -1.442695, %v3086_v0  ;;  %v3087_v39 = vadd.f32 %v6433_v49, %v3048_v22 }
 0x265   : > { %v4284_v58 = vmul.f32 -1.442695, %v3084_v32  ;;  %v3085_v41 = vadd.f32 %v6433_v49, %v3046_v51 }
 0x266   : > { %4931 = vpow2.f32 %v4286_v5  ;;  %v4287_v52 = vmul.f32 -1.442695, %v3087_v39 }
 0x267   : > { %4933 = vpow2.f32 %v4284_v58  ;;  %v4285_v53 = vmul.f32 -1.442695, %v3085_v41 }
 0x268   : > { %4935 = vpow2.f32 %v4287_v52 }
 0x269   : > { %4937 = vpow2.f32 %v4285_v53 }
 0x270   : > { %v4932_v54 = vpop.eup %4931 }
 0x271   : > { %v4934_v56 = vpop.eup %4933  ;;  %v3214_v23 = vadd.f32 1.0, %v4932_v54 }
 0x272   : > { %v4936_v16 = vpop.eup %4935  ;;  %v3212_v55 = vadd.f32 1.0, %v4934_v56 }
 0x273   : > { %v4938_v18 = vpop.eup %4937  ;;  %4939 = vrcp.f32 %v3214_v23  ;;  %v3215_v57 = vadd.f32 1.0, %v4936_v16 }
 0x274   : > { %4941 = vrcp.f32 %v3212_v55  ;;  %v3213_v17 = vadd.f32 1.0, %v4938_v18 }
 0x275   : > { %4943 = vrcp.f32 %v3215_v57 }
 0x276   : > { %4945 = vrcp.f32 %v3213_v17 }
 0x27d   : > { %v4940_v34 = vpop.eup %4939 }
 0x27e   : > { %v4942_v29 = vpop.eup %4941  ;;  %v3310_v19 = vmul.f32 %v4940_v34, %v3086_v0 }
 0x27f   : > { %v4944_v24 = vpop.eup %4943  ;;  %v3308_v61 = vmul.f32 %v4942_v29, %v3084_v32 }
 0x280   : > { %v4946_v59 = vpop.eup %4945  ;;  %v3311_v60 = vmul.f32 %v4944_v24, %v3087_v39 }
 0x281   : > { %v3309_v1 = vmul.f32 %v4946_v59, %v3085_v41 }
 0x282   : > { %v3329_v30 = vpack.c.bf16 %v3311_v60, %v3310_v19 }
 0x283   : > { %v3328_v38 = vpack.c.bf16 %v3309_v1, %v3308_v61 }
 0x285   : > { %4591 = vmatprep.mubr.msk.bf16.mxu1 %vm3364_vm3, %v3328_v38 }
 0x286   : > { %4592 = vmatmul.mubr.msk.bf16.gmra.mrb[24].mxu1 %vm3364_vm3, %v3329_v30 }
 0x28e   : > { %v4557_v62 = vpop.f32.mrb[28].mxu0 }
 0x28f   : > { %v3051_v37 = vmul.f32 %v4557_v62, %v6427_v10  ;;  %v2999_v25 = vpop.f32.mrb[29].mxu0 }
 0x290   : > { %v3049_v20 = vmul.f32 %v6427_v10, %v2999_v25  ;;  %v4558_v31 = vpop.f32.mrb[30].mxu0  ;;  %v4569_v6 = vpop.f32.mrb[0].mxu1 }
 0x291   : > { %v6597_v12 = vadd.f32 %v6433_v49, %v3051_v37  ;;  %v3052_v9 = vmul.f32 %v4558_v31, %v6427_v10  ;;  %v3002_v11 = vpop.f32.mrb[31].mxu0  ;;  %v3583_v27 = vmul.f32 %v4569_v6, %v6587_v40  ;;  %v3447_v33 = vpop.f32.mrb[1].mxu1 }
 0x292   : > { %v6602_v21 = vadd.f32 %v6433_v49, %v3049_v20  ;;  %v3050_v3 = vmul.f32 %v6427_v10, %v3002_v11  ;;  %v3581_v28 = vmul.f32 %v6587_v40, %v3447_v33  ;;  %v4570_v63 = vpop.f32.mrb[2].mxu1 }
 0x293   : > { %v4290_v14 = vmul.f32 -1.442695, %v6597_v12  ;;  %v6608_v8 = vadd.f32 %v6433_v49, %v3052_v9  ;;  %v6611_v42 = vadd.f32 %v6594_v43, %v3583_v27  ;;  %v3584_v50 = vmul.f32 %v4570_v63, %v6587_v40  ;;  %v3450_v15 = vpop.f32.mrb[3].mxu1 }
 0x294   : > { %v4288_v44 = vmul.f32 -1.442695, %v6602_v21  ;;  %v6616_v46 = vadd.f32 %v6433_v49, %v3050_v3  ;;  %v6619_v10 = vadd.f32 %v6594_v43, %v3581_v28  ;;  %v3582_v36 = vmul.f32 %v6587_v40, %v3450_v15 }
 0x295   : > { %4947 = vpow2.f32 %v4290_v14  ;;  %v4291_v13 = vmul.f32 -1.442695, %v6608_v8  ;;  %v4316_v48 = vmul.f32 -1.442695, %v6611_v42  ;;  %v6625_v45 = vadd.f32 %v6594_v43, %v3584_v50 }
 0x296   : > { %4949 = vpow2.f32 %v4288_v44  ;;  %v4289_v35 = vmul.f32 -1.442695, %v6616_v46  ;;  %v4314_v4 = vmul.f32 -1.442695, %v6619_v10  ;;  %v6630_v49 = vadd.f32 %v6594_v43, %v3582_v36 }
 0x297   : > { %4951 = vpow2.f32 %v4291_v13  ;;  %v4317_v7 = vmul.f32 -1.442695, %v6625_v45 }
 0x298   : > { %4953 = vpow2.f32 %v4289_v35  ;;  %v4315_v2 = vmul.f32 -1.442695, %v6630_v49  ;;  %v4573_v26 = vpop.f32.mrb[4].mxu1 }
 0x299   : > { %4955 = vpow2.f32 %v4316_v48  ;;  %v3587_v0 = vmul.f32 %v4573_v26, %v6587_v40  ;;  %v3463_v22 = vpop.f32.mrb[5].mxu1 }
 0x29a   : > { %4957 = vpow2.f32 %v4314_v4  ;;  %v3585_v47 = vmul.f32 %v6587_v40, %v3463_v22  ;;  %v4574_v32 = vpop.f32.mrb[6].mxu1 }
 0x29b   : > { %4959 = vpow2.f32 %v4317_v7  ;;  %v6637_v51 = vadd.f32 %v6594_v43, %v3587_v0  ;;  %v3588_v5 = vmul.f32 %v4574_v32, %v6587_v40  ;;  %v3466_v39 = vpop.f32.mrb[7].mxu1 }
 0x29c   : > { %4961 = vpow2.f32 %v4315_v2  ;;  %v6641_v58 = vadd.f32 %v6594_v43, %v3585_v47  ;;  %v3586_v54 = vmul.f32 %v6587_v40, %v3466_v39 }
 0x29d   : > { %v4320_v41 = vmul.f32 -1.442695, %v6637_v51  ;;  %v6646_v53 = vadd.f32 %v6594_v43, %v3588_v5 }
 0x29e   : > { %v4318_v52 = vmul.f32 -1.442695, %v6641_v58  ;;  %v6651_v29 = vadd.f32 %v6594_v43, %v3586_v54 }
 0x29f   : > { %v4948_v56 = vpop.eup %4947  ;;  %v4321_v34 = vmul.f32 -1.442695, %v6646_v53 }
 0x2a0   : > { %v4950_v23 = vpop.eup %4949  ;;  %v3218_v16 = vadd.f32 1.0, %v4948_v56  ;;  %4963 = vpow2.f32 %v4318_v52  ;;  %v4319_v62 = vmul.f32 -1.442695, %v6651_v29 }
 0x2a1   : > { %v4952_v55 = vpop.eup %4951  ;;  %v3216_v18 = vadd.f32 1.0, %v4950_v23  ;;  %4965 = vpow2.f32 %v4320_v41 }
 0x2a2   : > { %v4954_v57 = vpop.eup %4953  ;;  %4967 = vrcp.f32 %v3218_v16  ;;  %v3219_v17 = vadd.f32 1.0, %v4952_v55 }
 0x2a3   : > { %v4956_v24 = vpop.eup %4955  ;;  %4969 = vrcp.f32 %v3216_v18  ;;  %v3217_v59 = vadd.f32 1.0, %v4954_v57 }
 0x2a4   : > { %v4958_v19 = vpop.eup %4957  ;;  %4971 = vrcp.f32 %v3219_v17  ;;  %v3750_v60 = vadd.f32 1.0, %v4956_v24 }
 0x2a5   : > { %v4960_v61 = vpop.eup %4959  ;;  %4973 = vrcp.f32 %v3217_v59  ;;  %v3748_v1 = vadd.f32 1.0, %v4958_v19  ;;  %v4577_v30 = vpop.f32.mrb[8].mxu1 }
 0x2a6   : > { %v4962_v38 = vpop.eup %4961  ;;  %4975 = vpow2.f32 %v4321_v34  ;;  %v3591_v37 = vmul.f32 %v4577_v30, %v6587_v40  ;;  %v3479_v25 = vpop.f32.mrb[9].mxu1  ;;  %v3751_v20 = vadd.f32 1.0, %v4960_v61 }
 0x2a7   : > { %4977 = vrcp.f32 %v3748_v1  ;;  %v3749_v31 = vadd.f32 1.0, %v4962_v38  ;;  %v3589_v6 = vmul.f32 %v6587_v40, %v3479_v25  ;;  %v4578_v9 = vpop.f32.mrb[10].mxu1 }
 0x2a8   : > { %4979 = vrcp.f32 %v3750_v60  ;;  %v6657_v11 = vadd.f32 %v6594_v43, %v3591_v37  ;;  %v3592_v27 = vmul.f32 %v4578_v9, %v6587_v40  ;;  %v3482_v33 = vpop.f32.mrb[11].mxu1 }
 0x2a9   : > { %4981 = vrcp.f32 %v3749_v31  ;;  %v6661_v3 = vadd.f32 %v6594_v43, %v3589_v6  ;;  %v3590_v28 = vmul.f32 %v6587_v40, %v3482_v33 }
 0x2aa   : > { %v4964_v63 = vpop.eup %4963  ;;  %4983 = vpow2.f32 %v4319_v62  ;;  %v6665_v14 = vadd.f32 %v6594_v43, %v3592_v27  ;;  %v4324_v44 = vmul.f32 -1.442695, %v6657_v11 }
 0x2ab   : > { %v4966_v50 = vpop.eup %4965  ;;  %4985 = vrcp.f32 %v3751_v20  ;;  %v3752_v15 = vadd.f32 1.0, %v4964_v63  ;;  %v6669_v36 = vadd.f32 %v6594_v43, %v3590_v28  ;;  %v4322_v48 = vmul.f32 -1.442695, %v6661_v3 }
 0x2ac   : > { %v4968_v13 = vpop.eup %4967  ;;  %v4325_v4 = vmul.f32 -1.442695, %v6665_v14  ;;  %v3754_v56 = vadd.f32 1.0, %v4966_v50 }
 0x2ad   : > { %v4970_v35 = vpop.eup %4969  ;;  %4987 = vrcp.f32 %v3752_v15  ;;  %v4323_v2 = vmul.f32 -1.442695, %v6669_v36  ;;  %v3314_v0 = vmul.f32 %v4968_v13, %v6597_v12 }
 0x2ae   : > { %v4972_v7 = vpop.eup %4971  ;;  %4989 = vpow2.f32 %v4324_v44  ;;  %v3312_v32 = vmul.f32 %v4970_v35, %v6602_v21 }
 0x2af   : > { %v4974_v26 = vpop.eup %4973  ;;  %v3315_v22 = vmul.f32 %v4972_v7, %v6608_v8  ;;  %4991 = vpow2.f32 %v4322_v48 }
 0x2b0   : > { %v4976_v47 = vpop.eup %4975  ;;  %v3313_v5 = vmul.f32 %v4974_v26, %v6616_v46  ;;  %4993 = vpow2.f32 %v4325_v4 }
 0x2b1   : > { %v4978_v39 = vpop.eup %4977  ;;  %v3331_v41 = vpack.c.bf16 %v3315_v22, %v3314_v0  ;;  %4995 = vpow2.f32 %v4323_v2  ;;  %v3755_v21 = vadd.f32 1.0, %v4976_v47 }
 0x2b2   : > { %v4980_v52 = vpop.eup %4979  ;;  %v3330_v54 = vpack.c.bf16 %v3313_v5, %v3312_v32  ;;  %v3844_v12 = vmul.f32 %v4978_v39, %v6619_v10  ;;  %4997 = vrcp.f32 %v3754_v56 }
 0x2b3   : > { %v4982_v23 = vpop.eup %4981  ;;  %v3846_v18 = vmul.f32 %v4980_v52, %v6611_v42  ;;  %v5164_v52 = vmov 0.0|0.0  }
 0x2b4   : > { %v4984_v16 = vpop.eup %4983  ;;  %4595 = vmatprep.mubr.msk.bf16.mxu1 %vm3364_vm3, %v3330_v54  ;;  %v3845_v8 = vmul.f32 %v4982_v23, %v6630_v49  ;;  %4634 = vmatprep.subr.bf16.mxu0 %v5164_v52 }
 0x2b5   : > { %v4986_v55 = vpop.eup %4985  ;;  %4596 = vmatmul.mubr.msk.bf16.gmra.mrb[28].mxu1 %vm3364_vm3, %v3331_v41  ;;  %v3753_v46 = vadd.f32 1.0, %v4984_v16 }
 0x2b6   : > { %v3876_v57 = vadd.f32 %v3845_v8, %v3844_v12  ;;  %v3847_v34 = vmul.f32 %v4986_v55, %v6625_v45 }
 0x2b7   : > { %v4988_v17 = vpop.eup %4987  ;;  %4999 = vrcp.f32 %v3753_v46 }
 0x2b8   : > { %v3877_v24 = vadd.f32 %v3876_v57, %v3846_v18  ;;  %v3848_v59 = vmul.f32 %v4988_v17, %v6641_v58  ;;  %v4990_v19 = vpop.eup %4989  ;;  %5001 = vrcp.f32 %v3755_v21 }
 0x2b9   : > { %v4992_v10 = vpop.eup %4991  ;;  %v3758_v60 = vadd.f32 1.0, %v4990_v19 }
 0x2ba   : > { %v3878_v49 = vadd.f32 %v3877_v24, %v3847_v34  ;;  %v4994_v61 = vpop.eup %4993  ;;  %v3756_v1 = vadd.f32 1.0, %v4992_v10 }
 0x2bb   : > { %v4996_v30 = vpop.eup %4995  ;;  %v3759_v42 = vadd.f32 1.0, %v4994_v61 }
 0x2bc   : > { %v3879_v38 = vadd.f32 %v3878_v49, %v3848_v59  ;;  %5003 = vrcp.f32 %v3756_v1  ;;  %v3757_v62 = vadd.f32 1.0, %v4996_v30  ;;  %v4998_v37 = vpop.eup %4997  ;;  %v3915_v30 = vld [vmem:[%s6851_s10] sm:$0xff] }
 0x2bd   : > { %5005 = vrcp.f32 %v3758_v60  ;;  %v3850_v20 = vmul.f32 %v4998_v37, %v6637_v51 }
 0x2be   : > { %5007 = vrcp.f32 %v3757_v62 }
 0x2bf   : > { %5009 = vrcp.f32 %v3759_v42 }
 0x2c1   : > { %v5000_v25 = vpop.eup %4999 }
 0x2c2   : > { %v3849_v45 = vmul.f32 %v5000_v25, %v6651_v29  ;;  %v5002_v58 = vpop.eup %5001 }
 0x2c3   : > { %v3851_v6 = vmul.f32 %v5002_v58, %v6646_v53 }
 0x2c4   : > { %v3880_v31 = vadd.f32 %v3879_v38, %v3849_v45  ;;  %v3916_v38 = vld [vmem:[%s6851_s10 + $0x8] sm:$0xff] }
 0x2c5   : > { %v4635_v42 = vpack.c.bf16 %v3916_v38, %v3915_v30  ;;  %v3924_v30 = vld [vmem:[%s6851_s10 + $0x48] sm:$0xff] }
 0x2c6   : > { %v3881_v9 = vadd.f32 %v3880_v31, %v3850_v20  ;;  %v5004_v27 = vpop.eup %5003 }
 0x2c7   : > { %v5006_v33 = vpop.eup %5005  ;;  %v3852_v28 = vmul.f32 %v5004_v27, %v6661_v3  ;;  %4636 = vmatpush3.bf16.msra.mxu0 %v4635_v42 }
 0x2c8   : > { %v3882_v63 = vadd.f32 %v3881_v9, %v3851_v6  ;;  %v5008_v50 = vpop.eup %5007  ;;  %v3854_v51 = vmul.f32 %v5006_v33, %v6657_v11  ;;  %4637 = vmatprep.subr.bf16.mxu0 %v5164_v52 }
 0x2c9   : > { %v3853_v44 = vmul.f32 %v5008_v50, %v6669_v36  ;;  %v5010_v48 = vpop.eup %5009 }
 0x2ca   : > { %v3883_v15 = vadd.f32 %v3882_v63, %v3852_v28  ;;  %v4581_v13 = vpop.f32.mrb[12].mxu1  ;;  %v3855_v0 = vmul.f32 %v5010_v48, %v6665_v14 }
 0x2cb   : > { %v3595_v29 = vmul.f32 %v4581_v13, %v6587_v40  ;;  %v3495_v35 = vpop.f32.mrb[13].mxu1 }
 0x2cc   : > { %v3884_v4 = vadd.f32 %v3883_v15, %v3853_v44  ;;  %v3593_v53 = vmul.f32 %v6587_v40, %v3495_v35  ;;  %v4582_v7 = vpop.f32.mrb[14].mxu1 }
 0x2cd   : > { %v3634_v2 = vadd.f32 %v6594_v43, %v3595_v29  ;;  %v3596_v3 = vmul.f32 %v4582_v7, %v6587_v40  ;;  %v3498_v26 = vpop.f32.mrb[15].mxu1 }
 0x2ce   : > { %v3885_v22 = vadd.f32 %v3884_v4, %v3854_v51  ;;  %v3632_v36 = vadd.f32 %v6594_v43, %v3593_v53  ;;  %v3594_v47 = vmul.f32 %v6587_v40, %v3498_v26 }
 0x2cf   : > { %v4328_v32 = vmul.f32 -1.442695, %v3634_v2  ;;  %v3635_v5 = vadd.f32 %v6594_v43, %v3596_v3 }
 0x2d0   : > { %v4326_v11 = vmul.f32 -1.442695, %v3632_v36  ;;  %v3886_v39 = vadd.f32 %v3885_v22, %v3855_v0  ;;  %v3633_v41 = vadd.f32 %v6594_v43, %v3594_v47 }
 0x2d1   : > { %5011 = vpow2.f32 %v4328_v32  ;;  %v4329_v54 = vmul.f32 -1.442695, %v3635_v5 }
 0x2d2   : > { %5013 = vpow2.f32 %v4326_v11  ;;  %v4327_v56 = vmul.f32 -1.442695, %v3633_v41 }
 0x2d3   : > { %5015 = vpow2.f32 %v4329_v54  ;;  %v3917_v54 = vld [vmem:[%s6851_s10 + $0x10] sm:$0xff] }
 0x2d4   : > { %5017 = vpow2.f32 %v4327_v56  ;;  %v3918_v56 = vld [vmem:[%s6851_s10 + $0x18] sm:$0xff] }
 0x2db   : > { %v5012_v14 = vpop.eup %5011 }
 0x2dc   : > { %v5014_v23 = vpop.eup %5013  ;;  %v3762_v16 = vadd.f32 1.0, %v5012_v14  ;;  %v4638_v14 = vpack.c.bf16 %v3918_v56, %v3917_v54 }
 0x2dd   : > { %v5016_v12 = vpop.eup %5015  ;;  %v3760_v8 = vadd.f32 1.0, %v5014_v23  ;;  %v3919_v23 = vld [vmem:[%s6851_s10 + $0x20] sm:$0xff] }
 0x2de   : > { %v5018_v55 = vpop.eup %5017  ;;  %v3763_v21 = vadd.f32 1.0, %v5016_v12  ;;  %4639 = vmatpush3.bf16.msra.mxu0 %v4638_v14 }
 0x2df   : > { %5019 = vrcp.f32 %v3760_v8  ;;  %v3761_v46 = vadd.f32 1.0, %v5018_v55  ;;  %4640 = vmatprep.subr.bf16.mxu0 %v5164_v52 }
 0x2e0   : > { %5021 = vrcp.f32 %v3762_v16  ;;  %v3920_v16 = vld [vmem:[%s6851_s10 + $0x28] sm:$0xff] }
 0x2e1   : > { %5023 = vrcp.f32 %v3761_v46  ;;  %v4641_v12 = vpack.c.bf16 %v3920_v16, %v3919_v23  ;;  %v3921_v46 = vld [vmem:[%s6851_s10 + $0x30] sm:$0xff] }
 0x2e2   : > { %5025 = vrcp.f32 %v3763_v21 }
 0x2e3   : > { %4642 = vmatpush3.bf16.msra.mxu0 %v4641_v12 }
 0x2e4   : > { %4643 = vmatprep.subr.bf16.mxu0 %v5164_v52 }
 0x2e9   : > { %v5020_v18 = vpop.eup %5019 }
 0x2ea   : > { %v5022_v57 = vpop.eup %5021  ;;  %v3856_v17 = vmul.f32 %v5020_v18, %v3632_v36  ;;  %v3922_v18 = vld [vmem:[%s6851_s10 + $0x38] sm:$0xff] }
 0x2eb   : > { %v5024_v34 = vpop.eup %5023  ;;  %v3858_v10 = vmul.f32 %v5022_v57, %v3634_v2 }
 0x2ec   : > { %v3887_v24 = vadd.f32 %v3886_v39, %v3856_v17  ;;  %v3857_v59 = vmul.f32 %v5024_v34, %v3633_v41  ;;  %v5026_v19 = vpop.eup %5025  ;;  %v4644_v34 = vpack.c.bf16 %v3922_v18, %v3921_v46 }
 0x2ed   : > { %v3859_v60 = vmul.f32 %v5026_v19, %v3635_v5 }
 0x2ee   : > { %v3888_v49 = vadd.f32 %v3887_v24, %v3857_v59  ;;  %4645 = vmatpush3.bf16.msra.mxu0 %v4644_v34 }
 0x2ef   : > { %4646 = vmatprep.subr.bf16.mxu0 %v5164_v52 }
 0x2f0   : > { %v3889_v61 = vadd.f32 %v3888_v49, %v3858_v10 }
 0x2f2   : > { %v3890_v1 = vadd.f32 %v3889_v61, %v3859_v60 }
 0x2fa   : > { %v4585_v62 = vpop.f32.mrb[16].mxu1 }
 0x2fb   : > { %v3599_v37 = vmul.f32 %v4585_v62, %v6587_v40  ;;  %v3511_v25 = vpop.f32.mrb[17].mxu1 }
 0x2fc   : > { %v3597_v45 = vmul.f32 %v6587_v40, %v3511_v25  ;;  %v4586_v58 = vpop.f32.mrb[18].mxu1 }
 0x2fd   : > { %v3638_v20 = vadd.f32 %v6594_v43, %v3599_v37  ;;  %v3600_v31 = vmul.f32 %v4586_v58, %v6587_v40  ;;  %v3514_v6 = vpop.f32.mrb[19].mxu1  ;;  %v3926_v58 = vld [vmem:[%s6851_s10 + $0x58] sm:$0xff] }
 0x2fe   : > { %v3636_v9 = vadd.f32 %v6594_v43, %v3597_v45  ;;  %v3598_v27 = vmul.f32 %v6587_v40, %v3514_v6  ;;  %v3925_v45 = vld [vmem:[%s6851_s10 + $0x50] sm:$0xff]  ;;  %v3928_v6 = vld [vmem:[%s6851_s10 + $0x68] sm:$0xff] }
 0x2ff   : > { %v4332_v33 = vmul.f32 -1.442695, %v3638_v20  ;;  %v3639_v28 = vadd.f32 %v6594_v43, %v3600_v31  ;;  %v3927_v31 = vld [vmem:[%s6851_s10 + $0x60] sm:$0xff] }
 0x300   : > { %v4330_v63 = vmul.f32 -1.442695, %v3636_v9  ;;  %v3637_v50 = vadd.f32 %v6594_v43, %v3598_v27  ;;  %v4653_v27 = vpack.c.bf16 %v3928_v6, %v3927_v31 }
 0x301   : > { %5027 = vpow2.f32 %v4332_v33  ;;  %v4333_v15 = vmul.f32 -1.442695, %v3639_v28  ;;  %v3930_v33 = vld [vmem:[%s6851_s10 + $0x78] sm:$0xff] }
 0x302   : > { %5029 = vpow2.f32 %v4330_v63  ;;  %v4331_v44 = vmul.f32 -1.442695, %v3637_v50 }
 0x303   : > { %5031 = vpow2.f32 %v4333_v15 }
 0x304   : > { %5033 = vpow2.f32 %v4331_v44 }
 0x30b   : > { %v5028_v13 = vpop.eup %5027 }
 0x30c   : > { %v5030_v48 = vpop.eup %5029  ;;  %v3766_v29 = vadd.f32 1.0, %v5028_v13 }
 0x30d   : > { %v5032_v35 = vpop.eup %5031  ;;  %v3764_v51 = vadd.f32 1.0, %v5030_v48 }
 0x30e   : > { %v5034_v4 = vpop.eup %5033  ;;  %v3767_v53 = vadd.f32 1.0, %v5032_v35 }
 0x30f   : > { %5035 = vrcp.f32 %v3764_v51  ;;  %v3765_v7 = vadd.f32 1.0, %v5034_v4 }
 0x310   : > { %5037 = vrcp.f32 %v3766_v29 }
 0x311   : > { %5039 = vrcp.f32 %v3765_v7 }
 0x312   : > { %5041 = vrcp.f32 %v3767_v53 }
 0x319   : > { %v5036_v2 = vpop.eup %5035 }
 0x31a   : > { %v5038_v3 = vpop.eup %5037  ;;  %v3860_v26 = vmul.f32 %v5036_v2, %v3636_v9  ;;  %v3929_v9 = vld [vmem:[%s6851_s10 + $0x70] sm:$0xff] }
 0x31b   : > { %v5040_v0 = vpop.eup %5039  ;;  %v3862_v32 = vmul.f32 %v5038_v3, %v3638_v20  ;;  %v4650_v20 = vpack.c.bf16 %v3926_v58, %v3925_v45  ;;  %v4656_v63 = vpack.c.bf16 %v3930_v33, %v3929_v9 }
 0x31c   : > { %v3891_v22 = vadd.f32 %v3890_v1, %v3860_v26  ;;  %v3861_v36 = vmul.f32 %v5040_v0, %v3637_v50  ;;  %v5042_v47 = vpop.eup %5041  ;;  %v3923_v1 = vld [vmem:[%s6851_s10 + $0x40] sm:$0xff] }
 0x31d   : > { %v3863_v11 = vmul.f32 %v5042_v47, %v3639_v28  ;;  %v4647_v62 = vpack.c.bf16 %v3924_v30, %v3923_v1  ;;  %v5166_v28 = vmov 0.0  }
 0x31e   : > { %v3892_v5 = vadd.f32 %v3891_v22, %v3861_v36  ;;  %4631 = vmatprep.mubr.msk.f32.mxu0 %vm5165_vm4, %v5166_v28 }
 0x31f   : > { %4648 = vmatpush3.bf16.msra.mxu0 %v4647_v62 }
 0x320   : > { %v3893_v39 = vadd.f32 %v3892_v5, %v3862_v32  ;;  %4649 = vmatprep.subr.bf16.mxu0 %v5164_v52 }
 0x322   : > { %v6716_v41 = vadd.f32 %v3893_v39, %v3863_v11 }
 0x323   : > { %4651 = vmatpush3.bf16.msra.mxu0 %v4650_v20 }
 0x324   : > { %4652 = vmatprep.subr.bf16.mxu0 %v5164_v52 }
 0x327   : > { %4654 = vmatpush3.bf16.msra.mxu0 %v4653_v27 }
 0x328   : > { %4655 = vmatprep.subr.bf16.mxu0 %v5164_v52 }
 0x329   : > { %v4589_v8 = vpop.f32.mrb[20].mxu1 }
 0x32a   : > { %v3603_v55 = vmul.f32 %v4589_v8, %v6587_v40  ;;  %v3527_v21 = vpop.f32.mrb[21].mxu1 }
 0x32b   : > { %v3601_v57 = vmul.f32 %v6587_v40, %v3527_v21  ;;  %v4590_v17 = vpop.f32.mrb[22].mxu1  ;;  %4657 = vmatpush3.bf16.msra.mxu0 %v4656_v63 }
 0x32c   : > { %v3642_v24 = vadd.f32 %v6594_v43, %v3603_v55  ;;  %v3604_v59 = vmul.f32 %v4590_v17, %v6587_v40  ;;  %v3530_v19 = vpop.f32.mrb[23].mxu1 }
 0x32d   : > { %v3640_v10 = vadd.f32 %v6594_v43, %v3601_v57  ;;  %v3602_v49 = vmul.f32 %v6587_v40, %v3530_v19 }
 0x32e   : > { %v4336_v60 = vmul.f32 -1.442695, %v3642_v24  ;;  %v3643_v61 = vadd.f32 %v6594_v43, %v3604_v59 }
 0x32f   : > { %v4334_v38 = vmul.f32 -1.442695, %v3640_v10  ;;  %v3641_v42 = vadd.f32 %v6594_v43, %v3602_v49 }
 0x330   : > { %5043 = vpow2.f32 %v4336_v60  ;;  %v4337_v37 = vmul.f32 -1.442695, %v3643_v61 }
 0x331   : > { %5045 = vpow2.f32 %v4334_v38  ;;  %v4335_v25 = vmul.f32 -1.442695, %v3641_v42 }
 0x332   : > { %5047 = vpow2.f32 %v4337_v37 }
 0x333   : > { %5049 = vpow2.f32 %v4335_v25 }
 0x33a   : > { %v5044_v50 = vpop.eup %5043 }
 0x33b   : > { %v5046_v15 = vpop.eup %5045  ;;  %v3770_v44 = vadd.f32 1.0, %v5044_v50 }
 0x33c   : > { %v5048_v13 = vpop.eup %5047  ;;  %v3768_v48 = vadd.f32 1.0, %v5046_v15 }
 0x33d   : > { %v5050_v29 = vpop.eup %5049  ;;  %v3771_v35 = vadd.f32 1.0, %v5048_v13 }
 0x33e   : > { %5051 = vrcp.f32 %v3768_v48  ;;  %v3769_v51 = vadd.f32 1.0, %v5050_v29 }
 0x33f   : > { %5053 = vrcp.f32 %v3770_v44 }
 0x340   : > { %5055 = vrcp.f32 %v3769_v51 }
 0x341   : > { %5057 = vrcp.f32 %v3771_v35 }
 0x348   : > { %v5052_v4 = vpop.eup %5051 }
 0x349   : > { %v5054_v53 = vpop.eup %5053  ;;  %v3864_v7 = vmul.f32 %v5052_v4, %v3640_v10 }
 0x34a   : > { %v5056_v2 = vpop.eup %5055  ;;  %v3866_v0 = vmul.f32 %v5054_v53, %v3642_v24 }
 0x34b   : > { %v3895_v3 = vadd.f32 %v6716_v41, %v3864_v7  ;;  %v3865_v26 = vmul.f32 %v5056_v2, %v3641_v42  ;;  %v5058_v52 = vpop.eup %5057 }
 0x34c   : > { %v3867_v36 = vmul.f32 %v5058_v52, %v3643_v61 }
 0x34d   : > { %v3896_v22 = vadd.f32 %v3895_v3, %v3865_v26 }
 0x34f   : > { %v3897_v47 = vadd.f32 %v3896_v22, %v3866_v0 }
 0x351   : > { %v3898_v32 = vadd.f32 %v3897_v47, %v3867_v36 }
 0x359   : > { %v4593_v5 = vpop.f32.mrb[24].mxu1 }
 0x35a   : > { %v3607_v11 = vmul.f32 %v4593_v5, %v6587_v40  ;;  %v3543_v39 = vpop.f32.mrb[25].mxu1 }
 0x35b   : > { %v3605_v54 = vmul.f32 %v6587_v40, %v3543_v39  ;;  %v4594_v56 = vpop.f32.mrb[26].mxu1 }
 0x35c   : > { %v3646_v14 = vadd.f32 %v6594_v43, %v3607_v11  ;;  %v3608_v23 = vmul.f32 %v4594_v56, %v6587_v40  ;;  %v3546_v16 = vpop.f32.mrb[27].mxu1 }
 0x35d   : > { %v3644_v41 = vadd.f32 %v6594_v43, %v3605_v54  ;;  %v3606_v12 = vmul.f32 %v6587_v40, %v3546_v16 }
 0x35e   : > { %v4340_v8 = vmul.f32 -1.442695, %v3646_v14  ;;  %v3647_v55 = vadd.f32 %v6594_v43, %v3608_v23 }
 0x35f   : > { %v4338_v21 = vmul.f32 -1.442695, %v3644_v41  ;;  %v3645_v46 = vadd.f32 %v6594_v43, %v3606_v12 }
 0x360   : > { %5059 = vpow2.f32 %v4340_v8  ;;  %v4341_v18 = vmul.f32 -1.442695, %v3647_v55 }
 0x361   : > { %5061 = vpow2.f32 %v4338_v21  ;;  %v4339_v57 = vmul.f32 -1.442695, %v3645_v46 }
 0x362   : > { %5063 = vpow2.f32 %v4341_v18 }
 0x363   : > { %5065 = vpow2.f32 %v4339_v57  ;;  %v3931_v57 = vld [vmem:[%s6852_s11] sm:$0x1] }
 0x36a   : > { %v5060_v17 = vpop.eup %5059 }
 0x36b   : > { %v5062_v34 = vpop.eup %5061  ;;  %v3774_v24 = vadd.f32 1.0, %v5060_v17 }
 0x36c   : > { %v5064_v59 = vpop.eup %5063  ;;  %v3772_v19 = vadd.f32 1.0, %v5062_v34 }
 0x36d   : > { %v5066_v10 = vpop.eup %5065  ;;  %v3775_v49 = vadd.f32 1.0, %v5064_v59 }
 0x36e   : > { %5067 = vrcp.f32 %v3772_v19  ;;  %v3773_v60 = vadd.f32 1.0, %v5066_v10 }
 0x36f   : > { %5069 = vrcp.f32 %v3774_v24 }
 0x370   : > { %5071 = vrcp.f32 %v3773_v60 }
 0x371   : > { %5073 = vrcp.f32 %v3775_v49 }
 0x378   : > { %v5068_v61 = vpop.eup %5067 }
 0x379   : > { %v5070_v1 = vpop.eup %5069  ;;  %v3868_v30 = vmul.f32 %v5068_v61, %v3644_v41 }
 0x37a   : > { %v5072_v38 = vpop.eup %5071  ;;  %v3870_v25 = vmul.f32 %v5070_v1, %v3646_v14 }
 0x37b   : > { %v3899_v42 = vadd.f32 %v3898_v32, %v3868_v30  ;;  %v3869_v62 = vmul.f32 %v5072_v38, %v3645_v46  ;;  %v5074_v37 = vpop.eup %5073 }
 0x37c   : > { %v3871_v58 = vmul.f32 %v5074_v37, %v3647_v55 }
 0x37d   : > { %v3900_v45 = vadd.f32 %v3899_v42, %v3869_v62 }
 0x37f   : > { %v3901_v20 = vadd.f32 %v3900_v45, %v3870_v25 }
 0x381   : > { %v3902_v31 = vadd.f32 %v3901_v20, %v3871_v58 }
 0x388   : > { %v4597_v6 = vpop.f32.mrb[28].mxu1 }
 0x389   : > { %v3611_v9 = vmul.f32 %v4597_v6, %v6587_v40  ;;  %v3559_v27 = vpop.f32.mrb[29].mxu1 }
 0x38a   : > { %v3609_v33 = vmul.f32 %v6587_v40, %v3559_v27  ;;  %v4598_v28 = vpop.f32.mrb[30].mxu1 }
 0x38b   : > { %v3650_v63 = vadd.f32 %v6594_v43, %v3611_v9  ;;  %v3612_v50 = vmul.f32 %v4598_v28, %v6587_v40  ;;  %v3562_v15 = vpop.f32.mrb[31].mxu1 }
 0x38c   : > { %v3648_v44 = vadd.f32 %v6594_v43, %v3609_v33  ;;  %v3610_v13 = vmul.f32 %v6587_v40, %v3562_v15 }
 0x38d   : > { %v4344_v48 = vmul.f32 -1.442695, %v3650_v63  ;;  %v3651_v29 = vadd.f32 %v6594_v43, %v3612_v50 }
 0x38e   : > { %v4342_v35 = vmul.f32 -1.442695, %v3648_v44  ;;  %v3649_v51 = vadd.f32 %v6594_v43, %v3610_v13 }
 0x38f   : > { %5075 = vpow2.f32 %v4344_v48  ;;  %v4345_v4 = vmul.f32 -1.442695, %v3651_v29 }
 0x390   : > { %5077 = vpow2.f32 %v4342_v35  ;;  %v4343_v53 = vmul.f32 -1.442695, %v3649_v51 }
 0x391   : > { %5079 = vpow2.f32 %v4345_v4 }
 0x392   : > { %5081 = vpow2.f32 %v4343_v53 }
 0x399   : > { %v5076_v7 = vpop.eup %5075 }
 0x39a   : > { %v5078_v2 = vpop.eup %5077  ;;  %v3778_v3 = vadd.f32 1.0, %v5076_v7 }
 0x39b   : > { %v5080_v26 = vpop.eup %5079  ;;  %v3776_v52 = vadd.f32 1.0, %v5078_v2 }
 0x39c   : > { %v5082_v0 = vpop.eup %5081  ;;  %v3779_v40 = vadd.f32 1.0, %v5080_v26 }
 0x39d   : > { %5083 = vrcp.f32 %v3776_v52  ;;  %v3777_v22 = vadd.f32 1.0, %v5082_v0 }
 0x39e   : > { %5085 = vrcp.f32 %v3778_v3 }
 0x39f   : > { %5087 = vrcp.f32 %v3777_v22 }
 0x3a0   : > { %5089 = vrcp.f32 %v3779_v40 }
 0x3a7   : > { %v5084_v36 = vpop.eup %5083 }
 0x3a8   : > { %v5086_v43 = vpop.eup %5085  ;;  %v3872_v47 = vmul.f32 %v5084_v36, %v3648_v44 }
 0x3a9   : > { %v5088_v32 = vpop.eup %5087  ;;  %v3874_v54 = vmul.f32 %v5086_v43, %v3650_v63 }
 0x3aa   : > { %v3903_v5 = vadd.f32 %v3902_v31, %v3872_v47  ;;  %v3873_v11 = vmul.f32 %v5088_v32, %v3649_v51  ;;  %v5090_v39 = vpop.eup %5089 }
 0x3ab   : > { %v3875_v14 = vmul.f32 %v5090_v39, %v3651_v29 }
 0x3ac   : > { %v3904_v56 = vadd.f32 %v3903_v5, %v3873_v11 }
 0x3ae   : > { %v3905_v23 = vadd.f32 %v3904_v56, %v3874_v54 }
 0x3b0   : > { %v3906_v16 = vadd.f32 %v3905_v23, %v3875_v14 }
 0x3b2   : > { %v3907_v41 = vrot.slane %v3906_v16, 4 }
 0x3b4   : > { %v3908_v12 = vadd.f32 %v3907_v41, %v3906_v16 }
 0x3b6   : > { %v3909_v8 = vrot.slane %v3908_v12, 2 }
 0x3b8   : > { %v3910_v55 = vadd.f32 %v3909_v8, %v3908_v12 }
 0x3ba   : > { %v3911_v21 = vrot.slane %v3910_v55, 1 }
 0x3bc   : > { %v3912_v46 = vadd.f32 %v3911_v21, %v3910_v55 }
 0x3be   : > { %v3914_v18 = vmul.f32 0.00390625, %v3912_v46 }
 0x3c0   : > { %4632 = vmatmul.mubr.f32.vlgmr.msra.gmra.mrb[32].mxu0 %v3914_v18 }
 0x493   : > { %v3998_v17 = vpop.f32.mrb[32].mxu0 }
 0x494   : > { %v3999_v34 = vadd.f32 %v3998_v17, %v3931_v57  ;;  %v4633_v24 = vpop.f32.mrb[33].mxu0 }
 0x496   : > { %4003 = vst.msk [vmem:[%s405_s29] sm:$0x1] %vm4002_vm5, %v3999_v34 }
 0x497   : > { %5113 = shalt.err (!%p5110_p3)
}
 0x498   : > { %s5114_s19 = scalar_lea.hbm %s6799_s18, 16  ;;  %s5118_s16 = scalar_lea.hbm %s6853_s12, 32 }
 0x499   : > { %p5115_p4 = scmp.ne.s32.totalorder %s6799_s18, %s5114_s19  ;;  %p5119_p9 = scmp.lt.u32.totalorder %s6799_s18, %s6853_s12 }
 0x49a   : > { %p5120_p10 = scmp.lt.u32.totalorder %s5118_s16, %s5114_s19  ;;  %p5122_p12 = scmp.lt.u32.totalorder %s5114_s19, %s6799_s18 }
 0x49b   : > { %p5116_p7 = pnand %p5115_p4, %p5271_p5 }
 0x49c   : > { %p5121_p11 = por %p5120_p10, %p5119_p9 }
 0x49d   : > { %p5117_p8 = pneg %p5116_p7 }
 0x49e   : > { %p5123_p13 = por %p5122_p12, %p5121_p11 }
 0x4a0   : > { %p5124_p0 = pnand %p5123_p13, %p5117_p8 }
 0x4a2   : > { %5127 = shalt.err (!%p5124_p0)
}
 0x4a3   : > { %4659 = dma.vmem_to_hbm [thread:$0]  (%p5271_p5), %s6801_s15, 16, %s6799_s18, %s4005_s20  }
 0x4a4 PF: > { %p4665_p1 = scmp.ge.s32.totalorder %s5162_s24, 2  ;;  %s4029_s1 = sand.u32 1, %s5150_s21  }
 0x4a5   : > { %s4030_s26 = scalar_lea.sflag [#allocation3], %s4029_s1 }
 0x4a6   : > { %p4662_p2 = pnand %p4665_p1, %p5275_p6 }
 0x4a8   : > { %5145 = dma.done.wait (!%p4662_p2), %s4030_s26, 16  }
 0x4a9   : > { %5147 = vsyncadd (!%p4662_p2), %s4030_s26, 4294967280  ;;  %p22_p3 = scmp.ge.s32.totalorder %s5258_s27, 4   ;;  %s6860_s21 = smov %s5154_s22 }
 0x4aa   : > { %s6861_s22 = smov %s5158_s23  ;;  %s6862_s23 = smov %s5269_s30 }
 0x4ab   : > { %s6863_s24 = smov %s5258_s27  ;;  %24 = sbr.rel (!%p22_p3) target bundleno = 6 (0x6), region = 105 }
 0x4b2   :  { %4034 = vsyncpa [#allocation3], 1 }
 0x4b3   :  { %4036 = vsyncpa [#allocation3 + $0x1], 1 }

</bundles_post_ra>
